<compile_context>
chip_gen: v7x
topology: tpu7x:2x2x1
jax: 0.10.0
libtpu: 0.0.40
codegen_flags: <defaults>
</compile_context>

<pallas_src>
import functools

import jax
import jax.numpy as jnp
from jax.experimental import pallas as pl
from jax.experimental.pallas import tpu as pltpu


def _round_up(v, m):
    return ((v + m - 1) // m) * m


def _conv_out(s, k, st):
    return (s - k) // st + 1


# ----------------------------------------------------------------------------
# Kernel 1: conv GEMM  out = relu(x @ w + b), single full-extent K block.
# x: (tm, K) bf16, w: (K, 128) bf16, b: (1, 128) f32, out: (tm, 128) bf16.
# ----------------------------------------------------------------------------
def _gemm_bias_act_kernel(x_ref, w_ref, b_ref, o_ref, *, apply_relu):
    out = jnp.dot(x_ref[...], w_ref[...], preferred_element_type=jnp.float32)
    out = out + b_ref[...]
    if apply_relu:
        out = jnp.maximum(out, 0.0)
    o_ref[...] = out.astype(o_ref.dtype)


def conv_gemm(x_col, w_p, b_p, *, relu=True, out_dtype=jnp.bfloat16, tm_max=512):
    """x_col: (M, K) bf16; w_p: (K, Np) bf16 pre-padded; b_p: (1, Np) f32.

    K is not tiled (block K dim == full array dim, so no 128-padding needed).
    Returns (M, Np) in out_dtype (channels beyond the real OC are zero).
    """
    M, K = x_col.shape
    Kw, Np = w_p.shape
    assert K == Kw and Np % 128 == 0

    tm = min(tm_max, _round_up(M, 16))          # 16-aligned for bf16 packing
    grid = (pl.cdiv(M, tm), Np // 128)

    out_itemsize = 2 if out_dtype == jnp.bfloat16 else 4
    cost = pl.CostEstimate(
        flops=2 * M * Np * K,
        transcendentals=0,
        bytes_accessed=M * K * 2 * (Np // 128) + K * Np * 2 + M * Np * out_itemsize,
    )

    return pl.pallas_call(
        functools.partial(_gemm_bias_act_kernel, apply_relu=relu),
        out_shape=jax.ShapeDtypeStruct((M, Np), out_dtype),
        grid_spec=pltpu.PrefetchScalarGridSpec(
            num_scalar_prefetch=0,
            grid=grid,
            in_specs=[
                pl.BlockSpec((tm, K), lambda i, j: (i, 0)),
                pl.BlockSpec((K, 128), lambda i, j: (0, j)),
                pl.BlockSpec((1, 128), lambda i, j: (0, j)),
            ],
            out_specs=pl.BlockSpec((tm, 128), lambda i, j: (i, j)),
        ),
        compiler_params=pltpu.CompilerParams(
            dimension_semantics=("parallel", "parallel"),
            vmem_limit_bytes=48 << 20,
        ),
        cost_estimate=cost,
    )(x_col, w_p, b_p)


# ----------------------------------------------------------------------------
# Kernel 2: fused fc1+fc2.  K-reduction grid with VMEM accumulator; finalize
# computes h = relu(acc + b1) and the per-j partial logits h @ w2[j-block].
# Partials are summed (+ b2) outside the kernel (tiny).
# ----------------------------------------------------------------------------
def _fc_fused_kernel(x_ref, w1_ref, b1_ref, w2_ref, o_ref, acc_ref):
    k = pl.program_id(2)

    @pl.when(k == 0)
    def _():
        acc_ref[...] = jnp.zeros_like(acc_ref)

    acc_ref[...] += jnp.dot(x_ref[...], w1_ref[...],
                            preferred_element_type=jnp.float32)

    @pl.when(k == pl.num_programs(2) - 1)
    def _():
        h = jnp.maximum(acc_ref[...] + b1_ref[...], 0.0)        # (tm, tn) f32
        o_ref[...] = jnp.dot(h, w2_ref[...],                    # partial logits
                             preferred_element_type=jnp.float32)


def fc_fused(x_flat, w1_p, b1_p, w2_p, *, tk_max=4096):
    """x_flat: (B, K) bf16; w1_p: (Kp, H) bf16; b1_p: (1, H) f32; w2_p: (H, Ap) f32.

    Returns (grid_n, Mp, Ap) f32 partial logits; caller sums over axis 0,
    slices to (B, n_actions) and adds the fc2 bias.
    """
    B, K = x_flat.shape
    Kp, H = w1_p.shape
    Hw, Ap = w2_p.shape
    assert H == Hw and Kp % 128 == 0 and H % 128 == 0 and Ap % 128 == 0
    assert Kp >= K

    # Split the hidden dim in two so the j axis has extent 2 (both v7x TCs).
    tn = H // 2 if (H >= 512 and H % 256 == 0) else H
    # Largest 128-multiple tk that divides Kp, capped (weight tile <= ~2 MiB).
    units = Kp // 128
    tk = 128
    for t in range(min(units, tk_max // 128), 0, -1):
        if units % t == 0:
            tk = t * 128
            break

    Mp = _round_up(B, 16)
    tm = min(256, Mp)
    grid = (pl.cdiv(Mp, tm), H // tn, Kp // tk)

    xp = jnp.pad(x_flat, ((0, Mp - B), (0, Kp - K))).astype(jnp.bfloat16)

    cost = pl.CostEstimate(
        flops=2 * Mp * H * Kp + 2 * Mp * H * Ap,
        transcendentals=0,
        bytes_accessed=(Mp * Kp * 2 * grid[1] + Kp * H * 2 * grid[0]
                        + H * Ap * 4 * grid[0] + grid[1] * Mp * Ap * 4),
    )

    return pl.pallas_call(
        _fc_fused_kernel,
        out_shape=jax.ShapeDtypeStruct((grid[1], Mp, Ap), jnp.float32),
        grid_spec=pltpu.PrefetchScalarGridSpec(
            num_scalar_prefetch=0,
            grid=grid,
            in_specs=[
                pl.BlockSpec((tm, tk), lambda i, j, k: (i, k)),
                pl.BlockSpec((tk, tn), lambda i, j, k: (k, j)),
                pl.BlockSpec((1, tn), lambda i, j, k: (0, j)),
                pl.BlockSpec((tn, Ap), lambda i, j, k: (j, 0)),
            ],
            out_specs=pl.BlockSpec((None, tm, Ap), lambda i, j, k: (j, i, 0)),
            scratch_shapes=[pltpu.VMEM((tm, tn), jnp.float32)],
        ),
        compiler_params=pltpu.CompilerParams(
            dimension_semantics=("parallel", "parallel", "arbitrary"),
            vmem_limit_bytes=48 << 20,
        ),
        cost_estimate=cost,
    )(xp, w1_p, b1_p, w2_p)


# ----------------------------------------------------------------------------
# im2col glue in NHWC (pure indexing / reshape, no math) — stays bf16.
# ----------------------------------------------------------------------------
def _im2col_nhwc(x, k, stride):
    """x: (N, H, W, C) -> (N*OH*OW, KH*KW*C); column order (kh, kw, c)."""
    n, h, w, c = x.shape
    oh = (h - k) // stride + 1
    ow = (w - k) // stride + 1
    cols = []
    for kh in range(k):
        for kw in range(k):
            cols.append(x[:, kh:kh + stride * oh:stride,
                          kw:kw + stride * ow:stride, :])   # (N, OH, OW, C)
    col = jnp.stack(cols, axis=3)                            # (N, OH, OW, k*k, C)
    return col.reshape(n * oh * ow, k * k * c), oh, ow


def conv2d_relu_nhwc(x, w_p, b_p, *, n_real, k, stride):
    """NHWC conv via im2col + Pallas GEMM; returns bf16 NHWC activations."""
    n = x.shape[0]
    col, oh, ow = _im2col_nhwc(x, k, stride)                  # (M, K) bf16
    out = conv_gemm(col, w_p, b_p, relu=True)                 # (M, Np) bf16
    # slice padded channels + reshape (single XLA copy, tiny vs. GEMM traffic)
    return out[:, :n_real].reshape(n, oh, ow, n_real)


# ----------------------------------------------------------------------------
# One-time parameter conversion: PyTorch layout -> padded bf16 GEMM layout.
# ----------------------------------------------------------------------------
def _fc1_padded_k(K, cap=4096):
    """Pad fc1's K so a tk in [2048, cap] (or K itself when small) divides it."""
    kp0 = _round_up(K, 128)
    units = kp0 // 128
    cap_u = cap // 128
    if units <= cap_u:
        return kp0
    best_key, best_kp = None, None
    for t in range(cap_u // 2, cap_u + 1):
        steps = -(-units // t)
        key = (steps * t - units, -t)          # minimize padding, prefer big tk
        if best_key is None or key < best_key:
            best_key, best_kp = key, steps * t * 128
    return best_kp


def convert_params_for_tpu(params, in_h, in_w):
    h1, w1 = _conv_out(in_h, 8, 4), _conv_out(in_w, 8, 4)
    h2, w2 = _conv_out(h1, 4, 2), _conv_out(w1, 4, 2)
    h3, w3 = _conv_out(h2, 3, 1), _conv_out(w2, 3, 1)

    def prep_conv(w_oihw, b, scale=1.0):
        # (OC, C, KH, KW) -> (KH*KW*C, OC) rows matching the im2col columns.
        oc = w_oihw.shape[0]
        wg = (w_oihw * scale).transpose(2, 3, 1, 0).reshape(-1, oc)
        npad = _round_up(oc, 128)
        wp = jnp.pad(wg, ((0, 0), (0, npad - oc))).astype(jnp.bfloat16)
        bp = jnp.pad(b.astype(jnp.float32), (0, npad - oc)).reshape(1, npad)
        return wp, bp

    # Fold the /255 input normalization into conv1's weights.
    w1g, b1p = prep_conv(params["w1"], params["b1"], scale=1.0 / 255.0)
    w2g, b2p = prep_conv(params["w2"], params["b2"])
    w3g, b3p = prep_conv(params["w3"], params["b3"])

    c3 = params["w3"].shape[0]
    hid = params["wf1"].shape[1]
    flat = c3 * h3 * w3
    # fc1 rows: PyTorch NCHW-flatten (c,h,w) order -> NHWC-flatten (h,w,c) order.
    wf1_hwc = (params["wf1"].reshape(c3, h3, w3, hid)
               .transpose(1, 2, 0, 3).reshape(flat, hid))
    kp = _fc1_padded_k(flat)
    hp = _round_up(hid, 128)
    wf1g = jnp.pad(wf1_hwc, ((0, kp - flat), (0, hp - hid))).astype(jnp.bfloat16)
    bf1p = jnp.pad(params["bf1"].astype(jnp.float32), (0, hp - hid)).reshape(1, hp)

    n_act = params["wf2"].shape[1]
    ap = _round_up(n_act, 128)
    wf2g = jnp.pad(params["wf2"].astype(jnp.float32),
                   ((0, hp - hid), (0, ap - n_act)))          # f32: final logits

    return {
        "w1g": w1g, "b1p": b1p,
        "w2g": w2g, "b2p": b2p,
        "w3g": w3g, "b3p": b3p,
        "wf1g": wf1g, "bf1p": bf1p,
        "wf2g": wf2g, "bf2": params["bf2"].astype(jnp.float32),
    }


# ----------------------------------------------------------------------------
# MarioCNN forward (Pallas) and a pure-JAX reference for verification.
# ----------------------------------------------------------------------------
def mario_cnn_forward(x, p):
    # x: (N, 3, H, W) raw pixels in [0, 255]; /255 is folded into w1g.
    x = jnp.transpose(x, (0, 2, 3, 1)).astype(jnp.bfloat16)   # NCHW -> NHWC once
    x = conv2d_relu_nhwc(x, p["w1g"], p["b1p"], n_real=32, k=8, stride=4)
    x = conv2d_relu_nhwc(x, p["w2g"], p["b2p"], n_real=64, k=4, stride=2)
    x = conv2d_relu_nhwc(x, p["w3g"], p["b3p"], n_real=64, k=3, stride=1)
    b = x.shape[0]
    x = x.reshape(b, -1)                 # NHWC flatten; wf1g rows pre-permuted
    partial = fc_fused(x, p["wf1g"], p["bf1p"], p["wf2g"])    # (nj, Mp, Ap) f32
    n_actions = p["bf2"].shape[0]
    return partial.sum(axis=0)[:b, :n_actions] + p["bf2"]


def mario_cnn_reference(x, params):
    """Pure-XLA reference following the PyTorch module exactly (f32)."""
    x = x / 255.0

    def conv(x, w, b, stride):
        y = jax.lax.conv_general_dilated(
            x, w, window_strides=(stride, stride), padding="VALID",
            dimension_numbers=("NCHW", "OIHW", "NCHW"))
        return jax.nn.relu(y + b[None, :, None, None])

    x = conv(x, params["w1"], params["b1"], 4)
    x = conv(x, params["w2"], params["b2"], 2)
    x = conv(x, params["w3"], params["b3"], 1)
    x = x.reshape(x.shape[0], -1)                             # NCHW flatten
    x = jax.nn.relu(x @ params["wf1"] + params["bf1"])
    return x @ params["wf2"] + params["bf2"]


def init_params(key, n_actions, in_h, in_w):
    """Deterministic synthetic init; shapes follow MarioCNN.__init__ (PyTorch layout)."""
    h1, w1 = _conv_out(in_h, 8, 4), _conv_out(in_w, 8, 4)
    h2, w2 = _conv_out(h1, 4, 2), _conv_out(w1, 4, 2)
    h3, w3 = _conv_out(h2, 3, 1), _conv_out(w2, 3, 1)
    flat_size = 64 * h3 * w3

    ks = jax.random.split(key, 10)
    scale = 0.05
    return {
        "w1": scale * jax.random.normal(ks[0], (32, 3, 8, 8), jnp.float32),
        "b1": scale * jax.random.normal(ks[1], (32,), jnp.float32),
        "w2": scale * jax.random.normal(ks[2], (64, 32, 4, 4), jnp.float32),
        "b2": scale * jax.random.normal(ks[3], (64,), jnp.float32),
        "w3": scale * jax.random.normal(ks[4], (64, 64, 3, 3), jnp.float32),
        "b3": scale * jax.random.normal(ks[5], (64,), jnp.float32),
        # Linear weights stored already transposed: (in, out); wf1 rows follow
        # PyTorch's NCHW (C-major) flatten order.
        "wf1": scale * jax.random.normal(ks[6], (flat_size, 512), jnp.float32),
        "bf1": scale * jax.random.normal(ks[7], (512,), jnp.float32),
        "wf2": scale * jax.random.normal(ks[8], (512, n_actions), jnp.float32),
        "bf2": scale * jax.random.normal(ks[9], (n_actions,), jnp.float32),
    }


if __name__ == "__main__":
    # Small shapes consistent with the module: NCHW input, 3 channels.
    # (Full Mario obs is (1, 3, 240, 256); 64x64 here keeps the test fast —
    #  flat_size is recomputed from the actual spatial dims, as __init__ does.)
    N, C, H, W = 2, 3, 64, 64
    n_actions = 7  # len(SIMPLE_MOVEMENT)

    key = jax.random.PRNGKey(0)
    k_x, k_p = jax.random.split(key)
    x = jax.random.uniform(k_x, (N, C, H, W), jnp.float32, minval=0.0, maxval=255.0)

    torch_params = init_params(k_p, n_actions, H, W)
    tpu_params = convert_params_for_tpu(torch_params, H, W)

    fwd = jax.jit(mario_cnn_forward)
    out = fwd(x, tpu_params)
    jax.block_until_ready(out)
    assert out.shape == (N, n_actions), out.shape

    # Correctness: compare against the pure-XLA f32 reference with a relative
    # tolerance (bf16 operands + folded 1/255 -> small compounded error).
    ref = jax.jit(mario_cnn_reference)(x, torch_params)
    jax.block_until_ready(ref)
    max_abs = float(jnp.max(jnp.abs(out - ref)))
    ref_scale = float(jnp.max(jnp.abs(ref)))
    assert max_abs <= 2e-2 + 5e-2 * ref_scale, (
        f"mismatch vs reference: max_abs={max_abs}, ref_scale={ref_scale}")

    print("KERNEL_OK")
</pallas_src>

<mosaic_0001>
module attributes {stable_mosaic.version = 11 : i64} {
  func.func @_gemm_bias_act_kernel(%arg0: i32, %arg1: i32, %arg2: memref<464x192xbf16, #tpu.memory_space<vmem>>, %arg3: memref<192x128xbf16, #tpu.memory_space<vmem>>, %arg4: memref<1x128xf32, #tpu.memory_space<vmem>>, %arg5: memref<464x128xbf16, #tpu.memory_space<vmem>>) attributes {dimension_semantics = [#tpu.dimension_semantics<parallel>, #tpu.dimension_semantics<parallel>], iteration_bounds = array<i64: 1, 1>, scalar_prefetch = 0 : i64, scratch_operands = 0 : i64, tpu.core_type = #tpu.core_type<tc>, window_params = [{transform_indices = @transform_0, window_bounds = array<i64: 464, 192>}, {transform_indices = @transform_1, window_bounds = array<i64: 192, 128>}, {transform_indices = @transform_2, window_bounds = array<i64: 1, 128>}, {transform_indices = @transform_3, window_bounds = array<i64: 464, 128>}]} {
    %c0 = arith.constant 0 : index
    %c0_0 = arith.constant 0 : index
    %0 = vector.load %arg2[%c0, %c0_0] : memref<464x192xbf16, #tpu.memory_space<vmem>>, vector<464x192xbf16>
    %c0_1 = arith.constant 0 : index
    %c0_2 = arith.constant 0 : index
    %1 = vector.load %arg3[%c0_1, %c0_2] : memref<192x128xbf16, #tpu.memory_space<vmem>>, vector<192x128xbf16>
    %cst = arith.constant dense<0.000000e+00> : vector<464x128xf32>
    %2 = tpu.matmul %0, %1, %cst {dimension_numbers = #tpu.dot_dimension_numbers<[1], [0], [0], [1], [0, 0, 1, 1], [], []>} : vector<464x192xbf16>, vector<192x128xbf16>, vector<464x128xf32> -> vector<464x128xf32>
    %c0_3 = arith.constant 0 : index
    %c0_4 = arith.constant 0 : index
    %3 = vector.load %arg4[%c0_3, %c0_4] : memref<1x128xf32, #tpu.memory_space<vmem>>, vector<1x128xf32>
    %4 = vector.broadcast %3 : vector<1x128xf32> to vector<464x128xf32>
    %5 = arith.addf %2, %4 : vector<464x128xf32>
    %cst_5 = arith.constant 0.000000e+00 : f32
    %6 = vector.broadcast %cst_5 : f32 to vector<464x128xf32>
    %7 = arith.maximumf %5, %6 : vector<464x128xf32>
    %8 = arith.truncf %7 : vector<464x128xf32> to vector<464x128xbf16>
    %c0_6 = arith.constant 0 : index
    %c0_7 = arith.constant 0 : index
    %9 = vector.load %arg5[%c0_6, %c0_7] : memref<464x128xbf16, #tpu.memory_space<vmem>>, vector<464x128xbf16>
    tpu.vector_store %arg5[%c0_6, %c0_7], %8 {strides = array<i32>} : memref<464x128xbf16, #tpu.memory_space<vmem>>, vector<464x128xbf16>,
    return
  }
  func.func @transform_0(%arg0: i32, %arg1: i32) -> (i32, i32) {
    %c0_i32 = arith.constant 0 : i32
    %c0_i32_0 = arith.constant 0 : i32
    return %arg0, %c0_i32 : i32, i32
  }
  func.func @transform_1(%arg0: i32, %arg1: i32) -> (i32, i32) {
    %c0_i32 = arith.constant 0 : i32
    %c0_i32_0 = arith.constant 0 : i32
    return %c0_i32, %arg1 : i32, i32
  }
  func.func @transform_2(%arg0: i32, %arg1: i32) -> (i32, i32) {
    %c0_i32 = arith.constant 0 : i32
    %c0_i32_0 = arith.constant 0 : i32
    return %c0_i32, %arg1 : i32, i32
  }
  func.func @transform_3(%arg0: i32, %arg1: i32) -> (i32, i32) {
    %c0_i32 = arith.constant 0 : i32
    return %arg0, %arg1 : i32, i32
  }
}

module attributes {stable_mosaic.version = 11 : i64} {
  func.func @_gemm_bias_act_kernel(%arg0: i32, %arg1: i32, %arg2: memref<80x512xbf16, #tpu.memory_space<vmem>>, %arg3: memref<512x128xbf16, #tpu.memory_space<vmem>>, %arg4: memref<1x128xf32, #tpu.memory_space<vmem>>, %arg5: memref<80x128xbf16, #tpu.memory_space<vmem>>) attributes {dimension_semantics = [#tpu.dimension_semantics<parallel>, #tpu.dimension_semantics<parallel>], iteration_bounds = array<i64: 1, 1>, scalar_prefetch = 0 : i64, scratch_operands = 0 : i64, tpu.core_type = #tpu.core_type<tc>, window_params = [{transform_indices = @transform_0, window_bounds = array<i64: 80, 512>}, {transform_indices = @transform_1, window_bounds = array<i64: 512, 128>}, {transform_indices = @transform_2, window_bounds = array<i64: 1, 128>}, {transform_indices = @transform_3, window_bounds = array<i64: 80, 128>}]} {
    %c0 = arith.constant 0 : index
    %c0_0 = arith.constant 0 : index
    %0 = vector.load %arg2[%c0, %c0_0] : memref<80x512xbf16, #tpu.memory_space<vmem>>, vector<80x512xbf16>
    %c0_1 = arith.constant 0 : index
    %c0_2 = arith.constant 0 : index
    %1 = vector.load %arg3[%c0_1, %c0_2] : memref<512x128xbf16, #tpu.memory_space<vmem>>, vector<512x128xbf16>
    %cst = arith.constant dense<0.000000e+00> : vector<80x128xf32>
    %2 = tpu.matmul %0, %1, %cst {dimension_numbers = #tpu.dot_dimension_numbers<[1], [0], [0], [1], [0, 0, 1, 1], [], []>} : vector<80x512xbf16>, vector<512x128xbf16>, vector<80x128xf32> -> vector<80x128xf32>
    %c0_3 = arith.constant 0 : index
    %c0_4 = arith.constant 0 : index
    %3 = vector.load %arg4[%c0_3, %c0_4] : memref<1x128xf32, #tpu.memory_space<vmem>>, vector<1x128xf32>
    %4 = vector.broadcast %3 : vector<1x128xf32> to vector<80x128xf32>
    %5 = arith.addf %2, %4 : vector<80x128xf32>
    %cst_5 = arith.constant 0.000000e+00 : f32
    %6 = vector.broadcast %cst_5 : f32 to vector<80x128xf32>
    %7 = arith.maximumf %5, %6 : vector<80x128xf32>
    %8 = arith.truncf %7 : vector<80x128xf32> to vector<80x128xbf16>
    %c0_6 = arith.constant 0 : index
    %c0_7 = arith.constant 0 : index
    %9 = vector.load %arg5[%c0_6, %c0_7] : memref<80x128xbf16, #tpu.memory_space<vmem>>, vector<80x128xbf16>
    tpu.vector_store %arg5[%c0_6, %c0_7], %8 {strides = array<i32>} : memref<80x128xbf16, #tpu.memory_space<vmem>>, vector<80x128xbf16>,
    return
  }
  func.func @transform_0(%arg0: i32, %arg1: i32) -> (i32, i32) {
    %c0_i32 = arith.constant 0 : i32
    %c0_i32_0 = arith.constant 0 : i32
    return %arg0, %c0_i32 : i32, i32
  }
  func.func @transform_1(%arg0: i32, %arg1: i32) -> (i32, i32) {
    %c0_i32 = arith.constant 0 : i32
    %c0_i32_0 = arith.constant 0 : i32
    return %c0_i32, %arg1 : i32, i32
  }
  func.func @transform_2(%arg0: i32, %arg1: i32) -> (i32, i32) {
    %c0_i32 = arith.constant 0 : i32
    %c0_i32_0 = arith.constant 0 : i32
    return %c0_i32, %arg1 : i32, i32
  }
  func.func @transform_3(%arg0: i32, %arg1: i32) -> (i32, i32) {
    %c0_i32 = arith.constant 0 : i32
    return %arg0, %arg1 : i32, i32
  }
}

module attributes {stable_mosaic.version = 11 : i64} {
  func.func @_gemm_bias_act_kernel(%arg0: i32, %arg1: i32, %arg2: memref<32x576xbf16, #tpu.memory_space<vmem>>, %arg3: memref<576x128xbf16, #tpu.memory_space<vmem>>, %arg4: memref<1x128xf32, #tpu.memory_space<vmem>>, %arg5: memref<32x128xbf16, #tpu.memory_space<vmem>>) attributes {dimension_semantics = [#tpu.dimension_semantics<parallel>, #tpu.dimension_semantics<parallel>], iteration_bounds = array<i64: 1, 1>, scalar_prefetch = 0 : i64, scratch_operands = 0 : i64, tpu.core_type = #tpu.core_type<tc>, window_params = [{transform_indices = @transform_0, window_bounds = array<i64: 32, 576>}, {transform_indices = @transform_1, window_bounds = array<i64: 576, 128>}, {transform_indices = @transform_2, window_bounds = array<i64: 1, 128>}, {transform_indices = @transform_3, window_bounds = array<i64: 32, 128>}]} {
    %c0 = arith.constant 0 : index
    %c0_0 = arith.constant 0 : index
    %0 = vector.load %arg2[%c0, %c0_0] : memref<32x576xbf16, #tpu.memory_space<vmem>>, vector<32x576xbf16>
    %c0_1 = arith.constant 0 : index
    %c0_2 = arith.constant 0 : index
    %1 = vector.load %arg3[%c0_1, %c0_2] : memref<576x128xbf16, #tpu.memory_space<vmem>>, vector<576x128xbf16>
    %cst = arith.constant dense<0.000000e+00> : vector<32x128xf32>
    %2 = tpu.matmul %0, %1, %cst {dimension_numbers = #tpu.dot_dimension_numbers<[1], [0], [0], [1], [0, 0, 1, 1], [], []>} : vector<32x576xbf16>, vector<576x128xbf16>, vector<32x128xf32> -> vector<32x128xf32>
    %c0_3 = arith.constant 0 : index
    %c0_4 = arith.constant 0 : index
    %3 = vector.load %arg4[%c0_3, %c0_4] : memref<1x128xf32, #tpu.memory_space<vmem>>, vector<1x128xf32>
    %4 = vector.broadcast %3 : vector<1x128xf32> to vector<32x128xf32>
    %5 = arith.addf %2, %4 : vector<32x128xf32>
    %cst_5 = arith.constant 0.000000e+00 : f32
    %6 = vector.broadcast %cst_5 : f32 to vector<32x128xf32>
    %7 = arith.maximumf %5, %6 : vector<32x128xf32>
    %8 = arith.truncf %7 : vector<32x128xf32> to vector<32x128xbf16>
    %c0_6 = arith.constant 0 : index
    %c0_7 = arith.constant 0 : index
    %9 = vector.load %arg5[%c0_6, %c0_7] : memref<32x128xbf16, #tpu.memory_space<vmem>>, vector<32x128xbf16>
    tpu.vector_store %arg5[%c0_6, %c0_7], %8 {strides = array<i32>} : memref<32x128xbf16, #tpu.memory_space<vmem>>, vector<32x128xbf16>,
    return
  }
  func.func @transform_0(%arg0: i32, %arg1: i32) -> (i32, i32) {
    %c0_i32 = arith.constant 0 : i32
    %c0_i32_0 = arith.constant 0 : i32
    return %arg0, %c0_i32 : i32, i32
  }
  func.func @transform_1(%arg0: i32, %arg1: i32) -> (i32, i32) {
    %c0_i32 = arith.constant 0 : i32
    %c0_i32_0 = arith.constant 0 : i32
    return %c0_i32, %arg1 : i32, i32
  }
  func.func @transform_2(%arg0: i32, %arg1: i32) -> (i32, i32) {
    %c0_i32 = arith.constant 0 : i32
    %c0_i32_0 = arith.constant 0 : i32
    return %c0_i32, %arg1 : i32, i32
  }
  func.func @transform_3(%arg0: i32, %arg1: i32) -> (i32, i32) {
    %c0_i32 = arith.constant 0 : i32
    return %arg0, %arg1 : i32, i32
  }
}

module attributes {stable_mosaic.version = 11 : i64} {
  func.func @_fc_fused_kernel(%arg0: i32, %arg1: i32, %arg2: i32, %arg3: memref<16x1024xbf16, #tpu.memory_space<vmem>>, %arg4: memref<1024x256xbf16, #tpu.memory_space<vmem>>, %arg5: memref<1x256xf32, #tpu.memory_space<vmem>>, %arg6: memref<256x128xf32, #tpu.memory_space<vmem>>, %arg7: memref<1x16x128xf32, #tpu.memory_space<vmem>>, %arg8: memref<16x256xf32, #tpu.memory_space<vmem>>) attributes {dimension_semantics = [#tpu.dimension_semantics<parallel>, #tpu.dimension_semantics<parallel>, #tpu.dimension_semantics<arbitrary>], iteration_bounds = array<i64: 1, 2, 1>, scalar_prefetch = 0 : i64, scratch_operands = 1 : i64, tpu.core_type = #tpu.core_type<tc>, window_params = [{transform_indices = @transform_0, window_bounds = array<i64: 16, 1024>}, {transform_indices = @transform_1, window_bounds = array<i64: 1024, 256>}, {transform_indices = @transform_2, window_bounds = array<i64: 1, 256>}, {transform_indices = @transform_3, window_bounds = array<i64: 256, 128>}, {transform_indices = @transform_4, window_bounds = array<i64: 1, 16, 128>}]} {
    %c0_i32 = arith.constant 0 : i32
    %0 = arith.cmpi eq, %arg2, %c0_i32 : i32
    %1 = arith.extui %0 : i1 to i32
    %c0_i32_0 = arith.constant 0 : i32
    %2 = arith.cmpi ne, %1, %c0_i32_0 : i32
    scf.if %2 {
      %cst_10 = arith.constant 0.000000e+00 : f32
      %12 = vector.broadcast %cst_10 : f32 to vector<16x256xf32>
      %c0_11 = arith.constant 0 : index
      %c0_12 = arith.constant 0 : index
      %13 = vector.load %arg8[%c0_11, %c0_12] : memref<16x256xf32, #tpu.memory_space<vmem>>, vector<16x256xf32>
      tpu.vector_store %arg8[%c0_11, %c0_12], %12 {strides = array<i32>} : memref<16x256xf32, #tpu.memory_space<vmem>>, vector<16x256xf32>,
    } else {
    }
    %c0 = arith.constant 0 : index
    %c0_1 = arith.constant 0 : index
    %3 = vector.load %arg8[%c0, %c0_1] : memref<16x256xf32, #tpu.memory_space<vmem>>, vector<16x256xf32>
    %c0_2 = arith.constant 0 : index
    %c0_3 = arith.constant 0 : index
    %4 = vector.load %arg3[%c0_2, %c0_3] : memref<16x1024xbf16, #tpu.memory_space<vmem>>, vector<16x1024xbf16>
    %c0_4 = arith.constant 0 : index
    %c0_5 = arith.constant 0 : index
    %5 = vector.load %arg4[%c0_4, %c0_5] : memref<1024x256xbf16, #tpu.memory_space<vmem>>, vector<1024x256xbf16>
    %cst = arith.constant dense<0.000000e+00> : vector<16x256xf32>
    %6 = tpu.matmul %4, %5, %cst {dimension_numbers = #tpu.dot_dimension_numbers<[1], [0], [0], [1], [0, 0, 1, 1], [], []>} : vector<16x1024xbf16>, vector<1024x256xbf16>, vector<16x256xf32> -> vector<16x256xf32>
    %7 = arith.addf %3, %6 : vector<16x256xf32>
    %c0_6 = arith.constant 0 : index
    %c0_7 = arith.constant 0 : index
    %8 = vector.load %arg8[%c0_6, %c0_7] : memref<16x256xf32, #tpu.memory_space<vmem>>, vector<16x256xf32>
    tpu.vector_store %arg8[%c0_6, %c0_7], %7 {strides = array<i32>} : memref<16x256xf32, #tpu.memory_space<vmem>>, vector<16x256xf32>,
    %c0_i32_8 = arith.constant 0 : i32
    %9 = arith.cmpi eq, %arg2, %c0_i32_8 : i32
    %10 = arith.extui %9 : i1 to i32
    %c0_i32_9 = arith.constant 0 : i32
    %11 = arith.cmpi ne, %10, %c0_i32_9 : i32
    scf.if %11 {
      %c0_10 = arith.constant 0 : index
      %c0_11 = arith.constant 0 : index
      %12 = vector.load %arg8[%c0_10, %c0_11] : memref<16x256xf32, #tpu.memory_space<vmem>>, vector<16x256xf32>
      %c0_12 = arith.constant 0 : index
      %c0_13 = arith.constant 0 : index
      %13 = vector.load %arg5[%c0_12, %c0_13] : memref<1x256xf32, #tpu.memory_space<vmem>>, vector<1x256xf32>
      %14 = vector.broadcast %13 : vector<1x256xf32> to vector<16x256xf32>
      %15 = arith.addf %12, %14 : vector<16x256xf32>
      %cst_14 = arith.constant 0.000000e+00 : f32
      %16 = vector.broadcast %cst_14 : f32 to vector<16x256xf32>
      %17 = arith.maximumf %15, %16 : vector<16x256xf32>
      %c0_15 = arith.constant 0 : index
      %c0_16 = arith.constant 0 : index
      %18 = vector.load %arg6[%c0_15, %c0_16] : memref<256x128xf32, #tpu.memory_space<vmem>>, vector<256x128xf32>
      %cst_17 = arith.constant dense<0.000000e+00> : vector<16x128xf32>
      %19 = tpu.matmul %17, %18, %cst_17 {dimension_numbers = #tpu.dot_dimension_numbers<[1], [0], [0], [1], [0, 0, 1, 1], [], []>} : vector<16x256xf32>, vector<256x128xf32>, vector<16x128xf32> -> vector<16x128xf32>
      %c0_18 = arith.constant 0 : index
      %c0_19 = arith.constant 0 : index
      %c0_20 = arith.constant 0 : index
      %20 = vector.load %arg7[%c0_18, %c0_19, %c0_20] : memref<1x16x128xf32, #tpu.memory_space<vmem>>, vector<1x16x128xf32>
      %21 = vector.shape_cast %20 : vector<1x16x128xf32> to vector<16x128xf32>
      %22 = vector.shape_cast %19 : vector<16x128xf32> to vector<1x16x128xf32>
      tpu.vector_store %arg7[%c0_18, %c0_19, %c0_20], %22 {strides = array<i32>} : memref<1x16x128xf32, #tpu.memory_space<vmem>>, vector<1x16x128xf32>,
    } else {
    }
    return
  }
  func.func @transform_0(%arg0: i32, %arg1: i32, %arg2: i32) -> (i32, i32) {
    %c0_i32 = arith.constant 0 : i32
    return %arg0, %arg2 : i32, i32
  }
  func.func @transform_1(%arg0: i32, %arg1: i32, %arg2: i32) -> (i32, i32) {
    %c0_i32 = arith.constant 0 : i32
    return %arg2, %arg1 : i32, i32
  }
  func.func @transform_2(%arg0: i32, %arg1: i32, %arg2: i32) -> (i32, i32) {
    %c0_i32 = arith.constant 0 : i32
    %c0_i32_0 = arith.constant 0 : i32
    return %c0_i32, %arg1 : i32, i32
  }
  func.func @transform_3(%arg0: i32, %arg1: i32, %arg2: i32) -> (i32, i32) {
    %c0_i32 = arith.constant 0 : i32
    %c0_i32_0 = arith.constant 0 : i32
    return %arg1, %c0_i32 : i32, i32
  }
  func.func @transform_4(%arg0: i32, %arg1: i32, %arg2: i32) -> (i32, i32, i32) {
    %c0_i32 = arith.constant 0 : i32
    %c0_i32_0 = arith.constant 0 : i32
    return %arg1, %arg0, %c0_i32 : i32, i32, i32
  }
}

</mosaic_0001>

<bundles_post_ra>
// kernel: mario_cnn_forward.4
= control target key start
LH: loop header
LB: loop body
LE: loop exit
PB: predicated region body
PF: predicated region fallthrough
CT: control target
= control target key end

     0   :  { %v1922_v1 = vmov 0   ;;  %vm437_vm0 = vcmask 523264   ;;  %s2332_s0 = inlined_call_operand.vmem [shape: bf16[450,192], index: 0, kind: input, shape index: {}]   ;;  %s2333_s1 = inlined_call_operand.vmem [shape: bf16[192,128], index: 1, kind: input, shape index: {}]   ;;  %s2334_s2 = inlined_call_operand.vmem [shape: f32[1,128], index: 2, kind: input, shape index: {}]   ;;  %s2335_s3 = inlined_call_operand.vmem [shape: bf16[450,128], index: 3, kind: output, shape index: {}]  }
   0x1   :  { %v1823_v0 = vld [vmem:[%s2333_s1] sm:$0xff]   ;;  %525 = vmatprep.subr.bf16.mxu0 %v1922_v1  ;;  %1798 = vmatprep.subr.bf16.mxu1 %v1922_v1  ;;  %v1824_v2 = vld [vmem:[%s2333_s1 + $0x8] sm:$0xff]   ;;  %v1825_v3 = vld [vmem:[%s2333_s1 + $0x10] sm:$0xff]  }
   0x2   :  { %526 = vmatpush1.bf16.msra.mxu0 %v1823_v0  ;;  %1810 = vmatpush1.bf16.msra.mxu1 %v1823_v0  ;;  %v1826_v4 = vld [vmem:[%s2333_s1 + $0x18] sm:$0xff]   ;;  %v1837_v5 = vld [vmem:[%s2332_s0 + $0x4] ss:$8 sps:$4 sm:$0xff]   ;;  %v1829_v9 = vld [vmem:[%s2333_s1 + $0x30] sm:$0xff]  }
   0x3   :  { %527 = vmatprep.subr.bf16.mxu0 %v1922_v1  ;;  %1799 = vmatprep.subr.bf16.mxu1 %v1922_v1  ;;  %v1827_v6 = vld [vmem:[%s2333_s1 + $0x20] sm:$0xff]   ;;  %v1840_v7 = vld [vmem:[%s2332_s0 + $0xf4] ss:$8 sps:$4 sm:$0xff]   ;;  %v1828_v8 = vld [vmem:[%s2333_s1 + $0x28] sm:$0xff]  }
   0x4   :  { %1480 = vmatprep.mubr.msk.bf16.mxu0 %vm437_vm0, %v1837_v5  ;;  %1495 = vmatprep.mubr.msk.bf16.mxu1 %vm437_vm0, %v1840_v7  ;;  %v1830_v10 = vld [vmem:[%s2333_s1 + $0x38] sm:$0xff]   ;;  %v1831_v11 = vld [vmem:[%s2333_s1 + $0x40] sm:$0xff]   ;;  %v1832_v12 = vld [vmem:[%s2333_s1 + $0x48] sm:$0xff]  }
   0x5   :  { %v1833_v13 = vld [vmem:[%s2333_s1 + $0x50] sm:$0xff]   ;;  %v1834_v14 = vld [vmem:[%s2333_s1 + $0x58] sm:$0xff]   ;;  %v1835_v15 = vld [vmem:[%s2332_s0] ss:$8 sps:$4 sm:$0xff]  }
   0x6   :  { %528 = vmatpush1.bf16.msra.mxu0 %v1824_v2  ;;  %1811 = vmatpush1.bf16.msra.mxu1 %v1824_v2  ;;  %v1838_v16 = vld [vmem:[%s2332_s0 + $0xf0] ss:$8 sps:$4 sm:$0xff]   ;;  %v1841_v17 = vld [vmem:[%s2332_s0 + $0x14] ss:$8 sps:$4 sm:$0xff]   ;;  %v1844_v18 = vld [vmem:[%s2332_s0 + $0x104] ss:$8 sps:$4 sm:$0xff]  }
   0x7   :  { %529 = vmatprep.subr.bf16.mxu0 %v1922_v1  ;;  %1800 = vmatprep.subr.bf16.mxu1 %v1922_v1  ;;  %v1843_v19 = vld [vmem:[%s2332_s0 + $0x10] ss:$8 sps:$4 sm:$0xff]   ;;  %v1846_v20 = vld [vmem:[%s2332_s0 + $0x100] ss:$8 sps:$4 sm:$0xff]   ;;  %v1847_v21 = vld [vmem:[%s2332_s0 + $0x24] ss:$8 sps:$4 sm:$0xff]  }
   0x8   :  { %v1850_v22 = vld [vmem:[%s2332_s0 + $0x114] ss:$8 sps:$4 sm:$0xff]   ;;  %v1849_v23 = vld [vmem:[%s2332_s0 + $0x20] ss:$8 sps:$4 sm:$0xff]   ;;  %v1852_v24 = vld [vmem:[%s2332_s0 + $0x110] ss:$8 sps:$4 sm:$0xff]  }
   0x9   :  { %v1853_v25 = vld [vmem:[%s2332_s0 + $0x34] ss:$8 sps:$4 sm:$0xff]   ;;  %v1856_v26 = vld [vmem:[%s2332_s0 + $0x124] ss:$8 sps:$4 sm:$0xff]   ;;  %v1855_v27 = vld [vmem:[%s2332_s0 + $0x30] ss:$8 sps:$4 sm:$0xff]  }
   0xa   :  { %530 = vmatpush1.bf16.msra.mxu0 %v1825_v3  ;;  %1812 = vmatpush1.bf16.msra.mxu1 %v1825_v3  ;;  %v1858_v28 = vld [vmem:[%s2332_s0 + $0x120] ss:$8 sps:$4 sm:$0xff]   ;;  %v1859_v29 = vld [vmem:[%s2332_s0 + $0x44] ss:$8 sps:$4 sm:$0xff]   ;;  %v1862_v30 = vld [vmem:[%s2332_s0 + $0x134] ss:$8 sps:$4 sm:$0xff]  }
   0xb   :  { %531 = vmatprep.subr.bf16.mxu0 %v1922_v1  ;;  %1801 = vmatprep.subr.bf16.mxu1 %v1922_v1  ;;  %v1861_v31 = vld [vmem:[%s2332_s0 + $0x40] ss:$8 sps:$4 sm:$0xff]   ;;  %v1864_v32 = vld [vmem:[%s2332_s0 + $0x130] ss:$8 sps:$4 sm:$0xff]   ;;  %v1865_v33 = vld [vmem:[%s2332_s0 + $0x54] ss:$8 sps:$4 sm:$0xff]  }
   0xc   :  { %v1868_v34 = vld [vmem:[%s2332_s0 + $0x144] ss:$8 sps:$4 sm:$0xff]   ;;  %v1867_v35 = vld [vmem:[%s2332_s0 + $0x50] ss:$8 sps:$4 sm:$0xff]   ;;  %v1870_v36 = vld [vmem:[%s2332_s0 + $0x140] ss:$8 sps:$4 sm:$0xff]  }
   0xd   :  { %v1871_v37 = vld [vmem:[%s2332_s0 + $0x64] ss:$8 sps:$4 sm:$0xff]   ;;  %v1874_v38 = vld [vmem:[%s2332_s0 + $0x154] ss:$8 sps:$4 sm:$0xff]   ;;  %v1873_v39 = vld [vmem:[%s2332_s0 + $0x60] ss:$8 sps:$4 sm:$0xff]  }
   0xe   :  { %532 = vmatpush1.bf16.msra.mxu0 %v1826_v4  ;;  %1813 = vmatpush1.bf16.msra.mxu1 %v1826_v4  ;;  %v1876_v40 = vld [vmem:[%s2332_s0 + $0x150] ss:$8 sps:$4 sm:$0xff]   ;;  %v1877_v41 = vld [vmem:[%s2332_s0 + $0x74] ss:$8 sps:$4 sm:$0xff]   ;;  %v1880_v42 = vld [vmem:[%s2332_s0 + $0x164] ss:$8 sps:$4 sm:$0xff]  }
   0xf   :  { %533 = vmatprep.subr.bf16.mxu0 %v1922_v1  ;;  %1802 = vmatprep.subr.bf16.mxu1 %v1922_v1  ;;  %v1879_v43 = vld [vmem:[%s2332_s0 + $0x70] ss:$8 sps:$4 sm:$0xff]   ;;  %v1882_v44 = vld [vmem:[%s2332_s0 + $0x160] ss:$8 sps:$4 sm:$0xff]   ;;  %v1883_v45 = vld [vmem:[%s2332_s0 + $0x84] ss:$8 sps:$4 sm:$0xff]  }
  0x10   :  { %v1886_v46 = vld [vmem:[%s2332_s0 + $0x174] ss:$8 sps:$4 sm:$0xff]   ;;  %v1885_v47 = vld [vmem:[%s2332_s0 + $0x80] ss:$8 sps:$4 sm:$0xff]   ;;  %v1888_v48 = vld [vmem:[%s2332_s0 + $0x170] ss:$8 sps:$4 sm:$0xff]  }
  0x11   :  { %v1889_v49 = vld [vmem:[%s2332_s0 + $0x94] ss:$8 sps:$4 sm:$0xff]   ;;  %v1892_v50 = vld [vmem:[%s2332_s0 + $0x184] ss:$8 sps:$4 sm:$0xff]   ;;  %v1891_v51 = vld [vmem:[%s2332_s0 + $0x90] ss:$8 sps:$4 sm:$0xff]  }
  0x12   :  { %534 = vmatpush1.bf16.msra.mxu0 %v1827_v6  ;;  %1814 = vmatpush1.bf16.msra.mxu1 %v1827_v6  ;;  %v1894_v52 = vld [vmem:[%s2332_s0 + $0x180] ss:$8 sps:$4 sm:$0xff]   ;;  %v1895_v53 = vld [vmem:[%s2332_s0 + $0xa4] ss:$8 sps:$4 sm:$0xff]   ;;  %v1898_v54 = vld [vmem:[%s2332_s0 + $0x194] ss:$8 sps:$4 sm:$0xff]  }
  0x13   :  { %535 = vmatprep.subr.bf16.mxu0 %v1922_v1  ;;  %1803 = vmatprep.subr.bf16.mxu1 %v1922_v1  ;;  %v1897_v55 = vld [vmem:[%s2332_s0 + $0xa0] ss:$8 sps:$4 sm:$0xff]   ;;  %v1900_v56 = vld [vmem:[%s2332_s0 + $0x190] ss:$8 sps:$4 sm:$0xff]   ;;  %v1901_v57 = vld [vmem:[%s2332_s0 + $0xb4] ss:$8 sps:$4 sm:$0xff]  }
  0x14   :  { %v1904_v58 = vld [vmem:[%s2332_s0 + $0x1a4] ss:$8 sps:$4 sm:$0xff]   ;;  %v1903_v59 = vld [vmem:[%s2332_s0 + $0xb0] ss:$8 sps:$4 sm:$0xff]   ;;  %v1906_v60 = vld [vmem:[%s2332_s0 + $0x1a0] ss:$8 sps:$4 sm:$0xff]  }
  0x15   :  { %v1907_v61 = vld [vmem:[%s2332_s0 + $0xc4] ss:$8 sps:$4 sm:$0xff]   ;;  %v1910_v62 = vld [vmem:[%s2332_s0 + $0x1b4] ss:$8 sps:$4 sm:$0xff]   ;;  %v1909_v63 = vld [vmem:[%s2332_s0 + $0xc0] ss:$8 sps:$4 sm:$0xff]  }
  0x16   :  { %536 = vmatpush1.bf16.msra.mxu0 %v1828_v8  ;;  %1815 = vmatpush1.bf16.msra.mxu1 %v1828_v8  ;;  %v1912_v0 = vld [vmem:[%s2332_s0 + $0x1b0] ss:$8 sps:$4 sm:$0xff]   ;;  %v1916_v2 = vld [vmem:[%s2332_s0 + $0x1c4] ss:$8 sps:$4 sm:$0xff]   ;;  %v1918_v4 = vld [vmem:[%s2332_s0 + $0x1c0] ss:$8 sps:$4 sm:$0xff]  }
  0x17   :  { %537 = vmatprep.subr.bf16.mxu0 %v1922_v1  ;;  %1804 = vmatprep.subr.bf16.mxu1 %v1922_v1  ;;  %v1915_v3 = vld [vmem:[%s2332_s0 + $0xd0] ss:$8 sps:$4 sm:$0xff]   ;;  %v1919_v5 = vld [vmem:[%s2332_s0 + $0xe4] ss:$8 sps:$4 sm:$0xff]   ;;  %v1921_v6 = vld [vmem:[%s2332_s0 + $0xe0] ss:$8 sps:$4 sm:$0xff]  }
  0x18   :  { %v2185_v7 = vld [vmem:[%s2334_s2] ss:$0 sm:$0xff] }
  0x1a   :  { %538 = vmatpush1.bf16.msra.mxu0 %v1829_v9  ;;  %1816 = vmatpush1.bf16.msra.mxu1 %v1829_v9 }
  0x1b   :  { %539 = vmatprep.subr.bf16.mxu0 %v1922_v1  ;;  %1805 = vmatprep.subr.bf16.mxu1 %v1922_v1 }
  0x1e   :  { %540 = vmatpush1.bf16.msra.mxu0 %v1830_v10  ;;  %1817 = vmatpush1.bf16.msra.mxu1 %v1830_v10 }
  0x1f   :  { %541 = vmatprep.subr.bf16.mxu0 %v1922_v1  ;;  %1806 = vmatprep.subr.bf16.mxu1 %v1922_v1 }
  0x22   :  { %542 = vmatpush1.bf16.msra.mxu0 %v1831_v11  ;;  %1818 = vmatpush1.bf16.msra.mxu1 %v1831_v11 }
  0x23   :  { %543 = vmatprep.subr.bf16.mxu0 %v1922_v1  ;;  %1807 = vmatprep.subr.bf16.mxu1 %v1922_v1 }
  0x26   :  { %544 = vmatpush1.bf16.msra.mxu0 %v1832_v12  ;;  %1819 = vmatpush1.bf16.msra.mxu1 %v1832_v12 }
  0x27   :  { %545 = vmatprep.subr.bf16.mxu0 %v1922_v1  ;;  %1808 = vmatprep.subr.bf16.mxu1 %v1922_v1 }
  0x2a   :  { %546 = vmatpush1.bf16.msra.mxu0 %v1833_v13  ;;  %1820 = vmatpush1.bf16.msra.mxu1 %v1833_v13 }
  0x2b   :  { %547 = vmatprep.subr.bf16.mxu0 %v1922_v1  ;;  %1809 = vmatprep.subr.bf16.mxu1 %v1922_v1  ;;  %v1913_v1 = vld [vmem:[%s2332_s0 + $0xd4] ss:$8 sps:$4 sm:$0xff]  }
  0x2e   :  { %548 = vmatpush1.bf16.msra.mxu0 %v1834_v14  ;;  %1821 = vmatpush1.bf16.msra.mxu1 %v1834_v14 }
  0x31   :  { %558 = vmatmul.mubr.bf16.vlgmr.msra.gmra.mrb[0].mxu0 %v1835_v15  ;;  %678 = vmatmul.mubr.bf16.vlgmr.msra.gmra.mrb[0].mxu1 %v1838_v16 }
  0x32   :  { %1481 = vmatprep.mubr.msk.bf16.mxu0 %vm437_vm0, %v1841_v17  ;;  %1496 = vmatprep.mubr.msk.bf16.mxu1 %vm437_vm0, %v1844_v18 }
  0x39   :  { %566 = vmatmul.mubr.bf16.gmra.mrb[4].mxu0 %v1843_v19  ;;  %686 = vmatmul.mubr.bf16.gmra.mrb[4].mxu1 %v1846_v20 }
  0x3a   :  { %1482 = vmatprep.mubr.msk.bf16.mxu0 %vm437_vm0, %v1847_v21  ;;  %1497 = vmatprep.mubr.msk.bf16.mxu1 %vm437_vm0, %v1850_v22 }
  0x41   :  { %574 = vmatmul.mubr.bf16.gmra.mrb[8].mxu0 %v1849_v23  ;;  %694 = vmatmul.mubr.bf16.gmra.mrb[8].mxu1 %v1852_v24 }
  0x42   :  { %1483 = vmatprep.mubr.msk.bf16.mxu0 %vm437_vm0, %v1853_v25  ;;  %1498 = vmatprep.mubr.msk.bf16.mxu1 %vm437_vm0, %v1856_v26 }
  0x49   :  { %582 = vmatmul.mubr.bf16.gmra.mrb[12].mxu0 %v1855_v27  ;;  %702 = vmatmul.mubr.bf16.gmra.mrb[12].mxu1 %v1858_v28 }
  0x4a   :  { %1484 = vmatprep.mubr.msk.bf16.mxu0 %vm437_vm0, %v1859_v29  ;;  %1499 = vmatprep.mubr.msk.bf16.mxu1 %vm437_vm0, %v1862_v30 }
  0x51   :  { %590 = vmatmul.mubr.bf16.gmra.mrb[16].mxu0 %v1861_v31  ;;  %710 = vmatmul.mubr.bf16.gmra.mrb[16].mxu1 %v1864_v32 }
  0x52   :  { %1485 = vmatprep.mubr.msk.bf16.mxu0 %vm437_vm0, %v1865_v33  ;;  %1500 = vmatprep.mubr.msk.bf16.mxu1 %vm437_vm0, %v1868_v34 }
  0x59   :  { %598 = vmatmul.mubr.bf16.gmra.mrb[20].mxu0 %v1867_v35  ;;  %718 = vmatmul.mubr.bf16.gmra.mrb[20].mxu1 %v1870_v36 }
  0x5a   :  { %1486 = vmatprep.mubr.msk.bf16.mxu0 %vm437_vm0, %v1871_v37  ;;  %1501 = vmatprep.mubr.msk.bf16.mxu1 %vm437_vm0, %v1874_v38 }
  0x61   :  { %606 = vmatmul.mubr.bf16.gmra.mrb[24].mxu0 %v1873_v39  ;;  %726 = vmatmul.mubr.bf16.gmra.mrb[24].mxu1 %v1876_v40 }
  0x62   :  { %1487 = vmatprep.mubr.msk.bf16.mxu0 %vm437_vm0, %v1877_v41  ;;  %1502 = vmatprep.mubr.msk.bf16.mxu1 %vm437_vm0, %v1880_v42 }
  0x69   :  { %614 = vmatmul.mubr.bf16.gmra.mrb[28].mxu0 %v1879_v43  ;;  %734 = vmatmul.mubr.bf16.gmra.mrb[28].mxu1 %v1882_v44 }
  0x6a   :  { %1488 = vmatprep.mubr.msk.bf16.mxu0 %vm437_vm0, %v1883_v45  ;;  %1503 = vmatprep.mubr.msk.bf16.mxu1 %vm437_vm0, %v1886_v46 }
  0x71   :  { %622 = vmatmul.mubr.bf16.gmra.mrb[32].mxu0 %v1885_v47  ;;  %742 = vmatmul.mubr.bf16.gmra.mrb[32].mxu1 %v1888_v48 }
  0x72   :  { %1489 = vmatprep.mubr.msk.bf16.mxu0 %vm437_vm0, %v1889_v49  ;;  %1504 = vmatprep.mubr.msk.bf16.mxu1 %vm437_vm0, %v1892_v50 }
  0x79   :  { %630 = vmatmul.mubr.bf16.gmra.mrb[36].mxu0 %v1891_v51  ;;  %750 = vmatmul.mubr.bf16.gmra.mrb[36].mxu1 %v1894_v52 }
  0x7a   :  { %1490 = vmatprep.mubr.msk.bf16.mxu0 %vm437_vm0, %v1895_v53  ;;  %1505 = vmatprep.mubr.msk.bf16.mxu1 %vm437_vm0, %v1898_v54 }
  0x81   :  { %638 = vmatmul.mubr.bf16.gmra.mrb[40].mxu0 %v1897_v55  ;;  %758 = vmatmul.mubr.bf16.gmra.mrb[40].mxu1 %v1900_v56 }
  0x82   :  { %1491 = vmatprep.mubr.msk.bf16.mxu0 %vm437_vm0, %v1901_v57  ;;  %1506 = vmatprep.mubr.msk.bf16.mxu1 %vm437_vm0, %v1904_v58 }
  0x89   :  { %646 = vmatmul.mubr.bf16.gmra.mrb[44].mxu0 %v1903_v59  ;;  %766 = vmatmul.mubr.bf16.gmra.mrb[44].mxu1 %v1906_v60 }
  0x8a   :  { %1492 = vmatprep.mubr.msk.bf16.mxu0 %vm437_vm0, %v1907_v61  ;;  %1507 = vmatprep.mubr.msk.bf16.mxu1 %vm437_vm0, %v1910_v62 }
  0x91   :  { %654 = vmatmul.mubr.bf16.gmra.mrb[48].mxu0 %v1909_v63  ;;  %774 = vmatmul.mubr.bf16.gmra.mrb[48].mxu1 %v1912_v0 }
  0x92   :  { %1493 = vmatprep.mubr.msk.bf16.mxu0 %vm437_vm0, %v1913_v1  ;;  %1508 = vmatprep.mubr.msk.bf16.mxu1 %vm437_vm0, %v1916_v2 }
  0x99   :  { %662 = vmatmul.mubr.bf16.gmra.mrb[52].mxu0 %v1915_v3  ;;  %782 = vmatmul.mubr.bf16.gmra.mrb[52].mxu1 %v1918_v4 }
  0x9a   :  { %1494 = vmatprep.mubr.msk.bf16.mxu0 %vm437_vm0, %v1919_v5 }
  0xa1   :  { %670 = vmatmul.mubr.bf16.gmra.mrb[56].mxu0 %v1921_v6 }
 0x104   :  { %v559_v8 = vpop.f32.mrb[0].mxu0  ;;  %v679_v9 = vpop.f32.mrb[0].mxu1 }
 0x105   :  { %v560_v10 = vadd.f32 %v2185_v7, %v559_v8  ;;  %v561_v11 = vpop.f32.mrb[1].mxu0  ;;  %v680_v12 = vadd.f32 %v2185_v7, %v679_v9  ;;  %v681_v13 = vpop.f32.mrb[1].mxu1 }
 0x106   :  { %v562_v14 = vpop.f32.mrb[2].mxu0  ;;  %v682_v15 = vpop.f32.mrb[2].mxu1 }
 0x107   :  { %v563_v16 = vadd.f32 %v2185_v7, %v562_v14  ;;  %v564_v17 = vpop.f32.mrb[3].mxu0  ;;  %v820_v18 = vmax.f32 %v680_v12, 0.0  ;;  %v683_v19 = vadd.f32 %v2185_v7, %v682_v15  ;;  %v684_v20 = vpop.f32.mrb[3].mxu1  ;;  %v790_v21 = vmax.f32 %v560_v10, 0.0 }
 0x109   :  { %v791_v22 = vmax.f32 %v563_v16, 0.0  ;;  %v821_v23 = vmax.f32 %v683_v19, 0.0 }
 0x10b   :  { %v1628_v24 = vpack.c.bf16 %v791_v22, %v790_v21  ;;  %v1703_v25 = vpack.c.bf16 %v821_v23, %v820_v18 }
 0x10c   :  { %v567_v26 = vpop.f32.mrb[4].mxu0  ;;  %v687_v27 = vpop.f32.mrb[4].mxu1 }
 0x10d   :  { %1629 = vst [vmem:[#allocation2] sm:$0xff] %v1628_v24   ;;  %1784 = vst [vmem:[#allocation2 + $0x78] sm:$0xff] %v1703_v25   ;;  %v568_v28 = vadd.f32 %v2185_v7, %v567_v26  ;;  %v569_v29 = vpop.f32.mrb[5].mxu0  ;;  %v688_v30 = vadd.f32 %v2185_v7, %v687_v27  ;;  %v689_v31 = vpop.f32.mrb[5].mxu1 }
 0x10e   :  { %v570_v32 = vpop.f32.mrb[6].mxu0  ;;  %v690_v33 = vpop.f32.mrb[6].mxu1 }
 0x10f   :  { %v571_v34 = vadd.f32 %v2185_v7, %v570_v32  ;;  %v572_v35 = vpop.f32.mrb[7].mxu0  ;;  %v822_v36 = vmax.f32 %v688_v30, 0.0  ;;  %v691_v37 = vadd.f32 %v2185_v7, %v690_v33  ;;  %v692_v38 = vpop.f32.mrb[7].mxu1  ;;  %v792_v39 = vmax.f32 %v568_v28, 0.0 }
 0x111   :  { %v793_v40 = vmax.f32 %v571_v34, 0.0  ;;  %v823_v41 = vmax.f32 %v691_v37, 0.0 }
 0x113   :  { %v1633_v42 = vpack.c.bf16 %v793_v40, %v792_v39  ;;  %v1708_v43 = vpack.c.bf16 %v823_v41, %v822_v36 }
 0x114   :  { %v1155_v44 = vld [vmem:[#allocation2] sm:$0xff]   ;;  %v1215_v45 = vld [vmem:[#allocation2 + $0x78] sm:$0xff]   ;;  %v575_v46 = vpop.f32.mrb[8].mxu0  ;;  %v695_v47 = vpop.f32.mrb[8].mxu1 }
 0x115   :  { %1156 = vst [vmem:[%s2335_s3] sm:$0xff] %v1155_v44   ;;  %1216 = vst [vmem:[%s2335_s3 + $0x78] sm:$0xff] %v1215_v45   ;;  %v576_v48 = vadd.f32 %v2185_v7, %v575_v46  ;;  %v577_v49 = vpop.f32.mrb[9].mxu0  ;;  %v696_v50 = vadd.f32 %v2185_v7, %v695_v47  ;;  %v697_v51 = vpop.f32.mrb[9].mxu1 }
 0x116   :  { %1770 = vst [vmem:[#allocation2 + $0x8] sm:$0xff] %v1633_v42   ;;  %1785 = vst [vmem:[#allocation2 + $0x80] sm:$0xff] %v1708_v43   ;;  %v578_v52 = vpop.f32.mrb[10].mxu0  ;;  %v698_v53 = vpop.f32.mrb[10].mxu1 }
 0x117   :  { %v579_v54 = vadd.f32 %v2185_v7, %v578_v52  ;;  %v580_v55 = vpop.f32.mrb[11].mxu0  ;;  %v824_v56 = vmax.f32 %v696_v50, 0.0  ;;  %v699_v57 = vadd.f32 %v2185_v7, %v698_v53  ;;  %v700_v58 = vpop.f32.mrb[11].mxu1  ;;  %v794_v59 = vmax.f32 %v576_v48, 0.0 }
 0x119   :  { %v795_v60 = vmax.f32 %v579_v54, 0.0  ;;  %v825_v61 = vmax.f32 %v699_v57, 0.0 }
 0x11b   :  { %v1638_v62 = vpack.c.bf16 %v795_v60, %v794_v59  ;;  %v1713_v63 = vpack.c.bf16 %v825_v61, %v824_v56 }
 0x11c   :  { %v583_v2 = vpop.f32.mrb[12].mxu0  ;;  %v703_v3 = vpop.f32.mrb[12].mxu1 }
 0x11d   :  { %v1159_v0 = vld [vmem:[#allocation2 + $0x8] sm:$0xff]   ;;  %v1219_v1 = vld [vmem:[#allocation2 + $0x80] sm:$0xff]   ;;  %1771 = vst [vmem:[#allocation2 + $0x10] sm:$0xff] %v1638_v62   ;;  %1786 = vst [vmem:[#allocation2 + $0x88] sm:$0xff] %v1713_v63   ;;  %v584_v4 = vadd.f32 %v2185_v7, %v583_v2  ;;  %v585_v5 = vpop.f32.mrb[13].mxu0  ;;  %v704_v6 = vadd.f32 %v2185_v7, %v703_v3  ;;  %v705_v8 = vpop.f32.mrb[13].mxu1 }
 0x11e   :  { %1160 = vst [vmem:[%s2335_s3 + $0x8] sm:$0xff] %v1159_v0   ;;  %1220 = vst [vmem:[%s2335_s3 + $0x80] sm:$0xff] %v1219_v1   ;;  %v586_v9 = vpop.f32.mrb[14].mxu0  ;;  %v706_v10 = vpop.f32.mrb[14].mxu1 }
 0x11f   :  { %v587_v11 = vadd.f32 %v2185_v7, %v586_v9  ;;  %v588_v12 = vpop.f32.mrb[15].mxu0  ;;  %v826_v13 = vmax.f32 %v704_v6, 0.0  ;;  %v707_v14 = vadd.f32 %v2185_v7, %v706_v10  ;;  %v708_v15 = vpop.f32.mrb[15].mxu1  ;;  %v796_v16 = vmax.f32 %v584_v4, 0.0 }
 0x121   :  { %v797_v17 = vmax.f32 %v587_v11, 0.0  ;;  %v827_v18 = vmax.f32 %v707_v14, 0.0 }
 0x123   :  { %v1643_v19 = vpack.c.bf16 %v797_v17, %v796_v16  ;;  %v1718_v20 = vpack.c.bf16 %v827_v18, %v826_v13 }
 0x124   :  { %v1163_v21 = vld [vmem:[#allocation2 + $0x10] sm:$0xff]   ;;  %v1223_v22 = vld [vmem:[#allocation2 + $0x88] sm:$0xff]   ;;  %v591_v23 = vpop.f32.mrb[16].mxu0  ;;  %v711_v24 = vpop.f32.mrb[16].mxu1 }
 0x125   :  { %1164 = vst [vmem:[%s2335_s3 + $0x10] sm:$0xff] %v1163_v21   ;;  %1224 = vst [vmem:[%s2335_s3 + $0x88] sm:$0xff] %v1223_v22   ;;  %v592_v25 = vadd.f32 %v2185_v7, %v591_v23  ;;  %v593_v26 = vpop.f32.mrb[17].mxu0  ;;  %v712_v27 = vadd.f32 %v2185_v7, %v711_v24  ;;  %v713_v28 = vpop.f32.mrb[17].mxu1 }
 0x126   :  { %1772 = vst [vmem:[#allocation2 + $0x18] sm:$0xff] %v1643_v19   ;;  %1787 = vst [vmem:[#allocation2 + $0x90] sm:$0xff] %v1718_v20   ;;  %v594_v29 = vpop.f32.mrb[18].mxu0  ;;  %v714_v30 = vpop.f32.mrb[18].mxu1 }
 0x127   :  { %v595_v31 = vadd.f32 %v2185_v7, %v594_v29  ;;  %v596_v32 = vpop.f32.mrb[19].mxu0  ;;  %v828_v33 = vmax.f32 %v712_v27, 0.0  ;;  %v715_v34 = vadd.f32 %v2185_v7, %v714_v30  ;;  %v716_v35 = vpop.f32.mrb[19].mxu1  ;;  %v798_v36 = vmax.f32 %v592_v25, 0.0 }
 0x129   :  { %v799_v37 = vmax.f32 %v595_v31, 0.0  ;;  %v829_v38 = vmax.f32 %v715_v34, 0.0 }
 0x12b   :  { %v1648_v39 = vpack.c.bf16 %v799_v37, %v798_v36  ;;  %v1723_v40 = vpack.c.bf16 %v829_v38, %v828_v33 }
 0x12c   :  { %v599_v43 = vpop.f32.mrb[20].mxu0  ;;  %v719_v44 = vpop.f32.mrb[20].mxu1 }
 0x12d   :  { %v1167_v41 = vld [vmem:[#allocation2 + $0x18] sm:$0xff]   ;;  %v1227_v42 = vld [vmem:[#allocation2 + $0x90] sm:$0xff]   ;;  %1773 = vst [vmem:[#allocation2 + $0x20] sm:$0xff] %v1648_v39   ;;  %1788 = vst [vmem:[#allocation2 + $0x98] sm:$0xff] %v1723_v40   ;;  %v600_v45 = vadd.f32 %v2185_v7, %v599_v43  ;;  %v601_v46 = vpop.f32.mrb[21].mxu0  ;;  %v720_v47 = vadd.f32 %v2185_v7, %v719_v44  ;;  %v721_v48 = vpop.f32.mrb[21].mxu1 }
 0x12e   :  { %1168 = vst [vmem:[%s2335_s3 + $0x18] sm:$0xff] %v1167_v41   ;;  %1228 = vst [vmem:[%s2335_s3 + $0x90] sm:$0xff] %v1227_v42   ;;  %v602_v49 = vpop.f32.mrb[22].mxu0  ;;  %v722_v50 = vpop.f32.mrb[22].mxu1 }
 0x12f   :  { %v603_v51 = vadd.f32 %v2185_v7, %v602_v49  ;;  %v604_v52 = vpop.f32.mrb[23].mxu0  ;;  %v830_v53 = vmax.f32 %v720_v47, 0.0  ;;  %v723_v54 = vadd.f32 %v2185_v7, %v722_v50  ;;  %v724_v55 = vpop.f32.mrb[23].mxu1  ;;  %v800_v56 = vmax.f32 %v600_v45, 0.0 }
 0x131   :  { %v801_v57 = vmax.f32 %v603_v51, 0.0  ;;  %v831_v58 = vmax.f32 %v723_v54, 0.0 }
 0x133   :  { %v1653_v59 = vpack.c.bf16 %v801_v57, %v800_v56  ;;  %v1728_v60 = vpack.c.bf16 %v831_v58, %v830_v53 }
 0x134   :  { %v1171_v61 = vld [vmem:[#allocation2 + $0x20] sm:$0xff]   ;;  %v1231_v62 = vld [vmem:[#allocation2 + $0x98] sm:$0xff]   ;;  %v607_v63 = vpop.f32.mrb[24].mxu0  ;;  %v727_v0 = vpop.f32.mrb[24].mxu1 }
 0x135   :  { %1172 = vst [vmem:[%s2335_s3 + $0x20] sm:$0xff] %v1171_v61   ;;  %1232 = vst [vmem:[%s2335_s3 + $0x98] sm:$0xff] %v1231_v62   ;;  %v608_v1 = vadd.f32 %v2185_v7, %v607_v63  ;;  %v609_v2 = vpop.f32.mrb[25].mxu0  ;;  %v728_v3 = vadd.f32 %v2185_v7, %v727_v0  ;;  %v729_v4 = vpop.f32.mrb[25].mxu1 }
 0x136   :  { %1774 = vst [vmem:[#allocation2 + $0x28] sm:$0xff] %v1653_v59   ;;  %1789 = vst [vmem:[#allocation2 + $0xa0] sm:$0xff] %v1728_v60   ;;  %v610_v5 = vpop.f32.mrb[26].mxu0  ;;  %v730_v6 = vpop.f32.mrb[26].mxu1 }
 0x137   :  { %v611_v8 = vadd.f32 %v2185_v7, %v610_v5  ;;  %v612_v9 = vpop.f32.mrb[27].mxu0  ;;  %v832_v10 = vmax.f32 %v728_v3, 0.0  ;;  %v731_v11 = vadd.f32 %v2185_v7, %v730_v6  ;;  %v732_v12 = vpop.f32.mrb[27].mxu1  ;;  %v802_v13 = vmax.f32 %v608_v1, 0.0 }
 0x139   :  { %v803_v14 = vmax.f32 %v611_v8, 0.0  ;;  %v833_v15 = vmax.f32 %v731_v11, 0.0 }
 0x13b   :  { %v1658_v16 = vpack.c.bf16 %v803_v14, %v802_v13  ;;  %v1733_v17 = vpack.c.bf16 %v833_v15, %v832_v10 }
 0x13c   :  { %v615_v20 = vpop.f32.mrb[28].mxu0  ;;  %v735_v21 = vpop.f32.mrb[28].mxu1 }
 0x13d   :  { %v1175_v18 = vld [vmem:[#allocation2 + $0x28] sm:$0xff]   ;;  %v1235_v19 = vld [vmem:[#allocation2 + $0xa0] sm:$0xff]   ;;  %1775 = vst [vmem:[#allocation2 + $0x30] sm:$0xff] %v1658_v16   ;;  %1790 = vst [vmem:[#allocation2 + $0xa8] sm:$0xff] %v1733_v17   ;;  %v616_v22 = vadd.f32 %v2185_v7, %v615_v20  ;;  %v617_v23 = vpop.f32.mrb[29].mxu0  ;;  %v736_v24 = vadd.f32 %v2185_v7, %v735_v21  ;;  %v737_v25 = vpop.f32.mrb[29].mxu1 }
 0x13e   :  { %1176 = vst [vmem:[%s2335_s3 + $0x28] sm:$0xff] %v1175_v18   ;;  %1236 = vst [vmem:[%s2335_s3 + $0xa0] sm:$0xff] %v1235_v19   ;;  %v618_v26 = vpop.f32.mrb[30].mxu0  ;;  %v738_v27 = vpop.f32.mrb[30].mxu1 }
 0x13f   :  { %v619_v28 = vadd.f32 %v2185_v7, %v618_v26  ;;  %v620_v29 = vpop.f32.mrb[31].mxu0  ;;  %v834_v30 = vmax.f32 %v736_v24, 0.0  ;;  %v739_v31 = vadd.f32 %v2185_v7, %v738_v27  ;;  %v740_v32 = vpop.f32.mrb[31].mxu1  ;;  %v804_v33 = vmax.f32 %v616_v22, 0.0 }
 0x141   :  { %v805_v34 = vmax.f32 %v619_v28, 0.0  ;;  %v835_v35 = vmax.f32 %v739_v31, 0.0 }
 0x143   :  { %v1663_v36 = vpack.c.bf16 %v805_v34, %v804_v33  ;;  %v1738_v37 = vpack.c.bf16 %v835_v35, %v834_v30 }
 0x144   :  { %v1179_v38 = vld [vmem:[#allocation2 + $0x30] sm:$0xff]   ;;  %v1239_v39 = vld [vmem:[#allocation2 + $0xa8] sm:$0xff]   ;;  %v623_v40 = vpop.f32.mrb[32].mxu0  ;;  %v743_v41 = vpop.f32.mrb[32].mxu1 }
 0x145   :  { %1180 = vst [vmem:[%s2335_s3 + $0x30] sm:$0xff] %v1179_v38   ;;  %1240 = vst [vmem:[%s2335_s3 + $0xa8] sm:$0xff] %v1239_v39   ;;  %v624_v42 = vadd.f32 %v2185_v7, %v623_v40  ;;  %v625_v43 = vpop.f32.mrb[33].mxu0  ;;  %v744_v44 = vadd.f32 %v2185_v7, %v743_v41  ;;  %v745_v45 = vpop.f32.mrb[33].mxu1 }
 0x146   :  { %1776 = vst [vmem:[#allocation2 + $0x38] sm:$0xff] %v1663_v36   ;;  %1791 = vst [vmem:[#allocation2 + $0xb0] sm:$0xff] %v1738_v37   ;;  %v626_v46 = vpop.f32.mrb[34].mxu0  ;;  %v746_v47 = vpop.f32.mrb[34].mxu1 }
 0x147   :  { %v627_v48 = vadd.f32 %v2185_v7, %v626_v46  ;;  %v628_v49 = vpop.f32.mrb[35].mxu0  ;;  %v836_v50 = vmax.f32 %v744_v44, 0.0  ;;  %v747_v51 = vadd.f32 %v2185_v7, %v746_v47  ;;  %v748_v52 = vpop.f32.mrb[35].mxu1  ;;  %v806_v53 = vmax.f32 %v624_v42, 0.0 }
 0x149   :  { %v807_v54 = vmax.f32 %v627_v48, 0.0  ;;  %v837_v55 = vmax.f32 %v747_v51, 0.0 }
 0x14b   :  { %v1668_v56 = vpack.c.bf16 %v807_v54, %v806_v53  ;;  %v1743_v57 = vpack.c.bf16 %v837_v55, %v836_v50 }
 0x14c   :  { %v631_v60 = vpop.f32.mrb[36].mxu0  ;;  %v751_v61 = vpop.f32.mrb[36].mxu1 }
 0x14d   :  { %v1183_v58 = vld [vmem:[#allocation2 + $0x38] sm:$0xff]   ;;  %v1243_v59 = vld [vmem:[#allocation2 + $0xb0] sm:$0xff]   ;;  %1777 = vst [vmem:[#allocation2 + $0x40] sm:$0xff] %v1668_v56   ;;  %1792 = vst [vmem:[#allocation2 + $0xb8] sm:$0xff] %v1743_v57   ;;  %v632_v62 = vadd.f32 %v2185_v7, %v631_v60  ;;  %v633_v63 = vpop.f32.mrb[37].mxu0  ;;  %v752_v0 = vadd.f32 %v2185_v7, %v751_v61  ;;  %v753_v1 = vpop.f32.mrb[37].mxu1 }
 0x14e   :  { %1184 = vst [vmem:[%s2335_s3 + $0x38] sm:$0xff] %v1183_v58   ;;  %1244 = vst [vmem:[%s2335_s3 + $0xb0] sm:$0xff] %v1243_v59   ;;  %v634_v2 = vpop.f32.mrb[38].mxu0  ;;  %v754_v3 = vpop.f32.mrb[38].mxu1 }
 0x14f   :  { %v635_v4 = vadd.f32 %v2185_v7, %v634_v2  ;;  %v636_v5 = vpop.f32.mrb[39].mxu0  ;;  %v838_v6 = vmax.f32 %v752_v0, 0.0  ;;  %v755_v8 = vadd.f32 %v2185_v7, %v754_v3  ;;  %v756_v9 = vpop.f32.mrb[39].mxu1  ;;  %v808_v10 = vmax.f32 %v632_v62, 0.0 }
 0x151   :  { %v809_v11 = vmax.f32 %v635_v4, 0.0  ;;  %v839_v12 = vmax.f32 %v755_v8, 0.0 }
 0x153   :  { %v1673_v13 = vpack.c.bf16 %v809_v11, %v808_v10  ;;  %v1748_v14 = vpack.c.bf16 %v839_v12, %v838_v6 }
 0x154   :  { %v1187_v15 = vld [vmem:[#allocation2 + $0x40] sm:$0xff]   ;;  %v1247_v16 = vld [vmem:[#allocation2 + $0xb8] sm:$0xff]   ;;  %v639_v17 = vpop.f32.mrb[40].mxu0  ;;  %v759_v18 = vpop.f32.mrb[40].mxu1 }
 0x155   :  { %1188 = vst [vmem:[%s2335_s3 + $0x40] sm:$0xff] %v1187_v15   ;;  %1248 = vst [vmem:[%s2335_s3 + $0xb8] sm:$0xff] %v1247_v16   ;;  %v640_v19 = vadd.f32 %v2185_v7, %v639_v17  ;;  %v641_v20 = vpop.f32.mrb[41].mxu0  ;;  %v760_v21 = vadd.f32 %v2185_v7, %v759_v18  ;;  %v761_v22 = vpop.f32.mrb[41].mxu1 }
 0x156   :  { %1778 = vst [vmem:[#allocation2 + $0x48] sm:$0xff] %v1673_v13   ;;  %1793 = vst [vmem:[#allocation2 + $0xc0] sm:$0xff] %v1748_v14   ;;  %v642_v23 = vpop.f32.mrb[42].mxu0  ;;  %v762_v24 = vpop.f32.mrb[42].mxu1 }
 0x157   :  { %v643_v25 = vadd.f32 %v2185_v7, %v642_v23  ;;  %v644_v26 = vpop.f32.mrb[43].mxu0  ;;  %v840_v27 = vmax.f32 %v760_v21, 0.0  ;;  %v763_v28 = vadd.f32 %v2185_v7, %v762_v24  ;;  %v764_v29 = vpop.f32.mrb[43].mxu1  ;;  %v810_v30 = vmax.f32 %v640_v19, 0.0 }
 0x159   :  { %v811_v31 = vmax.f32 %v643_v25, 0.0  ;;  %v841_v32 = vmax.f32 %v763_v28, 0.0 }
 0x15b   :  { %v1678_v33 = vpack.c.bf16 %v811_v31, %v810_v30  ;;  %v1753_v34 = vpack.c.bf16 %v841_v32, %v840_v27 }
 0x15c   :  { %v647_v37 = vpop.f32.mrb[44].mxu0  ;;  %v767_v38 = vpop.f32.mrb[44].mxu1 }
 0x15d   :  { %v1191_v35 = vld [vmem:[#allocation2 + $0x48] sm:$0xff]   ;;  %v1251_v36 = vld [vmem:[#allocation2 + $0xc0] sm:$0xff]   ;;  %1779 = vst [vmem:[#allocation2 + $0x50] sm:$0xff] %v1678_v33   ;;  %1794 = vst [vmem:[#allocation2 + $0xc8] sm:$0xff] %v1753_v34   ;;  %v648_v39 = vadd.f32 %v2185_v7, %v647_v37  ;;  %v649_v40 = vpop.f32.mrb[45].mxu0  ;;  %v768_v41 = vadd.f32 %v2185_v7, %v767_v38  ;;  %v769_v42 = vpop.f32.mrb[45].mxu1 }
 0x15e   :  { %1192 = vst [vmem:[%s2335_s3 + $0x48] sm:$0xff] %v1191_v35   ;;  %1252 = vst [vmem:[%s2335_s3 + $0xc0] sm:$0xff] %v1251_v36   ;;  %v650_v43 = vpop.f32.mrb[46].mxu0  ;;  %v770_v44 = vpop.f32.mrb[46].mxu1 }
 0x15f   :  { %v651_v45 = vadd.f32 %v2185_v7, %v650_v43  ;;  %v652_v46 = vpop.f32.mrb[47].mxu0  ;;  %v842_v47 = vmax.f32 %v768_v41, 0.0  ;;  %v771_v48 = vadd.f32 %v2185_v7, %v770_v44  ;;  %v772_v49 = vpop.f32.mrb[47].mxu1  ;;  %v812_v50 = vmax.f32 %v648_v39, 0.0 }
 0x161   :  { %v813_v51 = vmax.f32 %v651_v45, 0.0  ;;  %v843_v52 = vmax.f32 %v771_v48, 0.0 }
 0x163   :  { %v1683_v53 = vpack.c.bf16 %v813_v51, %v812_v50  ;;  %v1758_v54 = vpack.c.bf16 %v843_v52, %v842_v47 }
 0x164   :  { %v1195_v55 = vld [vmem:[#allocation2 + $0x50] sm:$0xff]   ;;  %v1255_v56 = vld [vmem:[#allocation2 + $0xc8] sm:$0xff]   ;;  %v655_v57 = vpop.f32.mrb[48].mxu0  ;;  %v775_v58 = vpop.f32.mrb[48].mxu1 }
 0x165   :  { %1196 = vst [vmem:[%s2335_s3 + $0x50] sm:$0xff] %v1195_v55   ;;  %1256 = vst [vmem:[%s2335_s3 + $0xc8] sm:$0xff] %v1255_v56   ;;  %v656_v59 = vadd.f32 %v2185_v7, %v655_v57  ;;  %v657_v60 = vpop.f32.mrb[49].mxu0  ;;  %v776_v61 = vadd.f32 %v2185_v7, %v775_v58  ;;  %v777_v62 = vpop.f32.mrb[49].mxu1 }
 0x166   :  { %1780 = vst [vmem:[#allocation2 + $0x58] sm:$0xff] %v1683_v53   ;;  %1795 = vst [vmem:[#allocation2 + $0xd0] sm:$0xff] %v1758_v54   ;;  %v658_v63 = vpop.f32.mrb[50].mxu0  ;;  %v778_v0 = vpop.f32.mrb[50].mxu1 }
 0x167   :  { %v659_v1 = vadd.f32 %v2185_v7, %v658_v63  ;;  %v660_v2 = vpop.f32.mrb[51].mxu0  ;;  %v844_v3 = vmax.f32 %v776_v61, 0.0  ;;  %v779_v4 = vadd.f32 %v2185_v7, %v778_v0  ;;  %v780_v5 = vpop.f32.mrb[51].mxu1  ;;  %v814_v6 = vmax.f32 %v656_v59, 0.0 }
 0x169   :  { %v815_v8 = vmax.f32 %v659_v1, 0.0  ;;  %v845_v9 = vmax.f32 %v779_v4, 0.0 }
 0x16b   :  { %v1688_v10 = vpack.c.bf16 %v815_v8, %v814_v6  ;;  %v1763_v11 = vpack.c.bf16 %v845_v9, %v844_v3 }
 0x16c   :  { %v663_v14 = vpop.f32.mrb[52].mxu0  ;;  %v783_v15 = vpop.f32.mrb[52].mxu1 }
 0x16d   :  { %v1199_v12 = vld [vmem:[#allocation2 + $0x58] sm:$0xff]   ;;  %v1259_v13 = vld [vmem:[#allocation2 + $0xd0] sm:$0xff]   ;;  %1781 = vst [vmem:[#allocation2 + $0x60] sm:$0xff] %v1688_v10   ;;  %1796 = vst [vmem:[#allocation2 + $0xd8] sm:$0xff] %v1763_v11   ;;  %v664_v16 = vadd.f32 %v2185_v7, %v663_v14  ;;  %v665_v17 = vpop.f32.mrb[53].mxu0  ;;  %v784_v18 = vadd.f32 %v2185_v7, %v783_v15  ;;  %v785_v19 = vpop.f32.mrb[53].mxu1 }
 0x16e   :  { %1200 = vst [vmem:[%s2335_s3 + $0x58] sm:$0xff] %v1199_v12   ;;  %1260 = vst [vmem:[%s2335_s3 + $0xd0] sm:$0xff] %v1259_v13   ;;  %v666_v20 = vpop.f32.mrb[54].mxu0  ;;  %v786_v21 = vpop.f32.mrb[54].mxu1 }
 0x16f   :  { %v667_v22 = vadd.f32 %v2185_v7, %v666_v20  ;;  %v668_v23 = vpop.f32.mrb[55].mxu0  ;;  %v846_v24 = vmax.f32 %v784_v18, 0.0  ;;  %v787_v25 = vadd.f32 %v2185_v7, %v786_v21  ;;  %v788_v26 = vpop.f32.mrb[55].mxu1  ;;  %v816_v27 = vmax.f32 %v664_v16, 0.0 }
 0x171   :  { %v817_v28 = vmax.f32 %v667_v22, 0.0  ;;  %v847_v29 = vmax.f32 %v787_v25, 0.0 }
 0x173   :  { %v1693_v30 = vpack.c.bf16 %v817_v28, %v816_v27  ;;  %v1768_v31 = vpack.c.bf16 %v847_v29, %v846_v24 }
 0x174   :  { %v1203_v32 = vld [vmem:[#allocation2 + $0x60] sm:$0xff]   ;;  %v1263_v33 = vld [vmem:[#allocation2 + $0xd8] sm:$0xff]   ;;  %v671_v34 = vpop.f32.mrb[56].mxu0 }
 0x175   :  { %1204 = vst [vmem:[%s2335_s3 + $0x60] sm:$0xff] %v1203_v32   ;;  %1264 = vst [vmem:[%s2335_s3 + $0xd8] sm:$0xff] %v1263_v33   ;;  %v672_v35 = vadd.f32 %v2185_v7, %v671_v34  ;;  %v673_v36 = vpop.f32.mrb[57].mxu0 }
 0x176   :  { %1782 = vst [vmem:[#allocation2 + $0x68] sm:$0xff] %v1693_v30   ;;  %1797 = vst [vmem:[#allocation2 + $0xe0] sm:$0xff] %v1768_v31   ;;  %v674_v37 = vpop.f32.mrb[58].mxu0 }
 0x177   :  { %v675_v38 = vadd.f32 %v2185_v7, %v674_v37  ;;  %v676_v39 = vpop.f32.mrb[59].mxu0  ;;  %v818_v40 = vmax.f32 %v672_v35, 0.0 }
 0x179   :  { %v819_v41 = vmax.f32 %v675_v38, 0.0 }
 0x17b   :  { %v1698_v42 = vpack.c.bf16 %v819_v41, %v818_v40 }
 0x17d   :  { %v1207_v43 = vld [vmem:[#allocation2 + $0x68] sm:$0xff]   ;;  %v1267_v44 = vld [vmem:[#allocation2 + $0xe0] sm:$0xf]  ;;  %1783 = vst [vmem:[#allocation2 + $0x70] sm:$0xff] %v1698_v42  }
 0x17e   :  { %1208 = vst [vmem:[%s2335_s3 + $0x68] sm:$0xff] %v1207_v43   ;;  %1268 = vst [vmem:[%s2335_s3 + $0xe0] sm:$0xf] %v1267_v44 }
 0x184   :  { %v1211_v45 = vld [vmem:[#allocation2 + $0x70] sm:$0xff]  }
 0x185   :  { %1212 = vst [vmem:[%s2335_s3 + $0x70] sm:$0xff] %v1211_v45  }

// kernel: mario_cnn_forward.5
= control target key start
LH: loop header
LB: loop body
LE: loop exit
PB: predicated region body
PF: predicated region fallthrough
CT: control target
= control target key end

     0   :  { %s1145_s0 = inlined_call_operand.vmem [shape: bf16[72,512], index: 0, kind: input, shape index: {}]   ;;  %s1146_s1 = inlined_call_operand.vmem [shape: bf16[512,128], index: 1, kind: input, shape index: {}]   ;;  %s1147_s2 = inlined_call_operand.vmem [shape: f32[1,128], index: 2, kind: input, shape index: {}]   ;;  %s1148_s3 = inlined_call_operand.vmem [shape: bf16[72,128], index: 3, kind: output, shape index: {}]  }
   0x1   :  { %v877_v0 = vld [vmem:[%s1146_s1 + $0x40] sm:$0xff]   ;;  %v881_v4 = vld [vmem:[%s1146_s1 + $0x48] sm:$0xff]   ;;  %v885_v8 = vld [vmem:[%s1146_s1 + $0x50] sm:$0xff]  }
   0x2   :  { %v878_v1 = vld [vmem:[%s1146_s1 + $0xc0] sm:$0xff]   ;;  %785 = vmatprep.subr.bf16.mxu0 %v877_v0  ;;  %v882_v5 = vld [vmem:[%s1146_s1 + $0xc8] sm:$0xff]   ;;  %v886_v9 = vld [vmem:[%s1146_s1 + $0xd0] sm:$0xff]  }
   0x3   :  { %v879_v2 = vld [vmem:[%s1146_s1] sm:$0xff]   ;;  %831 = vmatprep.subr.bf16.mxu1 %v878_v1  ;;  %v883_v6 = vld [vmem:[%s1146_s1 + $0x8] sm:$0xff]   ;;  %v887_v10 = vld [vmem:[%s1146_s1 + $0x10] sm:$0xff]  }
   0x4   :  { %v880_v3 = vld [vmem:[%s1146_s1 + $0x80] sm:$0xff]   ;;  %786 = vmatpush3.bf16.msra.mxu0 %v879_v2  ;;  %v884_v7 = vld [vmem:[%s1146_s1 + $0x88] sm:$0xff]   ;;  %v888_v11 = vld [vmem:[%s1146_s1 + $0x90] sm:$0xff]  }
   0x5   :  { %832 = vmatpush3.bf16.msra.mxu1 %v880_v3  ;;  %787 = vmatprep.subr.bf16.mxu0 %v881_v4  ;;  %v889_v12 = vld [vmem:[%s1146_s1 + $0x58] sm:$0xff]   ;;  %v893_v16 = vld [vmem:[%s1146_s1 + $0x60] sm:$0xff]   ;;  %v897_v20 = vld [vmem:[%s1146_s1 + $0x68] sm:$0xff]  }
   0x6   :  { %833 = vmatprep.subr.bf16.mxu1 %v882_v5  ;;  %v890_v13 = vld [vmem:[%s1146_s1 + $0xd8] sm:$0xff]   ;;  %v894_v17 = vld [vmem:[%s1146_s1 + $0xe0] sm:$0xff]   ;;  %v898_v21 = vld [vmem:[%s1146_s1 + $0xe8] sm:$0xff]  }
   0x7   :  { %v891_v14 = vld [vmem:[%s1146_s1 + $0x18] sm:$0xff]   ;;  %v895_v18 = vld [vmem:[%s1146_s1 + $0x20] sm:$0xff]   ;;  %v899_v22 = vld [vmem:[%s1146_s1 + $0x28] sm:$0xff]  }
   0x8   :  { %788 = vmatpush3.bf16.msra.mxu0 %v883_v6  ;;  %v892_v15 = vld [vmem:[%s1146_s1 + $0x98] sm:$0xff]   ;;  %v896_v19 = vld [vmem:[%s1146_s1 + $0xa0] sm:$0xff]   ;;  %v900_v23 = vld [vmem:[%s1146_s1 + $0xa8] sm:$0xff]  }
   0x9   :  { %834 = vmatpush3.bf16.msra.mxu1 %v884_v7  ;;  %789 = vmatprep.subr.bf16.mxu0 %v885_v8  ;;  %v901_v24 = vld [vmem:[%s1146_s1 + $0x70] sm:$0xff]   ;;  %v905_v28 = vld [vmem:[%s1146_s1 + $0x78] sm:$0xff]   ;;  %v1118_v54 = vld [vmem:[%s1147_s2] ss:$0 sm:$0xff] }
   0xa   :  { %835 = vmatprep.subr.bf16.mxu1 %v886_v9  ;;  %v902_v25 = vld [vmem:[%s1146_s1 + $0xf0] sm:$0xff]   ;;  %v906_v29 = vld [vmem:[%s1146_s1 + $0xf8] sm:$0xff]  }
   0xb   :  { %v903_v26 = vld [vmem:[%s1146_s1 + $0x30] sm:$0xff]   ;;  %v907_v30 = vld [vmem:[%s1146_s1 + $0x38] sm:$0xff]  }
   0xc   :  { %790 = vmatpush3.bf16.msra.mxu0 %v887_v10  ;;  %v904_v27 = vld [vmem:[%s1146_s1 + $0xb0] sm:$0xff]   ;;  %v908_v31 = vld [vmem:[%s1146_s1 + $0xb8] sm:$0xff]  }
   0xd   :  { %836 = vmatpush3.bf16.msra.mxu1 %v888_v11  ;;  %791 = vmatprep.subr.bf16.mxu0 %v889_v12  ;;  %v909_v32 = vld [vmem:[%s1145_s0] ss:$16 sps:$4 sm:$0xff]   ;;  %v911_v33 = vld [vmem:[%s1145_s0 + $0x4] ss:$16 sps:$4 sm:$0xff]   ;;  %v912_v34 = vld [vmem:[%s1145_s0 + $0x8] ss:$16 sps:$4 sm:$0xff]  }
   0xe   :  { %837 = vmatprep.subr.bf16.mxu1 %v890_v13  ;;  %v914_v35 = vld [vmem:[%s1145_s0 + $0xc] ss:$16 sps:$4 sm:$0xff]   ;;  %430 = vmatprep.mubr.bf16.mxu0 %v911_v33  ;;  %v915_v36 = vld [vmem:[%s1145_s0 + $0x24] ss:$16 sps:$4 sm:$0xff]   ;;  %v919_v38 = vld [vmem:[%s1145_s0 + $0x20] ss:$16 sps:$4 sm:$0xff]  }
   0xf   :  { %503 = vmatprep.mubr.bf16.mxu1 %v914_v35  ;;  %v917_v37 = vld [vmem:[%s1145_s0 + $0x2c] ss:$16 sps:$4 sm:$0xff]   ;;  %v920_v39 = vld [vmem:[%s1145_s0 + $0x28] ss:$16 sps:$4 sm:$0xff]   ;;  %v921_v40 = vld [vmem:[%s1145_s0 + $0x44] ss:$16 sps:$4 sm:$0xff]  }
  0x10   :  { %792 = vmatpush3.bf16.msra.mxu0 %v891_v14  ;;  %v923_v41 = vld [vmem:[%s1145_s0 + $0x4c] ss:$16 sps:$4 sm:$0xff]   ;;  %v925_v42 = vld [vmem:[%s1145_s0 + $0x40] ss:$16 sps:$4 sm:$0xff]   ;;  %v926_v43 = vld [vmem:[%s1145_s0 + $0x48] ss:$16 sps:$4 sm:$0xff]  }
  0x11   :  { %838 = vmatpush3.bf16.msra.mxu1 %v892_v15  ;;  %793 = vmatprep.subr.bf16.mxu0 %v893_v16  ;;  %v927_v44 = vld [vmem:[%s1145_s0 + $0x64] ss:$16 sps:$4 sm:$0xff]   ;;  %v929_v45 = vld [vmem:[%s1145_s0 + $0x6c] ss:$16 sps:$4 sm:$0xff]   ;;  %v931_v46 = vld [vmem:[%s1145_s0 + $0x60] ss:$16 sps:$4 sm:$0xff]  }
  0x12   :  { %839 = vmatprep.subr.bf16.mxu1 %v894_v17  ;;  %v932_v47 = vld [vmem:[%s1145_s0 + $0x68] ss:$16 sps:$4 sm:$0xff]   ;;  %v933_v48 = vld [vmem:[%s1145_s0 + $0x84] ss:$16 sps:$4 sm:$0xff]   ;;  %v935_v49 = vld [vmem:[%s1145_s0 + $0x8c] ss:$16 sps:$4 sm:$0xff]  }
  0x13   :  { %v937_v50 = vld [vmem:[%s1145_s0 + $0x80] ss:$16 sps:$4 sm:$0xff]   ;;  %v938_v51 = vld [vmem:[%s1145_s0 + $0x88] ss:$16 sps:$4 sm:$0xff]  }
  0x14   :  { %794 = vmatpush3.bf16.msra.mxu0 %v895_v18 }
  0x15   :  { %840 = vmatpush3.bf16.msra.mxu1 %v896_v19  ;;  %795 = vmatprep.subr.bf16.mxu0 %v897_v20 }
  0x16   :  { %841 = vmatprep.subr.bf16.mxu1 %v898_v21 }
  0x18   :  { %796 = vmatpush3.bf16.msra.mxu0 %v899_v22 }
  0x19   :  { %842 = vmatpush3.bf16.msra.mxu1 %v900_v23  ;;  %797 = vmatprep.subr.bf16.mxu0 %v901_v24 }
  0x1a   :  { %843 = vmatprep.subr.bf16.mxu1 %v902_v25 }
  0x1c   :  { %798 = vmatpush3.bf16.msra.mxu0 %v903_v26 }
  0x1d   :  { %844 = vmatpush3.bf16.msra.mxu1 %v904_v27  ;;  %799 = vmatprep.subr.bf16.mxu0 %v905_v28 }
  0x1e   :  { %845 = vmatprep.subr.bf16.mxu1 %v906_v29 }
  0x20   :  { %800 = vmatpush3.bf16.msra.mxu0 %v907_v30 }
  0x21   :  { %846 = vmatpush3.bf16.msra.mxu1 %v908_v31 }
  0x23   :  { %431 = vmatmul.mubr.bf16.vlgmr.msra.gmra.mrb[0].mxu0 %v909_v32 }
  0x24   :  { %504 = vmatmul.mubr.bf16.vlgmr.msra.gmra.mrb[0].mxu1 %v912_v34  ;;  %438 = vmatprep.mubr.bf16.mxu0 %v915_v36 }
  0x25   :  { %511 = vmatprep.mubr.bf16.mxu1 %v917_v37 }
  0x2b   :  { %439 = vmatmul.mubr.bf16.gmra.mrb[4].mxu0 %v919_v38 }
  0x2c   :  { %512 = vmatmul.mubr.bf16.gmra.mrb[4].mxu1 %v920_v39  ;;  %446 = vmatprep.mubr.bf16.mxu0 %v921_v40 }
  0x2d   :  { %519 = vmatprep.mubr.bf16.mxu1 %v923_v41 }
  0x33   :  { %447 = vmatmul.mubr.bf16.gmra.mrb[8].mxu0 %v925_v42 }
  0x34   :  { %520 = vmatmul.mubr.bf16.gmra.mrb[8].mxu1 %v926_v43  ;;  %454 = vmatprep.mubr.bf16.mxu0 %v927_v44 }
  0x35   :  { %527 = vmatprep.mubr.bf16.mxu1 %v929_v45 }
  0x3b   :  { %455 = vmatmul.mubr.bf16.gmra.mrb[12].mxu0 %v931_v46 }
  0x3c   :  { %528 = vmatmul.mubr.bf16.gmra.mrb[12].mxu1 %v932_v47  ;;  %462 = vmatprep.mubr.bf16.mxu0 %v933_v48 }
  0x3d   :  { %535 = vmatprep.mubr.bf16.mxu1 %v935_v49 }
  0x43   :  { %463 = vmatmul.mubr.bf16.gmra.mrb[16].mxu0 %v937_v50 }
  0x44   :  { %536 = vmatmul.mubr.bf16.gmra.mrb[16].mxu1 %v938_v51 }
  0xf6   :  { %v801_v52 = vpop.f32.mrb[0].mxu0 }
  0xf7   :  { %v847_v53 = vpop.f32.mrb[0].mxu1  ;;  %v802_v55 = vpop.f32.mrb[1].mxu0 }
  0xf8   :  { %v803_v56 = vadd.f32 %v802_v55, %v801_v52  ;;  %v848_v57 = vpop.f32.mrb[1].mxu1  ;;  %v804_v58 = vpop.f32.mrb[2].mxu0 }
  0xf9   :  { %v849_v59 = vadd.f32 %v848_v57, %v847_v53  ;;  %v850_v60 = vpop.f32.mrb[2].mxu1  ;;  %v805_v61 = vpop.f32.mrb[3].mxu0 }
  0xfa   :  { %v433_v62 = vadd.f32 %v803_v56, %v1118_v54  ;;  %v806_v63 = vadd.f32 %v805_v61, %v804_v58  ;;  %v851_v0 = vpop.f32.mrb[3].mxu1 }
  0xfb   :  { %v852_v1 = vadd.f32 %v851_v0, %v850_v60 }
  0xfc   :  { %v506_v2 = vadd.f32 %v849_v59, %v433_v62  ;;  %v436_v3 = vadd.f32 %v806_v63, %v1118_v54 }
  0xfe   :  { %v509_v4 = vadd.f32 %v852_v1, %v436_v3  ;;  %v807_v5 = vpop.f32.mrb[4].mxu0  ;;  %v544_v8 = vmax.f32 %v506_v2, 0.0 }
  0xff   :  { %v853_v6 = vpop.f32.mrb[4].mxu1  ;;  %v808_v7 = vpop.f32.mrb[5].mxu0 }
 0x100   :  { %v545_v9 = vmax.f32 %v509_v4, 0.0  ;;  %v809_v10 = vadd.f32 %v808_v7, %v807_v5  ;;  %v854_v11 = vpop.f32.mrb[5].mxu1  ;;  %v810_v12 = vpop.f32.mrb[6].mxu0 }
 0x101   :  { %v855_v13 = vadd.f32 %v854_v11, %v853_v6  ;;  %v856_v14 = vpop.f32.mrb[6].mxu1  ;;  %v811_v15 = vpop.f32.mrb[7].mxu0 }
 0x102   :  { %v759_v16 = vpack.c.bf16 %v545_v9, %v544_v8  ;;  %v441_v17 = vadd.f32 %v809_v10, %v1118_v54  ;;  %v812_v18 = vadd.f32 %v811_v15, %v810_v12  ;;  %v857_v19 = vpop.f32.mrb[7].mxu1 }
 0x103   :  { %v858_v20 = vadd.f32 %v857_v19, %v856_v14 }
 0x104   :  { %760 = vst [vmem:[#allocation2] sm:$0xff] %v759_v16   ;;  %v514_v21 = vadd.f32 %v855_v13, %v441_v17  ;;  %v444_v22 = vadd.f32 %v812_v18, %v1118_v54 }
 0x106   :  { %v517_v23 = vadd.f32 %v858_v20, %v444_v22  ;;  %v813_v24 = vpop.f32.mrb[8].mxu0  ;;  %v546_v27 = vmax.f32 %v514_v21, 0.0 }
 0x107   :  { %v859_v25 = vpop.f32.mrb[8].mxu1  ;;  %v814_v26 = vpop.f32.mrb[9].mxu0 }
 0x108   :  { %v547_v28 = vmax.f32 %v517_v23, 0.0  ;;  %v815_v29 = vadd.f32 %v814_v26, %v813_v24  ;;  %v860_v30 = vpop.f32.mrb[9].mxu1  ;;  %v816_v31 = vpop.f32.mrb[10].mxu0 }
 0x109   :  { %v861_v32 = vadd.f32 %v860_v30, %v859_v25  ;;  %v862_v33 = vpop.f32.mrb[10].mxu1  ;;  %v817_v34 = vpop.f32.mrb[11].mxu0 }
 0x10a   :  { %v764_v35 = vpack.c.bf16 %v547_v28, %v546_v27  ;;  %v449_v36 = vadd.f32 %v815_v29, %v1118_v54  ;;  %v818_v37 = vadd.f32 %v817_v34, %v816_v31  ;;  %v863_v38 = vpop.f32.mrb[11].mxu1 }
 0x10b   :  { %v621_v39 = vld [vmem:[#allocation2] sm:$0xff]   ;;  %v864_v40 = vadd.f32 %v863_v38, %v862_v33 }
 0x10c   :  { %622 = vst [vmem:[%s1148_s3] sm:$0xff] %v621_v39   ;;  %781 = vst [vmem:[#allocation2 + $0x8] sm:$0xff] %v764_v35   ;;  %v522_v41 = vadd.f32 %v861_v32, %v449_v36  ;;  %v452_v42 = vadd.f32 %v818_v37, %v1118_v54 }
 0x10e   :  { %v525_v43 = vadd.f32 %v864_v40, %v452_v42  ;;  %v819_v44 = vpop.f32.mrb[12].mxu0  ;;  %v548_v47 = vmax.f32 %v522_v41, 0.0 }
 0x10f   :  { %v865_v45 = vpop.f32.mrb[12].mxu1  ;;  %v820_v46 = vpop.f32.mrb[13].mxu0 }
 0x110   :  { %v549_v48 = vmax.f32 %v525_v43, 0.0  ;;  %v821_v49 = vadd.f32 %v820_v46, %v819_v44  ;;  %v866_v50 = vpop.f32.mrb[13].mxu1  ;;  %v822_v51 = vpop.f32.mrb[14].mxu0 }
 0x111   :  { %v867_v52 = vadd.f32 %v866_v50, %v865_v45  ;;  %v868_v53 = vpop.f32.mrb[14].mxu1  ;;  %v823_v55 = vpop.f32.mrb[15].mxu0 }
 0x112   :  { %v769_v56 = vpack.c.bf16 %v549_v48, %v548_v47  ;;  %v457_v57 = vadd.f32 %v821_v49, %v1118_v54  ;;  %v824_v58 = vadd.f32 %v823_v55, %v822_v51  ;;  %v869_v59 = vpop.f32.mrb[15].mxu1 }
 0x113   :  { %v625_v60 = vld [vmem:[#allocation2 + $0x8] sm:$0xff]   ;;  %v870_v61 = vadd.f32 %v869_v59, %v868_v53 }
 0x114   :  { %626 = vst [vmem:[%s1148_s3 + $0x8] sm:$0xff] %v625_v60   ;;  %782 = vst [vmem:[#allocation2 + $0x10] sm:$0xff] %v769_v56   ;;  %v530_v62 = vadd.f32 %v867_v52, %v457_v57  ;;  %v460_v63 = vadd.f32 %v824_v58, %v1118_v54 }
 0x116   :  { %v533_v0 = vadd.f32 %v870_v61, %v460_v63  ;;  %v825_v1 = vpop.f32.mrb[16].mxu0  ;;  %v550_v4 = vmax.f32 %v530_v62, 0.0 }
 0x117   :  { %v871_v2 = vpop.f32.mrb[16].mxu1  ;;  %v826_v3 = vpop.f32.mrb[17].mxu0 }
 0x118   :  { %v551_v5 = vmax.f32 %v533_v0, 0.0  ;;  %v827_v6 = vadd.f32 %v826_v3, %v825_v1  ;;  %v872_v7 = vpop.f32.mrb[17].mxu1  ;;  %v828_v8 = vpop.f32.mrb[18].mxu0 }
 0x119   :  { %v873_v9 = vadd.f32 %v872_v7, %v871_v2  ;;  %v874_v10 = vpop.f32.mrb[18].mxu1  ;;  %v829_v11 = vpop.f32.mrb[19].mxu0 }
 0x11a   :  { %v774_v12 = vpack.c.bf16 %v551_v5, %v550_v4  ;;  %v465_v13 = vadd.f32 %v827_v6, %v1118_v54  ;;  %v830_v14 = vadd.f32 %v829_v11, %v828_v8  ;;  %v875_v15 = vpop.f32.mrb[19].mxu1 }
 0x11b   :  { %v629_v16 = vld [vmem:[#allocation2 + $0x10] sm:$0xff]   ;;  %v876_v17 = vadd.f32 %v875_v15, %v874_v10 }
 0x11c   :  { %630 = vst [vmem:[%s1148_s3 + $0x10] sm:$0xff] %v629_v16   ;;  %783 = vst [vmem:[#allocation2 + $0x18] sm:$0xff] %v774_v12   ;;  %v538_v18 = vadd.f32 %v873_v9, %v465_v13  ;;  %v468_v19 = vadd.f32 %v830_v14, %v1118_v54 }
 0x11e   :  { %v541_v20 = vadd.f32 %v876_v17, %v468_v19  ;;  %v552_v21 = vmax.f32 %v538_v18, 0.0 }
 0x120   :  { %v553_v22 = vmax.f32 %v541_v20, 0.0 }
 0x122   :  { %v779_v23 = vpack.c.bf16 %v553_v22, %v552_v21 }
 0x123   :  { %v633_v24 = vld [vmem:[#allocation2 + $0x18] sm:$0xff]  }
 0x124   :  { %634 = vst [vmem:[%s1148_s3 + $0x18] sm:$0xff] %v633_v24   ;;  %784 = vst [vmem:[#allocation2 + $0x20] sm:$0xff] %v779_v23  }
 0x12b   :  { %v637_v25 = vld [vmem:[#allocation2 + $0x20] sm:$0xf] }
 0x12c   :  { %638 = vst [vmem:[%s1148_s3 + $0x20] sm:$0xf] %v637_v25 }

// kernel: mario_cnn_forward.6
= control target key start
LH: loop header
LB: loop body
LE: loop exit
PB: predicated region body
PF: predicated region fallthrough
CT: control target
= control target key end

     0   :  { %vm372_vm0 = vcmask 523264   ;;  %s913_s1 = inlined_call_operand.vmem [shape: bf16[576,128], index: 1, kind: input, shape index: {}]   ;;  %s914_s0 = inlined_call_operand.vmem [shape: bf16[32,576], index: 0, kind: input, shape index: {}]   ;;  %s915_s2 = inlined_call_operand.vmem [shape: f32[1,128], index: 2, kind: input, shape index: {}]   ;;  %s916_s3 = inlined_call_operand.vmem [shape: bf16[32,128], index: 3, kind: output, shape index: {}]  }
   0x1   :  { %v696_v0 = vld [vmem:[%s913_s1 + $0x40] sm:$0xff]   ;;  %v700_v4 = vld [vmem:[%s913_s1 + $0x48] sm:$0xff]   ;;  %v704_v8 = vld [vmem:[%s913_s1 + $0x50] sm:$0xff]  }
   0x2   :  { %v697_v1 = vld [vmem:[%s913_s1] sm:$0xff]   ;;  %622 = vmatprep.subr.bf16.mxu0 %v696_v0  ;;  %v701_v5 = vld [vmem:[%s913_s1 + $0x8] sm:$0xff]   ;;  %v705_v9 = vld [vmem:[%s913_s1 + $0x10] sm:$0xff]  }
   0x3   :  { %v698_v2 = vld [vmem:[%s913_s1 + $0xc0] sm:$0xff]   ;;  %623 = vmatpush3.bf16.msra.mxu0 %v697_v1  ;;  %v702_v6 = vld [vmem:[%s913_s1 + $0xc8] sm:$0xff]   ;;  %v706_v10 = vld [vmem:[%s913_s1 + $0xd0] sm:$0xff]  }
   0x4   :  { %v699_v3 = vld [vmem:[%s913_s1 + $0x80] sm:$0xff]   ;;  %650 = vmatprep.subr.bf16.mxu1 %v698_v2  ;;  %624 = vmatprep.subr.bf16.mxu0 %v700_v4  ;;  %v703_v7 = vld [vmem:[%s913_s1 + $0x88] sm:$0xff]   ;;  %v707_v11 = vld [vmem:[%s913_s1 + $0x90] sm:$0xff]  }
   0x5   :  { %651 = vmatpush3.bf16.msra.mxu1 %v699_v3  ;;  %v708_v12 = vld [vmem:[%s913_s1 + $0x58] sm:$0xff]   ;;  %v712_v16 = vld [vmem:[%s913_s1 + $0x60] sm:$0xff]   ;;  %v716_v20 = vld [vmem:[%s913_s1 + $0x68] sm:$0xff]  }
   0x6   :  { %652 = vmatprep.subr.bf16.mxu1 %v702_v6  ;;  %v709_v13 = vld [vmem:[%s913_s1 + $0x18] sm:$0xff]   ;;  %v713_v17 = vld [vmem:[%s913_s1 + $0x20] sm:$0xff]   ;;  %v717_v21 = vld [vmem:[%s913_s1 + $0x28] sm:$0xff]  }
   0x7   :  { %625 = vmatpush3.bf16.msra.mxu0 %v701_v5  ;;  %v710_v14 = vld [vmem:[%s913_s1 + $0xd8] sm:$0xff]   ;;  %v714_v18 = vld [vmem:[%s913_s1 + $0xe0] sm:$0xff]   ;;  %v718_v22 = vld [vmem:[%s913_s1 + $0xe8] sm:$0xff]  }
   0x8   :  { %626 = vmatprep.subr.bf16.mxu0 %v704_v8  ;;  %v711_v15 = vld [vmem:[%s913_s1 + $0x98] sm:$0xff]   ;;  %v715_v19 = vld [vmem:[%s913_s1 + $0xa0] sm:$0xff]   ;;  %v719_v23 = vld [vmem:[%s913_s1 + $0xa8] sm:$0xff]  }
   0x9   :  { %653 = vmatpush3.bf16.msra.mxu1 %v703_v7  ;;  %v720_v24 = vld [vmem:[%s913_s1 + $0x70] sm:$0xff]   ;;  %v724_v28 = vld [vmem:[%s913_s1 + $0x78] sm:$0xff]   ;;  %v731_v34 = vld [vmem:[%s913_s1 + $0x100] sm:$0xff]  }
   0xa   :  { %654 = vmatprep.subr.bf16.mxu1 %v706_v10  ;;  %v721_v25 = vld [vmem:[%s913_s1 + $0x30] sm:$0xff]   ;;  %v725_v29 = vld [vmem:[%s913_s1 + $0x38] sm:$0xff]   ;;  %v734_v36 = vld [vmem:[%s914_s0 + $0xc] ss:$20 sps:$4 sm:$0xff]  }
   0xb   :  { %627 = vmatpush3.bf16.msra.mxu0 %v705_v9  ;;  %v722_v26 = vld [vmem:[%s913_s1 + $0xf0] sm:$0xff]   ;;  %v726_v30 = vld [vmem:[%s913_s1 + $0xf8] sm:$0xff]   ;;  %v735_v37 = vld [vmem:[%s913_s1 + $0x108] sm:$0xff]   ;;  %460 = vmatprep.mubr.bf16.mxu1 %v734_v36 }
   0xc   :  { %628 = vmatprep.subr.bf16.mxu0 %v708_v12  ;;  %v723_v27 = vld [vmem:[%s913_s1 + $0xb0] sm:$0xff]   ;;  %v729_v32 = vld [vmem:[%s914_s0 + $0x4] ss:$20 sps:$4 sm:$0xff]   ;;  %v732_v35 = vld [vmem:[%s914_s0 + $0x8] ss:$20 sps:$4 sm:$0xff]  }
   0xd   :  { %655 = vmatpush3.bf16.msra.mxu1 %v707_v11  ;;  %v727_v31 = vld [vmem:[%s914_s0] ss:$20 sps:$4 sm:$0xff]   ;;  %v730_v33 = vld [vmem:[%s913_s1 + $0xb8] sm:$0xff]   ;;  %411 = vmatprep.mubr.bf16.mxu0 %v729_v32  ;;  %v742_v42 = vld [vmem:[%s914_s0 + $0x30] ss:$20 sps:$4 sm:$0xff]  }
   0xe   :  { %656 = vmatprep.subr.bf16.mxu1 %v710_v14  ;;  %v736_v38 = vld [vmem:[%s914_s0 + $0x2c] ss:$20 sps:$4 sm:$0xff]   ;;  %v738_v39 = vld [vmem:[%s914_s0 + $0x28] ss:$20 sps:$4 sm:$0xff]   ;;  %v739_v40 = vld [vmem:[%s913_s1 + $0x110] sm:$0xff]  }
   0xf   :  { %629 = vmatpush3.bf16.msra.mxu0 %v709_v13  ;;  %v740_v41 = vld [vmem:[%s914_s0 + $0x34] ss:$20 sps:$4 sm:$0xff]   ;;  %v743_v43 = vld [vmem:[%s913_s1 + $0x118] sm:$0xff]   ;;  %v744_v44 = vld [vmem:[%s914_s0 + $0x10] ss:$20 sps:$4 sm:$0xff]  }
  0x10   :  { %630 = vmatprep.subr.bf16.mxu0 %v712_v16  ;;  %v745_v45 = vld [vmem:[%s914_s0 + $0x38] ss:$20 sps:$4 sm:$0xff]   ;;  %v554_v47 = vld [vmem:[%s915_s2] ss:$0 sm:$0xff] }
  0x11   :  { %657 = vmatpush3.bf16.msra.mxu1 %v711_v15 }
  0x12   :  { %658 = vmatprep.subr.bf16.mxu1 %v714_v18 }
  0x13   :  { %631 = vmatpush3.bf16.msra.mxu0 %v713_v17 }
  0x14   :  { %632 = vmatprep.subr.bf16.mxu0 %v716_v20 }
  0x15   :  { %659 = vmatpush3.bf16.msra.mxu1 %v715_v19 }
  0x16   :  { %660 = vmatprep.subr.bf16.mxu1 %v718_v22 }
  0x17   :  { %633 = vmatpush3.bf16.msra.mxu0 %v717_v21 }
  0x18   :  { %634 = vmatprep.subr.bf16.mxu0 %v720_v24 }
  0x19   :  { %661 = vmatpush3.bf16.msra.mxu1 %v719_v23 }
  0x1a   :  { %662 = vmatprep.subr.bf16.mxu1 %v722_v26 }
  0x1b   :  { %635 = vmatpush3.bf16.msra.mxu0 %v721_v25 }
  0x1c   :  { %636 = vmatprep.subr.bf16.mxu0 %v724_v28 }
  0x1d   :  { %663 = vmatpush3.bf16.msra.mxu1 %v723_v27 }
  0x1e   :  { %664 = vmatprep.subr.bf16.mxu1 %v726_v30 }
  0x1f   :  { %637 = vmatpush3.bf16.msra.mxu0 %v725_v29 }
  0x20   :  { %684 = vmatprep.subr.bf16.mxu0 %v731_v34 }
  0x21   :  { %665 = vmatpush3.bf16.msra.mxu1 %v730_v33 }
  0x22   :  { %412 = vmatmul.mubr.bf16.vlgmr.msra.gmra.mrb[0].mxu0 %v727_v31 }
  0x23   :  { %685 = vmatpush3.bf16.msra.mxu0 %v731_v34  ;;  %419 = vmatprep.mubr.bf16.mxu0 %v736_v38 }
  0x24   :  { %461 = vmatmul.mubr.bf16.vlgmr.msra.gmra.mrb[0].mxu1 %v732_v35  ;;  %686 = vmatprep.subr.bf16.mxu0 %v735_v37 }
  0x25   :  { %468 = vmatprep.mubr.bf16.mxu1 %v740_v41 }
  0x27   :  { %687 = vmatpush3.bf16.msra.mxu0 %v735_v37 }
  0x28   :  { %688 = vmatprep.subr.bf16.mxu0 %v739_v40 }
  0x2a   :  { %420 = vmatmul.mubr.bf16.gmra.mrb[4].mxu0 %v738_v39 }
  0x2b   :  { %692 = vmatprep.mubr.msk.bf16.mxu0 %vm372_vm0, %v744_v44  ;;  %689 = vmatpush3.bf16.msra.mxu0 %v739_v40 }
  0x2c   :  { %469 = vmatmul.mubr.bf16.gmra.mrb[4].mxu1 %v742_v42  ;;  %690 = vmatprep.subr.bf16.mxu0 %v743_v43 }
  0x2f   :  { %691 = vmatpush3.bf16.msra.mxu0 %v743_v43 }
  0x32   :  { %693 = vmatmul.mubr.msk.bf16.vlgmr.msra.gmra.mrb[8].mxu0 %vm372_vm0, %v745_v45 }
  0xf5   :  { %v638_v46 = vpop.f32.mrb[0].mxu0 }
  0xf6   :  { %v639_v48 = vpop.f32.mrb[1].mxu0 }
  0xf7   :  { %v640_v49 = vadd.f32 %v639_v48, %v638_v46  ;;  %v641_v50 = vpop.f32.mrb[2].mxu0  ;;  %v666_v51 = vpop.f32.mrb[0].mxu1 }
  0xf8   :  { %v642_v52 = vpop.f32.mrb[3].mxu0  ;;  %v667_v55 = vpop.f32.mrb[1].mxu1 }
  0xf9   :  { %v414_v53 = vadd.f32 %v640_v49, %v554_v47  ;;  %v643_v54 = vadd.f32 %v642_v52, %v641_v50  ;;  %v668_v56 = vadd.f32 %v667_v55, %v666_v51  ;;  %v669_v57 = vpop.f32.mrb[2].mxu1 }
  0xfa   :  { %v670_v59 = vpop.f32.mrb[3].mxu1 }
  0xfb   :  { %v417_v58 = vadd.f32 %v643_v54, %v554_v47  ;;  %v671_v60 = vadd.f32 %v670_v59, %v669_v57  ;;  %v463_v61 = vadd.f32 %v668_v56, %v414_v53 }
  0xfd   :  { %v644_v62 = vpop.f32.mrb[4].mxu0  ;;  %v466_v0 = vadd.f32 %v671_v60, %v417_v58 }
  0xfe   :  { %v645_v63 = vpop.f32.mrb[5].mxu0 }
  0xff   :  { %v646_v1 = vadd.f32 %v645_v63, %v644_v62  ;;  %v647_v2 = vpop.f32.mrb[6].mxu0  ;;  %v672_v3 = vpop.f32.mrb[4].mxu1 }
 0x100   :  { %v648_v4 = vpop.f32.mrb[7].mxu0  ;;  %v673_v7 = vpop.f32.mrb[5].mxu1 }
 0x101   :  { %v422_v5 = vadd.f32 %v646_v1, %v554_v47  ;;  %v649_v6 = vadd.f32 %v648_v4, %v647_v2  ;;  %v674_v8 = vadd.f32 %v673_v7, %v672_v3  ;;  %v675_v9 = vpop.f32.mrb[6].mxu1 }
 0x102   :  { %v676_v11 = vpop.f32.mrb[7].mxu1 }
 0x103   :  { %v425_v10 = vadd.f32 %v649_v6, %v554_v47  ;;  %v677_v12 = vadd.f32 %v676_v11, %v675_v9  ;;  %v471_v13 = vadd.f32 %v674_v8, %v422_v5 }
 0x105   :  { %v694_v14 = vpop.f32.mrb[8].mxu0  ;;  %v474_v15 = vadd.f32 %v677_v12, %v425_v10 }
 0x106   :  { %v520_v16 = vadd.f32 %v694_v14, %v471_v13  ;;  %v511_v17 = vpop.f32.mrb[9].mxu0 }
 0x107   :  { %v512_v18 = vadd.f32 %v511_v17, %v463_v61  ;;  %v695_v19 = vpop.f32.mrb[10].mxu0 }
 0x108   :  { %v523_v20 = vadd.f32 %v695_v19, %v474_v15  ;;  %v514_v21 = vpop.f32.mrb[11].mxu0  ;;  %v528_v23 = vmax.f32 %v520_v16, 0.0 }
 0x109   :  { %v515_v22 = vadd.f32 %v514_v21, %v466_v0  ;;  %v526_v25 = vmax.f32 %v512_v18, 0.0 }
 0x10a   :  { %v529_v24 = vmax.f32 %v523_v20, 0.0 }
 0x10b   :  { %v527_v26 = vmax.f32 %v515_v22, 0.0 }
 0x10c   :  { %v619_v27 = vpack.c.bf16 %v529_v24, %v528_v23 }
 0x10d   :  { %v614_v28 = vpack.c.bf16 %v527_v26, %v526_v25 }
 0x10e   :  { %621 = vst [vmem:[%s916_s3 + $0x8] sm:$0xff] %v619_v27  }
 0x10f   :  { %615 = vst [vmem:[%s916_s3] sm:$0xff] %v614_v28  }

// kernel: mario_cnn_forward.7
= control target key start
LH: loop header
LB: loop body
LE: loop exit
PB: predicated region body
PF: predicated region fallthrough
CT: control target
= control target key end

     0   :  { %s2689_s15 = smov 0   ;;  %s2691_s16 = smov 0   ;;  %s3249_s0 = inlined_call_operand.vmem [shape: bf16[16,1024], index: 0, kind: input, shape index: {}]   ;;  %s3250_s1 = inlined_call_operand.vmem [shape: bf16[1024,512], index: 1, kind: input, shape index: {}]   ;;  %s3251_s2 = inlined_call_operand.vmem [shape: f32[1,512], index: 2, kind: input, shape index: {}]   ;;  %s3252_s3 = inlined_call_operand.vmem [shape: f32[512,128], index: 3, kind: input, shape index: {}]   ;;  %s3253_s4 = inlined_call_operand.vmem [shape: f32[2,16,128], index: 4, kind: output, shape index: {}]  }
   0x1   :  { %s2693_s17 = smov 0   ;;  %s2695_s18 = smov 0  }
   0x2   :  { %s2697_s19 = smov 0  }
   0x3 LB: > { %s29_s20 = sadd.s32 1, %s2658_s18  ;;  %p77_p1 = scmp.ne.s32.totalorder %s2650_s16, %s2646_s15  ;;  %s2662_s19 = sphi %s2697_s19, %s14_s19   ;;  %s2658_s18 = sphi %s2695_s18, %s3257_s18   ;;  %s2654_s17 = sphi %s2693_s17, %s3256_s17   ;;  %s2650_s16 = sphi %s2691_s16, %s3255_s16   ;;  %s2646_s15 = sphi %s2689_s15, %s3254_s15  }
   0x4   : > { %p31_p0 = scmp.ge.s32.totalorder %s29_s20, 2  ;;  %p78_p2 = scmp.eq.s32.totalorder %s2662_s19, 0 }
   0x5   : > { %s70_s22 = sadd.s32 1, %s2650_s16  ;;  %p2143_p5 = scmp.ge.s32.totalorder %s2662_s19, 2 }
   0x6   : > { %s3259_s20 = smov (%p31_p0, %s29_s20), 0  ;;  %p79_p3 = por %p78_p2, %p77_p1 }
   0x7   : > { %s66_s21 = ssub.s32 %s2658_s18, %s3259_s20  ;;  %198 = sbr.rel (%p2143_p5) target bundleno = 82 (0x52), region = 20 }
   0x8   : > { %p68_p4 = scmp.eq.s32.totalorder %s66_s21, 0 }
   0xa   : > { %s2724_s23 = scalar_select %p68_p4, %s2650_s16, %s70_s22  }
   0xe   : > { %201 = sbr.rel (!%p79_p3) target bundleno = 82 (0x52), region = 24  ;;  %s203_s24 = sand.u32 (%p79_p3), 1, %s2650_s16  }
   0xf   : > { %s2292_s25 = sshll.u32 (%p79_p3), %s2658_s18, 3  ;;  %s2144_s26 = sshll.u32 (%p79_p3), %s203_s24, 10 }
  0x10   : > { %s2732_s29 = scalar_lea.vmem (%p79_p3), %s3250_s1, %s2292_s25  ;;  %s2737_s30 = scalar_lea.vmem (%p79_p3), [#allocation3], %s2144_s26 }
  0x11   : > { %v493_v0 = vld [vmem:[%s2732_s29] sm:$0xff] (%p79_p3)  ;;  %v495_v1 = vld [vmem:[%s2732_s29 + $0x10] sm:$0xff] (%p79_p3) }
  0x12   : > { %v497_v2 = vld [vmem:[%s2732_s29 + $0x20] sm:$0xff] (%p79_p3)  ;;  %494 = vst [vmem:[%s2737_s30] sm:$0xff] (%p79_p3), %v493_v0  ;;  %496 = vst [vmem:[%s2737_s30 + $0x8] sm:$0xff] (%p79_p3), %v495_v1  ;;  %v499_v3 = vld [vmem:[%s2732_s29 + $0x30] sm:$0xff] (%p79_p3) }
  0x13   : > { %498 = vst [vmem:[%s2737_s30 + $0x10] sm:$0xff] (%p79_p3), %v497_v2  ;;  %v501_v4 = vld [vmem:[%s2732_s29 + $0x40] sm:$0xff] (%p79_p3)  ;;  %v503_v5 = vld [vmem:[%s2732_s29 + $0x50] sm:$0xff] (%p79_p3)  ;;  %500 = vst [vmem:[%s2737_s30 + $0x18] sm:$0xff] (%p79_p3), %v499_v3 }
  0x14   : > { %502 = vst [vmem:[%s2737_s30 + $0x20] sm:$0xff] (%p79_p3), %v501_v4  ;;  %504 = vst [vmem:[%s2737_s30 + $0x28] sm:$0xff] (%p79_p3), %v503_v5  ;;  %v505_v6 = vld [vmem:[%s2732_s29 + $0x60] sm:$0xff] (%p79_p3)  ;;  %v507_v7 = vld [vmem:[%s2732_s29 + $0x70] sm:$0xff] (%p79_p3) }
  0x15   : > { %v509_v8 = vld [vmem:[%s2732_s29 + $0x80] sm:$0xff]  ;;  %506 = vst [vmem:[%s2737_s30 + $0x30] sm:$0xff] %v505_v6  ;;  %508 = vst [vmem:[%s2737_s30 + $0x38] sm:$0xff] %v507_v7  ;;  %v511_v9 = vld [vmem:[%s2732_s29 + $0x90] sm:$0xff] }
  0x16   : > { %510 = vst [vmem:[%s2737_s30 + $0x40] sm:$0xff] %v509_v8  ;;  %v513_v10 = vld [vmem:[%s2732_s29 + $0xa0] sm:$0xff]  ;;  %v515_v11 = vld [vmem:[%s2732_s29 + $0xb0] sm:$0xff]  ;;  %512 = vst [vmem:[%s2737_s30 + $0x48] sm:$0xff] %v511_v9 }
  0x17   : > { %514 = vst [vmem:[%s2737_s30 + $0x50] sm:$0xff] %v513_v10  ;;  %516 = vst [vmem:[%s2737_s30 + $0x58] sm:$0xff] %v515_v11  ;;  %v517_v12 = vld [vmem:[%s2732_s29 + $0xc0] sm:$0xff]  ;;  %v519_v13 = vld [vmem:[%s2732_s29 + $0xd0] sm:$0xff] }
  0x18   : > { %v521_v14 = vld [vmem:[%s2732_s29 + $0xe0] sm:$0xff]  ;;  %518 = vst [vmem:[%s2737_s30 + $0x60] sm:$0xff] %v517_v12  ;;  %520 = vst [vmem:[%s2737_s30 + $0x68] sm:$0xff] %v519_v13  ;;  %v523_v15 = vld [vmem:[%s2732_s29 + $0xf0] sm:$0xff] }
  0x19   : > { %522 = vst [vmem:[%s2737_s30 + $0x70] sm:$0xff] %v521_v14  ;;  %v525_v16 = vld [vmem:[%s2732_s29 + $0x100] sm:$0xff]  ;;  %v527_v17 = vld [vmem:[%s2732_s29 + $0x110] sm:$0xff]  ;;  %524 = vst [vmem:[%s2737_s30 + $0x78] sm:$0xff] %v523_v15 }
  0x1a   : > { %526 = vst [vmem:[%s2737_s30 + $0x80] sm:$0xff] %v525_v16  ;;  %528 = vst [vmem:[%s2737_s30 + $0x88] sm:$0xff] %v527_v17  ;;  %v529_v18 = vld [vmem:[%s2732_s29 + $0x120] sm:$0xff]  ;;  %v531_v19 = vld [vmem:[%s2732_s29 + $0x130] sm:$0xff] }
  0x1b   : > { %v533_v20 = vld [vmem:[%s2732_s29 + $0x140] sm:$0xff]  ;;  %530 = vst [vmem:[%s2737_s30 + $0x90] sm:$0xff] %v529_v18  ;;  %532 = vst [vmem:[%s2737_s30 + $0x98] sm:$0xff] %v531_v19  ;;  %v535_v21 = vld [vmem:[%s2732_s29 + $0x150] sm:$0xff] }
  0x1c   : > { %534 = vst [vmem:[%s2737_s30 + $0xa0] sm:$0xff] %v533_v20  ;;  %v537_v22 = vld [vmem:[%s2732_s29 + $0x160] sm:$0xff]  ;;  %v539_v23 = vld [vmem:[%s2732_s29 + $0x170] sm:$0xff]  ;;  %536 = vst [vmem:[%s2737_s30 + $0xa8] sm:$0xff] %v535_v21 }
  0x1d   : > { %538 = vst [vmem:[%s2737_s30 + $0xb0] sm:$0xff] %v537_v22  ;;  %540 = vst [vmem:[%s2737_s30 + $0xb8] sm:$0xff] %v539_v23  ;;  %v541_v24 = vld [vmem:[%s2732_s29 + $0x180] sm:$0xff]  ;;  %v543_v25 = vld [vmem:[%s2732_s29 + $0x190] sm:$0xff] }
  0x1e   : > { %v545_v26 = vld [vmem:[%s2732_s29 + $0x1a0] sm:$0xff]  ;;  %542 = vst [vmem:[%s2737_s30 + $0xc0] sm:$0xff] %v541_v24  ;;  %544 = vst [vmem:[%s2737_s30 + $0xc8] sm:$0xff] %v543_v25  ;;  %v547_v27 = vld [vmem:[%s2732_s29 + $0x1b0] sm:$0xff] }
  0x1f   : > { %546 = vst [vmem:[%s2737_s30 + $0xd0] sm:$0xff] %v545_v26  ;;  %v549_v28 = vld [vmem:[%s2732_s29 + $0x1c0] sm:$0xff]  ;;  %v551_v29 = vld [vmem:[%s2732_s29 + $0x1d0] sm:$0xff]  ;;  %548 = vst [vmem:[%s2737_s30 + $0xd8] sm:$0xff] %v547_v27 }
  0x20   : > { %550 = vst [vmem:[%s2737_s30 + $0xe0] sm:$0xff] %v549_v28  ;;  %552 = vst [vmem:[%s2737_s30 + $0xe8] sm:$0xff] %v551_v29  ;;  %v553_v30 = vld [vmem:[%s2732_s29 + $0x1e0] sm:$0xff]  ;;  %v555_v31 = vld [vmem:[%s2732_s29 + $0x1f0] sm:$0xff] }
  0x21   : > { %v557_v32 = vld [vmem:[%s2732_s29 + $0x200] sm:$0xff]  ;;  %554 = vst [vmem:[%s2737_s30 + $0xf0] sm:$0xff] %v553_v30  ;;  %556 = vst [vmem:[%s2737_s30 + $0xf8] sm:$0xff] %v555_v31  ;;  %v559_v33 = vld [vmem:[%s2732_s29 + $0x210] sm:$0xff] }
  0x22   : > { %558 = vst [vmem:[%s2737_s30 + $0x100] sm:$0xff] %v557_v32  ;;  %v561_v34 = vld [vmem:[%s2732_s29 + $0x220] sm:$0xff]  ;;  %v563_v35 = vld [vmem:[%s2732_s29 + $0x230] sm:$0xff]  ;;  %560 = vst [vmem:[%s2737_s30 + $0x108] sm:$0xff] %v559_v33 }
  0x23   : > { %562 = vst [vmem:[%s2737_s30 + $0x110] sm:$0xff] %v561_v34  ;;  %564 = vst [vmem:[%s2737_s30 + $0x118] sm:$0xff] %v563_v35  ;;  %v565_v36 = vld [vmem:[%s2732_s29 + $0x240] sm:$0xff]  ;;  %v567_v37 = vld [vmem:[%s2732_s29 + $0x250] sm:$0xff] }
  0x24   : > { %v569_v38 = vld [vmem:[%s2732_s29 + $0x260] sm:$0xff]  ;;  %566 = vst [vmem:[%s2737_s30 + $0x120] sm:$0xff] %v565_v36  ;;  %568 = vst [vmem:[%s2737_s30 + $0x128] sm:$0xff] %v567_v37  ;;  %v571_v39 = vld [vmem:[%s2732_s29 + $0x270] sm:$0xff] }
  0x25   : > { %570 = vst [vmem:[%s2737_s30 + $0x130] sm:$0xff] %v569_v38  ;;  %v573_v40 = vld [vmem:[%s2732_s29 + $0x280] sm:$0xff]  ;;  %v575_v41 = vld [vmem:[%s2732_s29 + $0x290] sm:$0xff]  ;;  %572 = vst [vmem:[%s2737_s30 + $0x138] sm:$0xff] %v571_v39 }
  0x26   : > { %574 = vst [vmem:[%s2737_s30 + $0x140] sm:$0xff] %v573_v40  ;;  %576 = vst [vmem:[%s2737_s30 + $0x148] sm:$0xff] %v575_v41  ;;  %v577_v42 = vld [vmem:[%s2732_s29 + $0x2a0] sm:$0xff]  ;;  %v579_v43 = vld [vmem:[%s2732_s29 + $0x2b0] sm:$0xff] }
  0x27   : > { %v581_v44 = vld [vmem:[%s2732_s29 + $0x2c0] sm:$0xff]  ;;  %578 = vst [vmem:[%s2737_s30 + $0x150] sm:$0xff] %v577_v42  ;;  %580 = vst [vmem:[%s2737_s30 + $0x158] sm:$0xff] %v579_v43  ;;  %v583_v45 = vld [vmem:[%s2732_s29 + $0x2d0] sm:$0xff] }
  0x28   : > { %582 = vst [vmem:[%s2737_s30 + $0x160] sm:$0xff] %v581_v44  ;;  %v585_v46 = vld [vmem:[%s2732_s29 + $0x2e0] sm:$0xff]  ;;  %v587_v47 = vld [vmem:[%s2732_s29 + $0x2f0] sm:$0xff]  ;;  %584 = vst [vmem:[%s2737_s30 + $0x168] sm:$0xff] %v583_v45 }
  0x29   : > { %586 = vst [vmem:[%s2737_s30 + $0x170] sm:$0xff] %v585_v46  ;;  %588 = vst [vmem:[%s2737_s30 + $0x178] sm:$0xff] %v587_v47  ;;  %v589_v48 = vld [vmem:[%s2732_s29 + $0x300] sm:$0xff]  ;;  %v591_v49 = vld [vmem:[%s2732_s29 + $0x310] sm:$0xff] }
  0x2a   : > { %v593_v50 = vld [vmem:[%s2732_s29 + $0x320] sm:$0xff]  ;;  %590 = vst [vmem:[%s2737_s30 + $0x180] sm:$0xff] %v589_v48  ;;  %592 = vst [vmem:[%s2737_s30 + $0x188] sm:$0xff] %v591_v49  ;;  %v595_v51 = vld [vmem:[%s2732_s29 + $0x330] sm:$0xff] }
  0x2b   : > { %594 = vst [vmem:[%s2737_s30 + $0x190] sm:$0xff] %v593_v50  ;;  %v597_v52 = vld [vmem:[%s2732_s29 + $0x340] sm:$0xff]  ;;  %v599_v53 = vld [vmem:[%s2732_s29 + $0x350] sm:$0xff]  ;;  %596 = vst [vmem:[%s2737_s30 + $0x198] sm:$0xff] %v595_v51 }
  0x2c   : > { %598 = vst [vmem:[%s2737_s30 + $0x1a0] sm:$0xff] %v597_v52  ;;  %600 = vst [vmem:[%s2737_s30 + $0x1a8] sm:$0xff] %v599_v53  ;;  %v601_v54 = vld [vmem:[%s2732_s29 + $0x360] sm:$0xff]  ;;  %v603_v55 = vld [vmem:[%s2732_s29 + $0x370] sm:$0xff] }
  0x2d   : > { %v605_v56 = vld [vmem:[%s2732_s29 + $0x380] sm:$0xff]  ;;  %602 = vst [vmem:[%s2737_s30 + $0x1b0] sm:$0xff] %v601_v54  ;;  %604 = vst [vmem:[%s2737_s30 + $0x1b8] sm:$0xff] %v603_v55  ;;  %v607_v57 = vld [vmem:[%s2732_s29 + $0x390] sm:$0xff] }
  0x2e   : > { %606 = vst [vmem:[%s2737_s30 + $0x1c0] sm:$0xff] %v605_v56  ;;  %v609_v58 = vld [vmem:[%s2732_s29 + $0x3a0] sm:$0xff]  ;;  %v611_v59 = vld [vmem:[%s2732_s29 + $0x3b0] sm:$0xff]  ;;  %608 = vst [vmem:[%s2737_s30 + $0x1c8] sm:$0xff] %v607_v57 }
  0x2f   : > { %610 = vst [vmem:[%s2737_s30 + $0x1d0] sm:$0xff] %v609_v58  ;;  %612 = vst [vmem:[%s2737_s30 + $0x1d8] sm:$0xff] %v611_v59  ;;  %v613_v60 = vld [vmem:[%s2732_s29 + $0x3c0] sm:$0xff]  ;;  %v615_v61 = vld [vmem:[%s2732_s29 + $0x3d0] sm:$0xff] }
  0x30   : > { %v617_v62 = vld [vmem:[%s2732_s29 + $0x3e0] sm:$0xff]  ;;  %614 = vst [vmem:[%s2737_s30 + $0x1e0] sm:$0xff] %v613_v60  ;;  %616 = vst [vmem:[%s2737_s30 + $0x1e8] sm:$0xff] %v615_v61  ;;  %v619_v63 = vld [vmem:[%s2732_s29 + $0x3f0] sm:$0xff] }
  0x31   : > { %618 = vst [vmem:[%s2737_s30 + $0x1f0] sm:$0xff] %v617_v62  ;;  %v621_v0 = vld [vmem:[%s2732_s29 + $0x400] sm:$0xff]  ;;  %v623_v1 = vld [vmem:[%s2732_s29 + $0x410] sm:$0xff]  ;;  %620 = vst [vmem:[%s2737_s30 + $0x1f8] sm:$0xff] %v619_v63 }
  0x32   : > { %622 = vst [vmem:[%s2737_s30 + $0x200] sm:$0xff] %v621_v0  ;;  %624 = vst [vmem:[%s2737_s30 + $0x208] sm:$0xff] %v623_v1  ;;  %v625_v2 = vld [vmem:[%s2732_s29 + $0x420] sm:$0xff]  ;;  %v627_v3 = vld [vmem:[%s2732_s29 + $0x430] sm:$0xff] }
  0x33   : > { %v629_v4 = vld [vmem:[%s2732_s29 + $0x440] sm:$0xff]  ;;  %626 = vst [vmem:[%s2737_s30 + $0x210] sm:$0xff] %v625_v2  ;;  %628 = vst [vmem:[%s2737_s30 + $0x218] sm:$0xff] %v627_v3  ;;  %v631_v5 = vld [vmem:[%s2732_s29 + $0x450] sm:$0xff] }
  0x34   : > { %630 = vst [vmem:[%s2737_s30 + $0x220] sm:$0xff] %v629_v4  ;;  %v633_v6 = vld [vmem:[%s2732_s29 + $0x460] sm:$0xff]  ;;  %v635_v7 = vld [vmem:[%s2732_s29 + $0x470] sm:$0xff]  ;;  %632 = vst [vmem:[%s2737_s30 + $0x228] sm:$0xff] %v631_v5 }
  0x35   : > { %634 = vst [vmem:[%s2737_s30 + $0x230] sm:$0xff] %v633_v6  ;;  %636 = vst [vmem:[%s2737_s30 + $0x238] sm:$0xff] %v635_v7  ;;  %v637_v8 = vld [vmem:[%s2732_s29 + $0x480] sm:$0xff]  ;;  %v639_v9 = vld [vmem:[%s2732_s29 + $0x490] sm:$0xff] }
  0x36   : > { %v641_v10 = vld [vmem:[%s2732_s29 + $0x4a0] sm:$0xff]  ;;  %638 = vst [vmem:[%s2737_s30 + $0x240] sm:$0xff] %v637_v8  ;;  %640 = vst [vmem:[%s2737_s30 + $0x248] sm:$0xff] %v639_v9  ;;  %v643_v11 = vld [vmem:[%s2732_s29 + $0x4b0] sm:$0xff] }
  0x37   : > { %642 = vst [vmem:[%s2737_s30 + $0x250] sm:$0xff] %v641_v10  ;;  %v645_v12 = vld [vmem:[%s2732_s29 + $0x4c0] sm:$0xff]  ;;  %v647_v13 = vld [vmem:[%s2732_s29 + $0x4d0] sm:$0xff]  ;;  %644 = vst [vmem:[%s2737_s30 + $0x258] sm:$0xff] %v643_v11 }
  0x38   : > { %646 = vst [vmem:[%s2737_s30 + $0x260] sm:$0xff] %v645_v12  ;;  %648 = vst [vmem:[%s2737_s30 + $0x268] sm:$0xff] %v647_v13  ;;  %v649_v14 = vld [vmem:[%s2732_s29 + $0x4e0] sm:$0xff]  ;;  %v651_v15 = vld [vmem:[%s2732_s29 + $0x4f0] sm:$0xff] }
  0x39   : > { %v653_v16 = vld [vmem:[%s2732_s29 + $0x500] sm:$0xff]  ;;  %650 = vst [vmem:[%s2737_s30 + $0x270] sm:$0xff] %v649_v14  ;;  %652 = vst [vmem:[%s2737_s30 + $0x278] sm:$0xff] %v651_v15  ;;  %v655_v17 = vld [vmem:[%s2732_s29 + $0x510] sm:$0xff] }
  0x3a   : > { %654 = vst [vmem:[%s2737_s30 + $0x280] sm:$0xff] %v653_v16  ;;  %v657_v18 = vld [vmem:[%s2732_s29 + $0x520] sm:$0xff]  ;;  %v659_v19 = vld [vmem:[%s2732_s29 + $0x530] sm:$0xff]  ;;  %656 = vst [vmem:[%s2737_s30 + $0x288] sm:$0xff] %v655_v17 }
  0x3b   : > { %658 = vst [vmem:[%s2737_s30 + $0x290] sm:$0xff] %v657_v18  ;;  %660 = vst [vmem:[%s2737_s30 + $0x298] sm:$0xff] %v659_v19  ;;  %v661_v20 = vld [vmem:[%s2732_s29 + $0x540] sm:$0xff]  ;;  %v663_v21 = vld [vmem:[%s2732_s29 + $0x550] sm:$0xff] }
  0x3c   : > { %v665_v22 = vld [vmem:[%s2732_s29 + $0x560] sm:$0xff]  ;;  %662 = vst [vmem:[%s2737_s30 + $0x2a0] sm:$0xff] %v661_v20  ;;  %664 = vst [vmem:[%s2737_s30 + $0x2a8] sm:$0xff] %v663_v21  ;;  %v667_v23 = vld [vmem:[%s2732_s29 + $0x570] sm:$0xff] }
  0x3d   : > { %666 = vst [vmem:[%s2737_s30 + $0x2b0] sm:$0xff] %v665_v22  ;;  %v669_v24 = vld [vmem:[%s2732_s29 + $0x580] sm:$0xff]  ;;  %v671_v25 = vld [vmem:[%s2732_s29 + $0x590] sm:$0xff]  ;;  %668 = vst [vmem:[%s2737_s30 + $0x2b8] sm:$0xff] %v667_v23 }
  0x3e   : > { %670 = vst [vmem:[%s2737_s30 + $0x2c0] sm:$0xff] %v669_v24  ;;  %672 = vst [vmem:[%s2737_s30 + $0x2c8] sm:$0xff] %v671_v25  ;;  %v673_v26 = vld [vmem:[%s2732_s29 + $0x5a0] sm:$0xff]  ;;  %v675_v27 = vld [vmem:[%s2732_s29 + $0x5b0] sm:$0xff] }
  0x3f   : > { %v677_v28 = vld [vmem:[%s2732_s29 + $0x5c0] sm:$0xff]  ;;  %674 = vst [vmem:[%s2737_s30 + $0x2d0] sm:$0xff] %v673_v26  ;;  %676 = vst [vmem:[%s2737_s30 + $0x2d8] sm:$0xff] %v675_v27  ;;  %v679_v29 = vld [vmem:[%s2732_s29 + $0x5d0] sm:$0xff] }
  0x40   : > { %678 = vst [vmem:[%s2737_s30 + $0x2e0] sm:$0xff] %v677_v28  ;;  %v681_v30 = vld [vmem:[%s2732_s29 + $0x5e0] sm:$0xff]  ;;  %v683_v31 = vld [vmem:[%s2732_s29 + $0x5f0] sm:$0xff]  ;;  %680 = vst [vmem:[%s2737_s30 + $0x2e8] sm:$0xff] %v679_v29 }
  0x41   : > { %682 = vst [vmem:[%s2737_s30 + $0x2f0] sm:$0xff] %v681_v30  ;;  %684 = vst [vmem:[%s2737_s30 + $0x2f8] sm:$0xff] %v683_v31  ;;  %v685_v32 = vld [vmem:[%s2732_s29 + $0x600] sm:$0xff]  ;;  %v687_v33 = vld [vmem:[%s2732_s29 + $0x610] sm:$0xff] }
  0x42   : > { %v689_v34 = vld [vmem:[%s2732_s29 + $0x620] sm:$0xff]  ;;  %686 = vst [vmem:[%s2737_s30 + $0x300] sm:$0xff] %v685_v32  ;;  %688 = vst [vmem:[%s2737_s30 + $0x308] sm:$0xff] %v687_v33  ;;  %v691_v35 = vld [vmem:[%s2732_s29 + $0x630] sm:$0xff] }
  0x43   : > { %690 = vst [vmem:[%s2737_s30 + $0x310] sm:$0xff] %v689_v34  ;;  %v693_v36 = vld [vmem:[%s2732_s29 + $0x640] sm:$0xff]  ;;  %v695_v37 = vld [vmem:[%s2732_s29 + $0x650] sm:$0xff]  ;;  %692 = vst [vmem:[%s2737_s30 + $0x318] sm:$0xff] %v691_v35 }
  0x44   : > { %694 = vst [vmem:[%s2737_s30 + $0x320] sm:$0xff] %v693_v36  ;;  %696 = vst [vmem:[%s2737_s30 + $0x328] sm:$0xff] %v695_v37  ;;  %v697_v38 = vld [vmem:[%s2732_s29 + $0x660] sm:$0xff]  ;;  %v699_v39 = vld [vmem:[%s2732_s29 + $0x670] sm:$0xff] }
  0x45   : > { %v701_v40 = vld [vmem:[%s2732_s29 + $0x680] sm:$0xff]  ;;  %698 = vst [vmem:[%s2737_s30 + $0x330] sm:$0xff] %v697_v38  ;;  %700 = vst [vmem:[%s2737_s30 + $0x338] sm:$0xff] %v699_v39  ;;  %v703_v41 = vld [vmem:[%s2732_s29 + $0x690] sm:$0xff] }
  0x46   : > { %702 = vst [vmem:[%s2737_s30 + $0x340] sm:$0xff] %v701_v40  ;;  %v705_v42 = vld [vmem:[%s2732_s29 + $0x6a0] sm:$0xff]  ;;  %v707_v43 = vld [vmem:[%s2732_s29 + $0x6b0] sm:$0xff]  ;;  %704 = vst [vmem:[%s2737_s30 + $0x348] sm:$0xff] %v703_v41 }
  0x47   : > { %706 = vst [vmem:[%s2737_s30 + $0x350] sm:$0xff] %v705_v42  ;;  %708 = vst [vmem:[%s2737_s30 + $0x358] sm:$0xff] %v707_v43  ;;  %v709_v44 = vld [vmem:[%s2732_s29 + $0x6c0] sm:$0xff]  ;;  %v711_v45 = vld [vmem:[%s2732_s29 + $0x6d0] sm:$0xff] }
  0x48   : > { %v713_v46 = vld [vmem:[%s2732_s29 + $0x6e0] sm:$0xff]  ;;  %710 = vst [vmem:[%s2737_s30 + $0x360] sm:$0xff] %v709_v44  ;;  %712 = vst [vmem:[%s2737_s30 + $0x368] sm:$0xff] %v711_v45  ;;  %v715_v47 = vld [vmem:[%s2732_s29 + $0x6f0] sm:$0xff] }
  0x49   : > { %714 = vst [vmem:[%s2737_s30 + $0x370] sm:$0xff] %v713_v46  ;;  %v717_v48 = vld [vmem:[%s2732_s29 + $0x700] sm:$0xff]  ;;  %v719_v49 = vld [vmem:[%s2732_s29 + $0x710] sm:$0xff]  ;;  %716 = vst [vmem:[%s2737_s30 + $0x378] sm:$0xff] %v715_v47 }
  0x4a   : > { %718 = vst [vmem:[%s2737_s30 + $0x380] sm:$0xff] %v717_v48  ;;  %720 = vst [vmem:[%s2737_s30 + $0x388] sm:$0xff] %v719_v49  ;;  %v721_v50 = vld [vmem:[%s2732_s29 + $0x720] sm:$0xff]  ;;  %v723_v51 = vld [vmem:[%s2732_s29 + $0x730] sm:$0xff] }
  0x4b   : > { %v725_v52 = vld [vmem:[%s2732_s29 + $0x740] sm:$0xff]  ;;  %722 = vst [vmem:[%s2737_s30 + $0x390] sm:$0xff] %v721_v50  ;;  %724 = vst [vmem:[%s2737_s30 + $0x398] sm:$0xff] %v723_v51  ;;  %v727_v53 = vld [vmem:[%s2732_s29 + $0x750] sm:$0xff] }
  0x4c   : > { %726 = vst [vmem:[%s2737_s30 + $0x3a0] sm:$0xff] %v725_v52  ;;  %v729_v54 = vld [vmem:[%s2732_s29 + $0x760] sm:$0xff]  ;;  %v731_v55 = vld [vmem:[%s2732_s29 + $0x770] sm:$0xff]  ;;  %728 = vst [vmem:[%s2737_s30 + $0x3a8] sm:$0xff] %v727_v53 }
  0x4d   : > { %730 = vst [vmem:[%s2737_s30 + $0x3b0] sm:$0xff] %v729_v54  ;;  %732 = vst [vmem:[%s2737_s30 + $0x3b8] sm:$0xff] %v731_v55  ;;  %v733_v56 = vld [vmem:[%s2732_s29 + $0x780] sm:$0xff]  ;;  %v735_v57 = vld [vmem:[%s2732_s29 + $0x790] sm:$0xff] }
  0x4e   : > { %v737_v58 = vld [vmem:[%s2732_s29 + $0x7a0] sm:$0xff]  ;;  %734 = vst [vmem:[%s2737_s30 + $0x3c0] sm:$0xff] %v733_v56  ;;  %736 = vst [vmem:[%s2737_s30 + $0x3c8] sm:$0xff] %v735_v57  ;;  %v739_v59 = vld [vmem:[%s2732_s29 + $0x7b0] sm:$0xff] }
  0x4f   : > { %738 = vst [vmem:[%s2737_s30 + $0x3d0] sm:$0xff] %v737_v58  ;;  %v741_v60 = vld [vmem:[%s2732_s29 + $0x7c0] sm:$0xff]  ;;  %v743_v61 = vld [vmem:[%s2732_s29 + $0x7d0] sm:$0xff]  ;;  %740 = vst [vmem:[%s2737_s30 + $0x3d8] sm:$0xff] %v739_v59 }
  0x50   : > { %742 = vst [vmem:[%s2737_s30 + $0x3e0] sm:$0xff] %v741_v60  ;;  %744 = vst [vmem:[%s2737_s30 + $0x3e8] sm:$0xff] %v743_v61  ;;  %v745_v62 = vld [vmem:[%s2732_s29 + $0x7e0] sm:$0xff]  ;;  %v747_v63 = vld [vmem:[%s2732_s29 + $0x7f0] sm:$0xff] }
  0x51   : > { %746 = vst [vmem:[%s2737_s30 + $0x3f0] sm:$0xff] %v745_v62  ;;  %748 = vst [vmem:[%s2737_s30 + $0x3f8] sm:$0xff] %v747_v63 }
  0x52 PF: > { %p2147_p6 = scmp.ge.s32.totalorder %s2662_s19, 1  ;;  %p770_p7 = scmp.lt.s32.totalorder %s2662_s19, 3 }
  0x54   : > { %p771_p8 = pnand %p2147_p6, %p770_p7 }
  0x55   : > { %s777_s5 = sand.u32 (!%p771_p8), 1, %s2646_s15   ;;  %v2998_v0 = vld [vmem:[%s3249_s0] sm:$0xff] (!%p771_p8)  ;;  %v3008_v2 = vld [vmem:[%s3249_s0 + $0x10] sm:$0xff] (!%p771_p8)  ;;  %s2150_s30 = sshll.u32 (!%p771_p8), %s2654_s17, 5 }
  0x56   : > { %774 = sbr.rel (%p771_p8) target bundleno = 656 (0x290), region = 70  ;;  %v3003_v1 = vld [vmem:[%s3249_s0 + $0x20] sm:$0xff] (!%p771_p8)  ;;  %s2148_s12 = sshll.u32 (!%p771_p8), %s777_s5, 10  ;;  %v3017_v5 = vld [vmem:[%s3249_s0 + $0x30] sm:$0xff] (!%p771_p8) }
  0x57   : > { %v2154_v3 = vcombine.low (!%p771_p8), %v2998_v0, %v3003_v1  ;;  %v2155_v4 = vcombine.high (!%p771_p8), %v2998_v0, %v3003_v1  ;;  %v2158_v6 = vcombine.low (!%p771_p8), %v3008_v2, %v3017_v5  ;;  %v2159_v7 = vcombine.high (!%p771_p8), %v3008_v2, %v3017_v5  ;;  %s3023_s15 = scalar_lea.vmem (!%p771_p8), [#allocation3], %s2148_s12  ;;  %p845_p9 = scmp.lt.s32.totalorder (!%p771_p8), %s2150_s30, 63 }
  0x58   : > { %v2432_v8 = vld [vmem:[%s3023_s15 + $0x4] ss:$8 sps:$4 sm:$0xff] (!%p771_p8)   ;;  %v2436_v10 = vld [vmem:[%s3023_s15] ss:$8 sps:$4 sm:$0xff] (!%p771_p8)   ;;  %v2438_v12 = vld [vmem:[%s3023_s15 + $0x14] ss:$8 sps:$4 sm:$0xff] (!%p771_p8)  }
  0x59   : > { %1720 = vmatprep.mubr.bf16.mxu1 (!%p771_p8), %v2155_v4  ;;  %v2434_v9 = vld [vmem:[%s3023_s15 + $0x204] ss:$8 sps:$4 sm:$0xff] (!%p771_p8)   ;;  %1806 = vmatprep.mubr.bf16.mxu0 (!%p771_p8), %v2159_v7  ;;  %v2437_v11 = vld [vmem:[%s3023_s15 + $0x200] ss:$8 sps:$4 sm:$0xff] (!%p771_p8)   ;;  %v2440_v13 = vld [vmem:[%s3023_s15 + $0x214] ss:$8 sps:$4 sm:$0xff] (!%p771_p8)  }
  0x5a   : > { %1688 = vmatprep.subr.bf16.mxu1 (!%p771_p8), %v2432_v8  ;;  %1774 = vmatprep.subr.bf16.mxu0 (!%p771_p8), %v2434_v9  ;;  %v2442_v14 = vld [vmem:[%s3023_s15 + $0x10] ss:$8 sps:$4 sm:$0xff] (!%p771_p8)   ;;  %v2444_v16 = vld [vmem:[%s3023_s15 + $0x24] ss:$8 sps:$4 sm:$0xff] (!%p771_p8)   ;;  %v2448_v18 = vld [vmem:[%s3023_s15 + $0x20] ss:$8 sps:$4 sm:$0xff] (!%p771_p8)  }
  0x5b   : > { %1689 = vmatpush1.bf16.msra.mxu1 (!%p771_p8), %v2436_v10  ;;  %1775 = vmatpush1.bf16.msra.mxu0 (!%p771_p8), %v2437_v11  ;;  %v2443_v15 = vld [vmem:[%s3023_s15 + $0x210] ss:$8 sps:$4 sm:$0xff] (!%p771_p8)   ;;  %v2446_v17 = vld [vmem:[%s3023_s15 + $0x224] ss:$8 sps:$4 sm:$0xff] (!%p771_p8)   ;;  %v2449_v19 = vld [vmem:[%s3023_s15 + $0x220] ss:$8 sps:$4 sm:$0xff] (!%p771_p8)  }
  0x5c   : > { %1690 = vmatprep.subr.bf16.mxu1 (!%p771_p8), %v2438_v12  ;;  %1776 = vmatprep.subr.bf16.mxu0 (!%p771_p8), %v2440_v13  ;;  %v2450_v20 = vld [vmem:[%s3023_s15 + $0x34] ss:$8 sps:$4 sm:$0xff] (!%p771_p8)   ;;  %v2454_v22 = vld [vmem:[%s3023_s15 + $0x30] ss:$8 sps:$4 sm:$0xff] (!%p771_p8)   ;;  %v2456_v24 = vld [vmem:[%s3023_s15 + $0x44] ss:$8 sps:$4 sm:$0xff] (!%p771_p8)  }
  0x5d   : > { %v2452_v21 = vld [vmem:[%s3023_s15 + $0x234] ss:$8 sps:$4 sm:$0xff]   ;;  %v2455_v23 = vld [vmem:[%s3023_s15 + $0x230] ss:$8 sps:$4 sm:$0xff]   ;;  %v2458_v25 = vld [vmem:[%s3023_s15 + $0x244] ss:$8 sps:$4 sm:$0xff]  }
  0x5e   : > { %v2460_v26 = vld [vmem:[%s3023_s15 + $0x40] ss:$8 sps:$4 sm:$0xff]   ;;  %v2462_v28 = vld [vmem:[%s3023_s15 + $0x54] ss:$8 sps:$4 sm:$0xff]   ;;  %v2466_v30 = vld [vmem:[%s3023_s15 + $0x50] ss:$8 sps:$4 sm:$0xff]  }
  0x5f   : > { %1691 = vmatpush1.bf16.msra.mxu1 %v2442_v14  ;;  %1777 = vmatpush1.bf16.msra.mxu0 %v2443_v15  ;;  %v2461_v27 = vld [vmem:[%s3023_s15 + $0x240] ss:$8 sps:$4 sm:$0xff]   ;;  %v2464_v29 = vld [vmem:[%s3023_s15 + $0x254] ss:$8 sps:$4 sm:$0xff]   ;;  %v2467_v31 = vld [vmem:[%s3023_s15 + $0x250] ss:$8 sps:$4 sm:$0xff]  }
  0x60   : > { %1692 = vmatprep.subr.bf16.mxu1 %v2444_v16  ;;  %1778 = vmatprep.subr.bf16.mxu0 %v2446_v17  ;;  %v2468_v32 = vld [vmem:[%s3023_s15 + $0x64] ss:$8 sps:$4 sm:$0xff]   ;;  %v2472_v34 = vld [vmem:[%s3023_s15 + $0x60] ss:$8 sps:$4 sm:$0xff]   ;;  %v2474_v36 = vld [vmem:[%s3023_s15 + $0x74] ss:$8 sps:$4 sm:$0xff]  }
  0x61   : > { %v2470_v33 = vld [vmem:[%s3023_s15 + $0x264] ss:$8 sps:$4 sm:$0xff]   ;;  %v2473_v35 = vld [vmem:[%s3023_s15 + $0x260] ss:$8 sps:$4 sm:$0xff]   ;;  %v2476_v37 = vld [vmem:[%s3023_s15 + $0x274] ss:$8 sps:$4 sm:$0xff]  }
  0x62   : > { %v2478_v38 = vld [vmem:[%s3023_s15 + $0x70] ss:$8 sps:$4 sm:$0xff]   ;;  %v2480_v40 = vld [vmem:[%s3023_s15 + $0x84] ss:$8 sps:$4 sm:$0xff]   ;;  %v2484_v42 = vld [vmem:[%s3023_s15 + $0x80] ss:$8 sps:$4 sm:$0xff]  }
  0x63   : > { %1693 = vmatpush1.bf16.msra.mxu1 %v2448_v18  ;;  %1779 = vmatpush1.bf16.msra.mxu0 %v2449_v19  ;;  %v2479_v39 = vld [vmem:[%s3023_s15 + $0x270] ss:$8 sps:$4 sm:$0xff]   ;;  %v2482_v41 = vld [vmem:[%s3023_s15 + $0x284] ss:$8 sps:$4 sm:$0xff]   ;;  %v2485_v43 = vld [vmem:[%s3023_s15 + $0x280] ss:$8 sps:$4 sm:$0xff]  }
  0x64   : > { %1694 = vmatprep.subr.bf16.mxu1 %v2450_v20  ;;  %1780 = vmatprep.subr.bf16.mxu0 %v2452_v21  ;;  %v2486_v44 = vld [vmem:[%s3023_s15 + $0x94] ss:$8 sps:$4 sm:$0xff]   ;;  %v2490_v46 = vld [vmem:[%s3023_s15 + $0x90] ss:$8 sps:$4 sm:$0xff]   ;;  %v2492_v48 = vld [vmem:[%s3023_s15 + $0xa4] ss:$8 sps:$4 sm:$0xff]  }
  0x65   : > { %v2488_v45 = vld [vmem:[%s3023_s15 + $0x294] ss:$8 sps:$4 sm:$0xff]   ;;  %v2491_v47 = vld [vmem:[%s3023_s15 + $0x290] ss:$8 sps:$4 sm:$0xff]   ;;  %v2494_v49 = vld [vmem:[%s3023_s15 + $0x2a4] ss:$8 sps:$4 sm:$0xff]  }
  0x66   : > { %v2496_v50 = vld [vmem:[%s3023_s15 + $0xa0] ss:$8 sps:$4 sm:$0xff]   ;;  %v2498_v52 = vld [vmem:[%s3023_s15 + $0xb4] ss:$8 sps:$4 sm:$0xff]   ;;  %v2502_v54 = vld [vmem:[%s3023_s15 + $0xb0] ss:$8 sps:$4 sm:$0xff]  }
  0x67   : > { %1695 = vmatpush1.bf16.msra.mxu1 %v2454_v22  ;;  %1781 = vmatpush1.bf16.msra.mxu0 %v2455_v23  ;;  %v2497_v51 = vld [vmem:[%s3023_s15 + $0x2a0] ss:$8 sps:$4 sm:$0xff]   ;;  %v2500_v53 = vld [vmem:[%s3023_s15 + $0x2b4] ss:$8 sps:$4 sm:$0xff]   ;;  %v2503_v55 = vld [vmem:[%s3023_s15 + $0x2b0] ss:$8 sps:$4 sm:$0xff]  }
  0x68   : > { %1696 = vmatprep.subr.bf16.mxu1 %v2456_v24  ;;  %1782 = vmatprep.subr.bf16.mxu0 %v2458_v25  ;;  %v2504_v56 = vld [vmem:[%s3023_s15 + $0xc4] ss:$8 sps:$4 sm:$0xff]   ;;  %v2508_v58 = vld [vmem:[%s3023_s15 + $0xc0] ss:$8 sps:$4 sm:$0xff]   ;;  %v2510_v60 = vld [vmem:[%s3023_s15 + $0xd4] ss:$8 sps:$4 sm:$0xff]  }
  0x69   : > { %v2506_v57 = vld [vmem:[%s3023_s15 + $0x2c4] ss:$8 sps:$4 sm:$0xff]   ;;  %v2509_v59 = vld [vmem:[%s3023_s15 + $0x2c0] ss:$8 sps:$4 sm:$0xff]   ;;  %v2512_v61 = vld [vmem:[%s3023_s15 + $0x2d4] ss:$8 sps:$4 sm:$0xff]  }
  0x6a   : > { %v2514_v62 = vld [vmem:[%s3023_s15 + $0xd0] ss:$8 sps:$4 sm:$0xff]   ;;  %v2516_v4 = vld [vmem:[%s3023_s15 + $0xe4] ss:$8 sps:$4 sm:$0xff]   ;;  %v2520_v8 = vld [vmem:[%s3023_s15 + $0xe0] ss:$8 sps:$4 sm:$0xff]  }
  0x6b   : > { %1697 = vmatpush1.bf16.msra.mxu1 %v2460_v26  ;;  %1783 = vmatpush1.bf16.msra.mxu0 %v2461_v27  ;;  %v2515_v63 = vld [vmem:[%s3023_s15 + $0x2d0] ss:$8 sps:$4 sm:$0xff]   ;;  %v2518_v7 = vld [vmem:[%s3023_s15 + $0x2e4] ss:$8 sps:$4 sm:$0xff]   ;;  %v2521_v9 = vld [vmem:[%s3023_s15 + $0x2e0] ss:$8 sps:$4 sm:$0xff]  }
  0x6c   : > { %1698 = vmatprep.subr.bf16.mxu1 %v2462_v28  ;;  %1784 = vmatprep.subr.bf16.mxu0 %v2464_v29  ;;  %v2522_v10 = vld [vmem:[%s3023_s15 + $0xf4] ss:$8 sps:$4 sm:$0xff]   ;;  %v2526_v12 = vld [vmem:[%s3023_s15 + $0xf0] ss:$8 sps:$4 sm:$0xff]   ;;  %v2530_v14 = vld [vmem:[%s3023_s15 + $0x104] ss:$8 sps:$4 sm:$0xff]  }
  0x6d   : > { %v2524_v11 = vld [vmem:[%s3023_s15 + $0x2f4] ss:$8 sps:$4 sm:$0xff]   ;;  %v2527_v13 = vld [vmem:[%s3023_s15 + $0x2f0] ss:$8 sps:$4 sm:$0xff]   ;;  %v2533_v15 = vld [vmem:[%s3023_s15 + $0x304] ss:$8 sps:$4 sm:$0xff]  }
  0x6e   : > { %v3094_v16 = vld [vmem:[%s3249_s0 + $0x8] sm:$0xff]  ;;  %v2536_v20 = vld [vmem:[%s3023_s15 + $0x114] ss:$8 sps:$4 sm:$0xff]   ;;  %v2534_v23 = vld [vmem:[%s3023_s15 + $0x110] ss:$8 sps:$4 sm:$0xff]   ;;  %s3261_s30 = smov (!%p845_p9, %s2150_s30), 63 }
  0x6f   : > { %1699 = vmatpush1.bf16.msra.mxu1 %v2466_v30  ;;  %1785 = vmatpush1.bf16.msra.mxu0 %v2467_v31  ;;  %v3099_v17 = vld [vmem:[%s3249_s0 + $0x28] sm:$0xff]  ;;  %v2539_v21 = vld [vmem:[%s3023_s15 + $0x314] ss:$8 sps:$4 sm:$0xff]   ;;  %v2537_v24 = vld [vmem:[%s3023_s15 + $0x310] ss:$8 sps:$4 sm:$0xff]   ;;  %s2151_s5 = sshll.u32 %s3261_s30, 3 }
  0x70   : > { %1700 = vmatprep.subr.bf16.mxu1 %v2468_v32  ;;  %1786 = vmatprep.subr.bf16.mxu0 %v2470_v33  ;;  %v2528_v18 = vld [vmem:[%s3023_s15 + $0x100] ss:$8 sps:$4 sm:$0xff]   ;;  %v2157_v22 = vcombine.high %v3094_v16, %v3099_v17  ;;  %v2542_v25 = vld [vmem:[%s3023_s15 + $0x124] ss:$8 sps:$4 sm:$0xff]   ;;  %v2548_v2 = vld [vmem:[%s3023_s15 + $0x134] ss:$8 sps:$4 sm:$0xff]   ;;  %s3181_s8 = scalar_lea.vmem %s3252_s3, %s2151_s5 }
  0x71   : > { %v2531_v19 = vld [vmem:[%s3023_s15 + $0x300] ss:$8 sps:$4 sm:$0xff]   ;;  %v2545_v26 = vld [vmem:[%s3023_s15 + $0x324] ss:$8 sps:$4 sm:$0xff]   ;;  %v2546_v5 = vld [vmem:[%s3023_s15 + $0x130] ss:$8 sps:$4 sm:$0xff]  }
  0x72   : > { %v2540_v0 = vld [vmem:[%s3023_s15 + $0x120] ss:$8 sps:$4 sm:$0xff]   ;;  %v2554_v27 = vld [vmem:[%s3023_s15 + $0x144] ss:$8 sps:$4 sm:$0xff]   ;;  %v2560_v31 = vld [vmem:[%s3023_s15 + $0x154] ss:$8 sps:$4 sm:$0xff]  }
  0x73   : > { %1701 = vmatpush1.bf16.msra.mxu1 %v2472_v34  ;;  %1787 = vmatpush1.bf16.msra.mxu0 %v2473_v35  ;;  %v2543_v1 = vld [vmem:[%s3023_s15 + $0x320] ss:$8 sps:$4 sm:$0xff]   ;;  %v2557_v28 = vld [vmem:[%s3023_s15 + $0x344] ss:$8 sps:$4 sm:$0xff]   ;;  %v2563_v32 = vld [vmem:[%s3023_s15 + $0x354] ss:$8 sps:$4 sm:$0xff]  }
  0x74   : > { %1702 = vmatprep.subr.bf16.mxu1 %v2474_v36  ;;  %1788 = vmatprep.subr.bf16.mxu0 %v2476_v37  ;;  %v2552_v29 = vld [vmem:[%s3023_s15 + $0x140] ss:$8 sps:$4 sm:$0xff]   ;;  %v2558_v33 = vld [vmem:[%s3023_s15 + $0x150] ss:$8 sps:$4 sm:$0xff]   ;;  %v2566_v36 = vld [vmem:[%s3023_s15 + $0x164] ss:$8 sps:$4 sm:$0xff]  }
  0x75   : > { %v2555_v30 = vld [vmem:[%s3023_s15 + $0x340] ss:$8 sps:$4 sm:$0xff]   ;;  %v3133_v34 = vld [vmem:[%s3249_s0 + $0x18] sm:$0xff]  ;;  %v2569_v37 = vld [vmem:[%s3023_s15 + $0x364] ss:$8 sps:$4 sm:$0xff]   ;;  %s2149_s9 = sshll.u32 %s2654_s17, 1 }
  0x76   : > { %v2561_v35 = vld [vmem:[%s3023_s15 + $0x350] ss:$8 sps:$4 sm:$0xff]   ;;  %p840_p10 = scmp.lt.s32.totalorder %s2149_s9, 3  ;;  %p851_p11 = scmp.lt.s32.totalorder %s2654_s17, 1 }
  0x77   : > { %1703 = vmatpush1.bf16.msra.mxu1 %v2478_v38  ;;  %1789 = vmatpush1.bf16.msra.mxu0 %v2479_v39  ;;  %v3141_v38 = vld [vmem:[%s3249_s0 + $0x38] sm:$0xff] }
  0x78   : > { %1704 = vmatprep.subr.bf16.mxu1 %v2480_v40  ;;  %1790 = vmatprep.subr.bf16.mxu0 %v2482_v41  ;;  %v2161_v39 = vcombine.high %v3133_v34, %v3141_v38  ;;  %v2564_v40 = vld [vmem:[%s3023_s15 + $0x160] ss:$8 sps:$4 sm:$0xff]   ;;  %s3263_s9 = smov (!%p840_p10, %s2149_s9), 3  ;;  %s3265_s17 = smov (!%p851_p11, %s2654_s17), 1 }
  0x79   : > { %v2567_v41 = vld [vmem:[%s3023_s15 + $0x360] ss:$8 sps:$4 sm:$0xff]   ;;  %s842_s12 = scalar_lea.vmem %s3251_s2, %s3263_s9  ;;  %s2293_s13 = sshll.u32 %s3265_s17, 4 }
  0x7a   : > { %s858_s21 = scalar_lea.vmem %s3253_s4, %s2293_s13 }
  0x7b   : > { %1705 = vmatpush1.bf16.msra.mxu1 %v2484_v42  ;;  %1791 = vmatpush1.bf16.msra.mxu0 %v2485_v43  ;;  %v2572_v42 = vld [vmem:[%s3023_s15 + $0x174] ss:$8 sps:$4 sm:$0xff]  }
  0x7c   : > { %1706 = vmatprep.subr.bf16.mxu1 %v2486_v44  ;;  %1792 = vmatprep.subr.bf16.mxu0 %v2488_v45  ;;  %v2575_v43 = vld [vmem:[%s3023_s15 + $0x374] ss:$8 sps:$4 sm:$0xff]   ;;  %v2570_v44 = vld [vmem:[%s3023_s15 + $0x170] ss:$8 sps:$4 sm:$0xff]  }
  0x7d   : > { %v2573_v45 = vld [vmem:[%s3023_s15 + $0x370] ss:$8 sps:$4 sm:$0xff]  }
  0x7f   : > { %1707 = vmatpush1.bf16.msra.mxu1 %v2490_v46  ;;  %1793 = vmatpush1.bf16.msra.mxu0 %v2491_v47  ;;  %v2578_v46 = vld [vmem:[%s3023_s15 + $0x184] ss:$8 sps:$4 sm:$0xff]  }
  0x80   : > { %1708 = vmatprep.subr.bf16.mxu1 %v2492_v48  ;;  %1794 = vmatprep.subr.bf16.mxu0 %v2494_v49  ;;  %v2581_v47 = vld [vmem:[%s3023_s15 + $0x384] ss:$8 sps:$4 sm:$0xff]   ;;  %v2576_v48 = vld [vmem:[%s3023_s15 + $0x180] ss:$8 sps:$4 sm:$0xff]  }
  0x81   : > { %v2579_v49 = vld [vmem:[%s3023_s15 + $0x380] ss:$8 sps:$4 sm:$0xff]  }
  0x83   : > { %1709 = vmatpush1.bf16.msra.mxu1 %v2496_v50  ;;  %1795 = vmatpush1.bf16.msra.mxu0 %v2497_v51  ;;  %v2584_v50 = vld [vmem:[%s3023_s15 + $0x194] ss:$8 sps:$4 sm:$0xff]  }
  0x84   : > { %1710 = vmatprep.subr.bf16.mxu1 %v2498_v52  ;;  %1796 = vmatprep.subr.bf16.mxu0 %v2500_v53  ;;  %v2587_v51 = vld [vmem:[%s3023_s15 + $0x394] ss:$8 sps:$4 sm:$0xff]   ;;  %v2582_v52 = vld [vmem:[%s3023_s15 + $0x190] ss:$8 sps:$4 sm:$0xff]  }
  0x85   : > { %v2585_v53 = vld [vmem:[%s3023_s15 + $0x390] ss:$8 sps:$4 sm:$0xff]  }
  0x87   : > { %1711 = vmatpush1.bf16.msra.mxu1 %v2502_v54  ;;  %1797 = vmatpush1.bf16.msra.mxu0 %v2503_v55  ;;  %v2590_v54 = vld [vmem:[%s3023_s15 + $0x1a4] ss:$8 sps:$4 sm:$0xff]  }
  0x88   : > { %1712 = vmatprep.subr.bf16.mxu1 %v2504_v56  ;;  %1798 = vmatprep.subr.bf16.mxu0 %v2506_v57  ;;  %v2593_v55 = vld [vmem:[%s3023_s15 + $0x3a4] ss:$8 sps:$4 sm:$0xff]   ;;  %v2588_v56 = vld [vmem:[%s3023_s15 + $0x1a0] ss:$8 sps:$4 sm:$0xff]  }
  0x89   : > { %v2591_v57 = vld [vmem:[%s3023_s15 + $0x3a0] ss:$8 sps:$4 sm:$0xff]  }
  0x8b   : > { %1713 = vmatpush1.bf16.msra.mxu1 %v2508_v58  ;;  %1799 = vmatpush1.bf16.msra.mxu0 %v2509_v59  ;;  %v2596_v58 = vld [vmem:[%s3023_s15 + $0x1b4] ss:$8 sps:$4 sm:$0xff]  }
  0x8c   : > { %1714 = vmatprep.subr.bf16.mxu1 %v2510_v60  ;;  %1800 = vmatprep.subr.bf16.mxu0 %v2512_v61  ;;  %v2599_v59 = vld [vmem:[%s3023_s15 + $0x3b4] ss:$8 sps:$4 sm:$0xff]   ;;  %v2594_v60 = vld [vmem:[%s3023_s15 + $0x1b0] ss:$8 sps:$4 sm:$0xff]  }
  0x8d   : > { %v2597_v61 = vld [vmem:[%s3023_s15 + $0x3b0] ss:$8 sps:$4 sm:$0xff]  }
  0x8f   : > { %1715 = vmatpush1.bf16.msra.mxu1 %v2514_v62  ;;  %1801 = vmatpush1.bf16.msra.mxu0 %v2515_v63  ;;  %v2602_v62 = vld [vmem:[%s3023_s15 + $0x1c4] ss:$8 sps:$4 sm:$0xff]  }
  0x90   : > { %1716 = vmatprep.subr.bf16.mxu1 %v2516_v4  ;;  %1802 = vmatprep.subr.bf16.mxu0 %v2518_v7  ;;  %v2605_v63 = vld [vmem:[%s3023_s15 + $0x3c4] ss:$8 sps:$4 sm:$0xff]   ;;  %v2600_v4 = vld [vmem:[%s3023_s15 + $0x1c0] ss:$8 sps:$4 sm:$0xff]  }
  0x91   : > { %v2603_v7 = vld [vmem:[%s3023_s15 + $0x3c0] ss:$8 sps:$4 sm:$0xff]  }
  0x93   : > { %1717 = vmatpush1.bf16.msra.mxu1 %v2520_v8  ;;  %1803 = vmatpush1.bf16.msra.mxu0 %v2521_v9  ;;  %v2608_v8 = vld [vmem:[%s3023_s15 + $0x1d4] ss:$8 sps:$4 sm:$0xff]  }
  0x94   : > { %1718 = vmatprep.subr.bf16.mxu1 %v2522_v10  ;;  %1804 = vmatprep.subr.bf16.mxu0 %v2524_v11  ;;  %v2611_v9 = vld [vmem:[%s3023_s15 + $0x3d4] ss:$8 sps:$4 sm:$0xff]   ;;  %v2606_v10 = vld [vmem:[%s3023_s15 + $0x1d0] ss:$8 sps:$4 sm:$0xff]  }
  0x95   : > { %v2609_v11 = vld [vmem:[%s3023_s15 + $0x3d0] ss:$8 sps:$4 sm:$0xff]  }
  0x97   : > { %1719 = vmatpush1.bf16.msra.mxu1 %v2526_v12  ;;  %1805 = vmatpush1.bf16.msra.mxu0 %v2527_v13  ;;  %v2614_v12 = vld [vmem:[%s3023_s15 + $0x1e4] ss:$8 sps:$4 sm:$0xff]  }
  0x98   : > { %1731 = vmatprep.subr.bf16.mxu1 %v2530_v14  ;;  %1817 = vmatprep.subr.bf16.mxu0 %v2533_v15  ;;  %v2617_v13 = vld [vmem:[%s3023_s15 + $0x3e4] ss:$8 sps:$4 sm:$0xff]   ;;  %v2612_v14 = vld [vmem:[%s3023_s15 + $0x1e0] ss:$8 sps:$4 sm:$0xff]  }
  0x99   : > { %v2615_v15 = vld [vmem:[%s3023_s15 + $0x3e0] ss:$8 sps:$4 sm:$0xff]  }
  0x9a   : > { %1721 = vmatmul.mubr.bf16.vlgmr.msra.gmra.mrb[0].mxu1 %v2154_v3  ;;  %1807 = vmatmul.mubr.bf16.vlgmr.msra.gmra.mrb[0].mxu0 %v2158_v6  ;;  %v2551_v3 = vld [vmem:[%s3023_s15 + $0x334] ss:$8 sps:$4 sm:$0xff]   ;;  %v2549_v6 = vld [vmem:[%s3023_s15 + $0x330] ss:$8 sps:$4 sm:$0xff]  }
  0x9b   : > { %1732 = vmatpush1.bf16.msra.mxu1 %v2528_v18  ;;  %1818 = vmatpush1.bf16.msra.mxu0 %v2531_v19  ;;  %v2620_v18 = vld [vmem:[%s3023_s15 + $0x1f4] ss:$8 sps:$4 sm:$0xff]  }
  0x9c   : > { %1733 = vmatprep.subr.bf16.mxu1 %v2536_v20  ;;  %1819 = vmatprep.subr.bf16.mxu0 %v2539_v21  ;;  %v2623_v19 = vld [vmem:[%s3023_s15 + $0x3f4] ss:$8 sps:$4 sm:$0xff]   ;;  %v1911_v20 = vld [vmem:[%s3181_s8 + $0x80] sm:$0xff]  ;;  %v1912_v21 = vld [vmem:[%s3181_s8 + $0x88] sm:$0xff] }
  0x9d   : > { %1763 = vmatprep.mubr.bf16.mxu1 %v2157_v22  ;;  %1849 = vmatprep.mubr.bf16.mxu0 %v2161_v39  ;;  %v2618_v22 = vld [vmem:[%s3023_s15 + $0x1f0] ss:$8 sps:$4 sm:$0xff]   ;;  %v1919_v39 = vld [vmem:[%s3181_s8 + $0xc0] sm:$0xff] }
  0x9f   : > { %1734 = vmatpush1.bf16.msra.mxu1 %v2534_v23  ;;  %1820 = vmatpush1.bf16.msra.mxu0 %v2537_v24  ;;  %v2621_v23 = vld [vmem:[%s3023_s15 + $0x3f0] ss:$8 sps:$4 sm:$0xff]   ;;  %v2332_v24 = vpack.c.bf16 %v1912_v21, %v1911_v20 }
  0xa0   : > { %1735 = vmatprep.subr.bf16.mxu1 %v2542_v25  ;;  %1821 = vmatprep.subr.bf16.mxu0 %v2545_v26  ;;  %v1895_v25 = vld [vmem:[%s3181_s8] sm:$0xff]  ;;  %v1896_v26 = vld [vmem:[%s3181_s8 + $0x8] sm:$0xff] }
  0xa3   : > { %1736 = vmatpush1.bf16.msra.mxu1 %v2540_v0  ;;  %1822 = vmatpush1.bf16.msra.mxu0 %v2543_v1  ;;  %v1913_v0 = vld [vmem:[%s3181_s8 + $0x90] sm:$0xff]  ;;  %v1914_v1 = vld [vmem:[%s3181_s8 + $0x98] sm:$0xff] }
  0xa4   : > { %1737 = vmatprep.subr.bf16.mxu1 %v2548_v2  ;;  %1823 = vmatprep.subr.bf16.mxu0 %v2551_v3  ;;  %v2156_v2 = vcombine.low %v3094_v16, %v3099_v17  ;;  %v2160_v3 = vcombine.low %v3133_v34, %v3141_v38  ;;  %v1918_v34 = vld [vmem:[%s3181_s8 + $0xb8] sm:$0xff] }
  0xa5   : > { %v1902_v38 = vld [vmem:[%s3181_s8 + $0x38] sm:$0xff] }
  0xa7   : > { %1738 = vmatpush1.bf16.msra.mxu1 %v2546_v5  ;;  %1824 = vmatpush1.bf16.msra.mxu0 %v2549_v6  ;;  %v2334_v5 = vpack.c.bf16 %v1896_v26, %v1895_v25  ;;  %v2336_v6 = vpack.c.bf16 %v1914_v1, %v1913_v0 }
  0xa8   : > { %1739 = vmatprep.subr.bf16.mxu1 %v2554_v27  ;;  %1825 = vmatprep.subr.bf16.mxu0 %v2557_v28  ;;  %v1897_v27 = vld [vmem:[%s3181_s8 + $0x10] sm:$0xff]  ;;  %v1898_v28 = vld [vmem:[%s3181_s8 + $0x18] sm:$0xff] }
  0xa9   : > { %v2338_v16 = vpack.c.bf16 %v1898_v28, %v1897_v27 }
  0xab   : > { %1740 = vmatpush1.bf16.msra.mxu1 %v2552_v29  ;;  %1826 = vmatpush1.bf16.msra.mxu0 %v2555_v30  ;;  %v1915_v29 = vld [vmem:[%s3181_s8 + $0xa0] sm:$0xff]  ;;  %v1916_v30 = vld [vmem:[%s3181_s8 + $0xa8] sm:$0xff] }
  0xac   : > { %1741 = vmatprep.subr.bf16.mxu1 %v2560_v31  ;;  %1827 = vmatprep.subr.bf16.mxu0 %v2563_v32  ;;  %v2340_v17 = vpack.c.bf16 %v1916_v30, %v1915_v29  ;;  %v1899_v31 = vld [vmem:[%s3181_s8 + $0x20] sm:$0xff]  ;;  %v1900_v32 = vld [vmem:[%s3181_s8 + $0x28] sm:$0xff] }
  0xaf   : > { %1742 = vmatpush1.bf16.msra.mxu1 %v2558_v33  ;;  %1828 = vmatpush1.bf16.msra.mxu0 %v2561_v35  ;;  %v1917_v33 = vld [vmem:[%s3181_s8 + $0xb0] sm:$0xff]  ;;  %v2342_v35 = vpack.c.bf16 %v1900_v32, %v1899_v31 }
  0xb0   : > { %1743 = vmatprep.subr.bf16.mxu1 %v2566_v36  ;;  %1829 = vmatprep.subr.bf16.mxu0 %v2569_v37  ;;  %v2344_v36 = vpack.c.bf16 %v1918_v34, %v1917_v33  ;;  %v1901_v37 = vld [vmem:[%s3181_s8 + $0x30] sm:$0xff] }
  0xb3   : > { %1744 = vmatpush1.bf16.msra.mxu1 %v2564_v40  ;;  %1830 = vmatpush1.bf16.msra.mxu0 %v2567_v41  ;;  %v1920_v40 = vld [vmem:[%s3181_s8 + $0xc8] sm:$0xff]  ;;  %v2346_v41 = vpack.c.bf16 %v1902_v38, %v1901_v37 }
  0xb4   : > { %1745 = vmatprep.subr.bf16.mxu1 %v2572_v42  ;;  %1831 = vmatprep.subr.bf16.mxu0 %v2575_v43  ;;  %v2348_v42 = vpack.c.bf16 %v1920_v40, %v1919_v39  ;;  %v1903_v43 = vld [vmem:[%s3181_s8 + $0x40] sm:$0xff] }
  0xb7   : > { %1746 = vmatpush1.bf16.msra.mxu1 %v2570_v44  ;;  %1832 = vmatpush1.bf16.msra.mxu0 %v2573_v45  ;;  %v1904_v44 = vld [vmem:[%s3181_s8 + $0x48] sm:$0xff]  ;;  %v1921_v45 = vld [vmem:[%s3181_s8 + $0xd0] sm:$0xff] }
  0xb8   : > { %1747 = vmatprep.subr.bf16.mxu1 %v2578_v46  ;;  %1833 = vmatprep.subr.bf16.mxu0 %v2581_v47  ;;  %v1922_v46 = vld [vmem:[%s3181_s8 + $0xd8] sm:$0xff]  ;;  %v2350_v47 = vpack.c.bf16 %v1904_v44, %v1903_v43 }
  0xbb   : > { %1748 = vmatpush1.bf16.msra.mxu1 %v2576_v48  ;;  %1834 = vmatpush1.bf16.msra.mxu0 %v2579_v49  ;;  %v2352_v48 = vpack.c.bf16 %v1922_v46, %v1921_v45  ;;  %v1905_v49 = vld [vmem:[%s3181_s8 + $0x50] sm:$0xff] }
  0xbc   : > { %1749 = vmatprep.subr.bf16.mxu1 %v2584_v50  ;;  %1835 = vmatprep.subr.bf16.mxu0 %v2587_v51  ;;  %v1906_v50 = vld [vmem:[%s3181_s8 + $0x58] sm:$0xff] }
  0xbd   : > { %v2354_v51 = vpack.c.bf16 %v1906_v50, %v1905_v49 }
  0xbf   : > { %1750 = vmatpush1.bf16.msra.mxu1 %v2582_v52  ;;  %1836 = vmatpush1.bf16.msra.mxu0 %v2585_v53  ;;  %v1923_v52 = vld [vmem:[%s3181_s8 + $0xe0] sm:$0xff]  ;;  %v1924_v53 = vld [vmem:[%s3181_s8 + $0xe8] sm:$0xff] }
  0xc0   : > { %1751 = vmatprep.subr.bf16.mxu1 %v2590_v54  ;;  %1837 = vmatprep.subr.bf16.mxu0 %v2593_v55  ;;  %v2356_v54 = vpack.c.bf16 %v1924_v53, %v1923_v52  ;;  %v1907_v55 = vld [vmem:[%s3181_s8 + $0x60] sm:$0xff] }
  0xc3   : > { %1752 = vmatpush1.bf16.msra.mxu1 %v2588_v56  ;;  %1838 = vmatpush1.bf16.msra.mxu0 %v2591_v57  ;;  %v1908_v56 = vld [vmem:[%s3181_s8 + $0x68] sm:$0xff] }
  0xc4   : > { %1753 = vmatprep.subr.bf16.mxu1 %v2596_v58  ;;  %1839 = vmatprep.subr.bf16.mxu0 %v2599_v59  ;;  %v2358_v57 = vpack.c.bf16 %v1908_v56, %v1907_v55  ;;  %v1925_v58 = vld [vmem:[%s3181_s8 + $0xf0] sm:$0xff]  ;;  %v1926_v59 = vld [vmem:[%s3181_s8 + $0xf8] sm:$0xff] }
  0xc7   : > { %1754 = vmatpush1.bf16.msra.mxu1 %v2594_v60  ;;  %1840 = vmatpush1.bf16.msra.mxu0 %v2597_v61  ;;  %v2360_v60 = vpack.c.bf16 %v1926_v59, %v1925_v58  ;;  %v1909_v61 = vld [vmem:[%s3181_s8 + $0x70] sm:$0xff] }
  0xc8   : > { %1755 = vmatprep.subr.bf16.mxu1 %v2602_v62  ;;  %1841 = vmatprep.subr.bf16.mxu0 %v2605_v63  ;;  %v1910_v62 = vld [vmem:[%s3181_s8 + $0x78] sm:$0xff] }
  0xc9   : > { %v2362_v63 = vpack.c.bf16 %v1910_v62, %v1909_v61 }
  0xcb   : > { %1756 = vmatpush1.bf16.msra.mxu1 %v2600_v4  ;;  %1842 = vmatpush1.bf16.msra.mxu0 %v2603_v7  ;;  %v1877_v4 = vlaneseq }
  0xcc   : > { %1757 = vmatprep.subr.bf16.mxu1 %v2608_v8  ;;  %1843 = vmatprep.subr.bf16.mxu0 %v2611_v9  ;;  %v1875_v9 = vld [vmem:[%s842_s12] sm:$0x3] }
  0xcd   : > { %v1878_v7 = vshrl.u32 %v1877_v4, 7 }
  0xcf   : > { %1758 = vmatpush1.bf16.msra.mxu1 %v2606_v10  ;;  %1844 = vmatpush1.bf16.msra.mxu0 %v2609_v11  ;;  %v1879_v8 = vsub.s32 0, %v1878_v7  ;;  %v1883_v10 = vsub.s32 1, %v1878_v7 }
  0xd0   : > { %1759 = vmatprep.subr.bf16.mxu1 %v2614_v12  ;;  %1845 = vmatprep.subr.bf16.mxu0 %v2617_v13 }
  0xd1   : > { %v1880_v11 = vrot.slane %v1875_v9, %v1879_v8 }
  0xd3   : > { %1760 = vmatpush1.bf16.msra.mxu1 %v2612_v14  ;;  %1846 = vmatpush1.bf16.msra.mxu0 %v2615_v15  ;;  %v1884_v14 = vrot.slane %v1875_v9, %v1883_v10 }
  0xd4   : > { %1761 = vmatprep.subr.bf16.mxu1 %v2620_v18  ;;  %1847 = vmatprep.subr.bf16.mxu0 %v2623_v19 }
  0xd7   : > { %1762 = vmatpush1.bf16.msra.mxu1 %v2618_v22  ;;  %1848 = vmatpush1.bf16.msra.mxu0 %v2621_v23 }
  0xd8   : > { %2333 = vmatprep.subr.bf16.mxu0 %v2332_v24  ;;  %2364 = vmatprep.subr.bf16.mxu1 %v2332_v24 }
  0xda   : > { %1764 = vmatmul.mubr.bf16.vlgmr.msra.gmra.mrb[0].mxu1 %v2156_v2  ;;  %1850 = vmatmul.mubr.bf16.vlgmr.msra.gmra.mrb[0].mxu0 %v2160_v3 }
  0xdb   : > { %2335 = vmatpush3.bf16.msra.mxu0 %v2334_v5  ;;  %2372 = vmatpush3.bf16.msra.mxu1 %v2334_v5 }
  0xdc   : > { %2337 = vmatprep.subr.bf16.mxu0 %v2336_v6  ;;  %2365 = vmatprep.subr.bf16.mxu1 %v2336_v6 }
  0xdf   : > { %2339 = vmatpush3.bf16.msra.mxu0 %v2338_v16  ;;  %2373 = vmatpush3.bf16.msra.mxu1 %v2338_v16 }
  0xe0   : > { %2341 = vmatprep.subr.bf16.mxu0 %v2340_v17  ;;  %2366 = vmatprep.subr.bf16.mxu1 %v2340_v17 }
  0xe3   : > { %2343 = vmatpush3.bf16.msra.mxu0 %v2342_v35  ;;  %2374 = vmatpush3.bf16.msra.mxu1 %v2342_v35 }
  0xe4   : > { %2345 = vmatprep.subr.bf16.mxu0 %v2344_v36  ;;  %2367 = vmatprep.subr.bf16.mxu1 %v2344_v36 }
  0xe7   : > { %2347 = vmatpush3.bf16.msra.mxu0 %v2346_v41  ;;  %2375 = vmatpush3.bf16.msra.mxu1 %v2346_v41 }
  0xe8   : > { %2349 = vmatprep.subr.bf16.mxu0 %v2348_v42  ;;  %2368 = vmatprep.subr.bf16.mxu1 %v2348_v42 }
  0xeb   : > { %2351 = vmatpush3.bf16.msra.mxu0 %v2350_v47  ;;  %2376 = vmatpush3.bf16.msra.mxu1 %v2350_v47 }
  0xec   : > { %2353 = vmatprep.subr.bf16.mxu0 %v2352_v48  ;;  %2369 = vmatprep.subr.bf16.mxu1 %v2352_v48 }
  0xef   : > { %2355 = vmatpush3.bf16.msra.mxu0 %v2354_v51  ;;  %2377 = vmatpush3.bf16.msra.mxu1 %v2354_v51 }
  0xf0   : > { %2357 = vmatprep.subr.bf16.mxu0 %v2356_v54  ;;  %2370 = vmatprep.subr.bf16.mxu1 %v2356_v54 }
  0xf3   : > { %2359 = vmatpush3.bf16.msra.mxu0 %v2358_v57  ;;  %2378 = vmatpush3.bf16.msra.mxu1 %v2358_v57 }
  0xf4   : > { %2361 = vmatprep.subr.bf16.mxu0 %v2360_v60  ;;  %2371 = vmatprep.subr.bf16.mxu1 %v2360_v60 }
  0xf7   : > { %2363 = vmatpush3.bf16.msra.mxu0 %v2362_v63  ;;  %2379 = vmatpush3.bf16.msra.mxu1 %v2362_v63 }
 0x1ad   : > { %v1765_v12 = vpop.f32.mrb[0].mxu1  ;;  %v1851_v13 = vpop.f32.mrb[0].mxu0 }
 0x1ae   : > { %v2380_v15 = vadd.f32 %v1851_v13, %v1765_v12  ;;  %v1767_v18 = vpop.f32.mrb[1].mxu1  ;;  %v1853_v19 = vpop.f32.mrb[1].mxu0 }
 0x1af   : > { %v2381_v20 = vadd.f32 %v1853_v19, %v1767_v18  ;;  %v1769_v21 = vpop.f32.mrb[2].mxu1  ;;  %v1855_v22 = vpop.f32.mrb[2].mxu0 }
 0x1b0   : > { %v1887_v23 = vadd.f32 %v2380_v15, %v1880_v11  ;;  %v2382_v24 = vadd.f32 %v1855_v22, %v1769_v21  ;;  %v1771_v25 = vpop.f32.mrb[3].mxu1  ;;  %v1857_v26 = vpop.f32.mrb[3].mxu0 }
 0x1b1   : > { %v1888_v0 = vadd.f32 %v2381_v20, %v1884_v14  ;;  %v2383_v1 = vadd.f32 %v1857_v26, %v1771_v25 }
 0x1b2   : > { %v1889_v2 = vadd.f32 %v2382_v24, %v1880_v11  ;;  %v1891_v6 = vmax.f32 %v1887_v23, 0.0 }
 0x1b3   : > { %v1892_v3 = vmax.f32 %v1888_v0, 0.0  ;;  %v1890_v5 = vadd.f32 %v2383_v1, %v1884_v14 }
 0x1b4   : > { %v1893_v28 = vmax.f32 %v1889_v2, 0.0 }
 0x1b5   : > { %v1894_v27 = vmax.f32 %v1890_v5, 0.0  ;;  %1991 = vmatprep.mubr.f32.mxu0 %v1892_v3 }
 0x1b6   : > { %1992 = vmatmul.mubr.f32.vlgmr.msra.gmra.mrb[4].mxu0 %v1891_v6 }
 0x1b7   : > { %1996 = vmatprep.mubr.f32.mxu1 %v1894_v27 }
 0x1b8   : > { %1997 = vmatmul.mubr.f32.vlgmr.msra.gmra.mrb[4].mxu1 %v1893_v28 }
 0x289   : > { %v2326_v29 = vpop.f32.mrb[4].mxu0 }
 0x28a   : > { %v2327_v30 = vpop.f32.mrb[5].mxu0 }
 0x28b   : > { %v2328_v16 = vadd.f32 %v2327_v30, %v2326_v29  ;;  %v2329_v17 = vpop.f32.mrb[4].mxu1 }
 0x28c   : > { %v2330_v31 = vpop.f32.mrb[5].mxu1 }
 0x28d   : > { %2002 = vst [vmem:[%s858_s21] sm:$0xff] %v2328_v16  ;;  %v2331_v32 = vadd.f32 %v2330_v31, %v2329_v17 }
 0x28f   : > { %2003 = vst [vmem:[%s858_s21 + $0x8] sm:$0xff] %v2331_v32 }
 0x290 PF: > { %s14_s19 = sadd.s32 1, %s2662_s19   ;;  %s3254_s15 = smov %s2650_s16 }
 0x291   : > { %p11_p12 = scmp.ge.s32.totalorder %s14_s19, 4   ;;  %s3255_s16 = smov %s2724_s23 }
 0x292   : > { %s3256_s17 = smov %s2658_s18  ;;  %s3257_s18 = smov %s3259_s20 }
 0x293   :  { %13 = sbr.rel (!%p11_p12) target bundleno = 3 (0x3), region = 126 }

</bundles_post_ra>
